<compile_context>
chip_gen: v5e
topology: v5e:2x2
jax: 0.10.0
libtpu: 0.0.40
codegen_flags: <defaults>
</compile_context>

<pallas_src>
import functools

import numpy as np
import jax
import jax.numpy as jnp
from jax.experimental import pallas as pl
from jax.experimental.pallas import tpu as pltpu


# Row tile for the pipelined grids (multiple of 8; raise further if VMEM allows
# - budget 2 double-buffered tiles per streamed input against _VMEM_LIMIT).
_ROW_TILE = 512
# Scoped-VMEM budget; fits v5e/v6e (128 MiB) and v7x (64 MiB physical).
_VMEM_LIMIT = 32 * 1024 * 1024


# ----------------------------- tiling helpers -----------------------------

def _round_up(x, m):
    return ((x + m - 1) // m) * m


def _pad_rows(x, rows):
    pad = rows - x.shape[0]
    if pad == 0:
        return x
    cfg = [(0, pad)] + [(0, 0)] * (x.ndim - 1)
    return jnp.pad(x, cfg)


def _row_tiles(m, cap=_ROW_TILE):
    """Pick (tile_rows, padded_rows, num_tiles): tile multiple of 8, <= cap."""
    mp = _round_up(max(m, 1), 8)
    if mp <= cap:
        return mp, mp, 1
    tm = (cap // 8) * 8
    mp = _round_up(m, tm)
    return tm, mp, mp // tm


def _edge_row_tiles(m, rep, cap=_ROW_TILE):
    """Row tiling where tile_rows % rep == 0 and (tile_rows // rep) % 8 == 0."""
    unit = 8 * rep
    mp = _round_up(max(m, 1), unit)
    if mp <= cap:
        return mp, mp, 1
    tm = max(cap // unit, 1) * unit
    mp = _round_up(m, tm)
    return tm, mp, mp // tm


# ----------------------------- kernel: linear -----------------------------

def _linear_kernel(x_ref, w_ref, b_ref, o_ref, *, relu):
    acc = jnp.dot(x_ref[...], w_ref[...], preferred_element_type=jnp.float32)
    acc = acc + b_ref[...]
    if relu:
        acc = jnp.maximum(acc, 0.0)
    o_ref[...] = acc.astype(o_ref.dtype)


def pallas_linear(x, w, b, *, relu=False, out_dtype=jnp.bfloat16):
    """Row-tiled o = act(x @ w + b); bf16 matmul operands, f32 accumulation."""
    m, k = x.shape
    n = w.shape[1]
    tm, mp, nt = _row_tiles(m)
    xp = _pad_rows(x.astype(jnp.bfloat16), mp)
    # TODO(synk): for very large resident weights, K-tile the matmul instead of
    # loading the full (k, n) block (v7x VMEM ceiling).
    out = pl.pallas_call(
        functools.partial(_linear_kernel, relu=relu),
        out_shape=jax.ShapeDtypeStruct((mp, n), out_dtype),
        grid=(nt,),
        in_specs=[
            pl.BlockSpec((tm, k), lambda i: (i, 0)),
            pl.BlockSpec((k, n), lambda i: (0, 0)),
            pl.BlockSpec((1, n), lambda i: (0, 0)),
        ],
        out_specs=pl.BlockSpec((tm, n), lambda i: (i, 0)),
        compiler_params=pltpu.CompilerParams(
            dimension_semantics=("parallel",), vmem_limit_bytes=_VMEM_LIMIT),
    )(xp, w.astype(jnp.bfloat16), b.reshape(1, n).astype(jnp.float32))
    if mp != m:
        out = out[:m]
    return out


# --------- kernel: fused encoder edge head + gumbel-softmax + KL ----------

def _enc_edge_kernel(ef_ref, g_ref, w2_ref, b2_ref, w3_ref, b3_ref, lp_ref,
                     edges_ref, klp_ref, *, tau, hard, rows_valid, tile_rows,
                     kl_scale, eps):
    i = pl.program_id(0)
    h = jnp.dot(ef_ref[...], w2_ref[...], preferred_element_type=jnp.float32)
    h = jnp.maximum(h + b2_ref[...], 0.0)
    logits = jnp.dot(h.astype(jnp.bfloat16), w3_ref[...],
                     preferred_element_type=jnp.float32) + b3_ref[...]

    # gumbel-softmax sample (forward value); exact softmax division.
    y = (logits + g_ref[...]) * (1.0 / tau)
    y = y - jnp.max(y, axis=-1, keepdims=True)
    ey = jnp.exp(y)
    soft = ey / jnp.sum(ey, axis=-1, keepdims=True)
    if hard:
        # TODO(synk): forward-only hard one-hot; no straight-through gradient.
        am = jnp.argmax(soft, axis=-1)[:, None]
        lane = jax.lax.broadcasted_iota(jnp.int32, soft.shape, 1)
        edges = (lane == am).astype(jnp.float32)
    else:
        edges = soft
    edges_ref[...] = edges

    # prob = softmax(logits) never leaves VMEM; exact division on the loss path.
    z = logits - jnp.max(logits, axis=-1, keepdims=True)
    ez = jnp.exp(z)
    prob = ez / jnp.sum(ez, axis=-1, keepdims=True)
    row = i * tile_rows + jax.lax.broadcasted_iota(jnp.int32, (tile_rows, 1), 0)
    mask = (row < rows_valid).astype(jnp.float32)
    kl_part = jnp.sum(mask * prob * (jnp.log(prob + eps) - lp_ref[...])) * kl_scale
    # per-tile partial sum on a parallel axis (reduced in the wrapper)
    klp_ref[...] = jnp.broadcast_to(kl_part, klp_ref.shape).astype(klp_ref.dtype)


def pallas_encoder_edges(edge_feat, gumbel, w2, b2, w3, b3, log_prior, *,
                         tau, hard, num_sims, num_atoms, eps=1e-16):
    r, f2 = edge_feat.shape
    h = w2.shape[1]
    k = w3.shape[1]
    tm, rp, nt = _row_tiles(r)
    ef = _pad_rows(edge_feat.astype(jnp.bfloat16), rp)
    gum = _pad_rows(gumbel.astype(jnp.float32), rp)
    kern = functools.partial(
        _enc_edge_kernel, tau=float(tau), hard=bool(hard), rows_valid=r,
        tile_rows=tm, kl_scale=1.0 / (num_sims * num_atoms), eps=eps)
    edges, klp = pl.pallas_call(
        kern,
        out_shape=(jax.ShapeDtypeStruct((rp, k), jnp.float32),
                   jax.ShapeDtypeStruct((nt, 8, 128), jnp.float32)),
        grid=(nt,),
        in_specs=[
            pl.BlockSpec((tm, f2), lambda i: (i, 0)),
            pl.BlockSpec((tm, k), lambda i: (i, 0)),
            pl.BlockSpec((f2, h), lambda i: (0, 0)),
            pl.BlockSpec((1, h), lambda i: (0, 0)),
            pl.BlockSpec((h, k), lambda i: (0, 0)),
            pl.BlockSpec((1, k), lambda i: (0, 0)),
            pl.BlockSpec((1, k), lambda i: (0, 0)),
        ],
        out_specs=(pl.BlockSpec((tm, k), lambda i: (i, 0)),
                   pl.BlockSpec((1, 8, 128), lambda i: (i, 0, 0))),
        compiler_params=pltpu.CompilerParams(
            dimension_semantics=("parallel",), vmem_limit_bytes=_VMEM_LIMIT),
    )(ef, gum, w2.astype(jnp.bfloat16), b2.reshape(1, h).astype(jnp.float32),
      w3.astype(jnp.bfloat16), b3.reshape(1, k).astype(jnp.float32),
      log_prior.reshape(1, k).astype(jnp.float32))
    if rp != r:
        edges = edges[:r]
    return edges, jnp.sum(klp[:, 0, 0])


# ------------- kernel: fused edge-type message MLP + gating ---------------

def _edge_msg_kernel(pre_ref, gate_ref, exp_ref, wf_ref, bf_ref, msg_ref, *,
                     num_types, hidden):
    # One lane-dense [tm, 2D] @ [2D, K*H] MXU matmul; gating is VPU filler.
    h = jnp.dot(pre_ref[...], wf_ref[...], preferred_element_type=jnp.float32)
    h = jnp.maximum(h + bf_ref[...], 0.0)
    # Expand per-edge gates T-fold with a tiny static 0/1 matmul (the [S*E*T,K]
    # repeat never exists in HBM; gate HBM traffic is cut by T).
    g = jnp.dot(exp_ref[...], gate_ref[...], preferred_element_type=jnp.float32)
    # TODO(synk): per-type slices are 32-lane sub-vreg slices; size hidden to
    # 128 at production shapes for vreg-aligned gating.
    acc = g[:, 0:1] * h[:, 0:hidden]
    for k in range(1, num_types):
        acc = acc + g[:, k:k + 1] * h[:, k * hidden:(k + 1) * hidden]
    msg_ref[...] = acc.astype(msg_ref.dtype)


def pallas_edge_messages(pre2d, gate2d, w_msg, b_msg, *, rep):
    """pre2d rows ordered (sim, edge, t); gate2d rows ordered (sim, edge)."""
    m, f_in = pre2d.shape
    k_types, _, hidden = w_msg.shape
    wf = jnp.transpose(w_msg, (1, 0, 2)).reshape(f_in, k_types * hidden)
    bf = b_msg.reshape(1, k_types * hidden)
    tm, mp, nt = _edge_row_tiles(m, rep)
    gm = tm // rep
    pre = _pad_rows(pre2d.astype(jnp.bfloat16), mp)
    gate = _pad_rows(gate2d.astype(jnp.float32), mp // rep)
    # Static tile-local expansion matrix: expand[j*rep + t, j] = 1.
    expand = jnp.asarray(
        np.kron(np.eye(gm, dtype=np.float32), np.ones((rep, 1), np.float32)))
    out = pl.pallas_call(
        functools.partial(_edge_msg_kernel, num_types=k_types, hidden=hidden),
        out_shape=jax.ShapeDtypeStruct((mp, hidden), jnp.bfloat16),
        grid=(nt,),
        in_specs=[
            pl.BlockSpec((tm, f_in), lambda i: (i, 0)),
            pl.BlockSpec((gm, k_types), lambda i: (i, 0)),
            pl.BlockSpec((tm, gm), lambda i: (0, 0)),
            pl.BlockSpec((f_in, k_types * hidden), lambda i: (0, 0)),
            pl.BlockSpec((1, k_types * hidden), lambda i: (0, 0)),
        ],
        out_specs=pl.BlockSpec((tm, hidden), lambda i: (i, 0)),
        compiler_params=pltpu.CompilerParams(
            dimension_semantics=("parallel",), vmem_limit_bytes=_VMEM_LIMIT),
    )(pre, gate, expand, wf.astype(jnp.bfloat16), bf.astype(jnp.float32))
    if mp != m:
        out = out[:m]
    return out


# -- kernel: fused aggregation + decoder-out MLP + residual + classifier ----
#    (per-sim grid; agg and rec never leave VMEM; per-sim MSE / CE partials)

def _dec_cls_kernel(y_ref, msg_ref, x_ref, rel_ref, dw1_ref, db1_ref, dw2_ref,
                    db2_ref, cw1_ref, cb1_ref, cw2_ref, cb2_ref,
                    mse_ref, ce_ref, *, num_dims, mse_scale, ce_scale):
    s = pl.program_id(0)

    # edge -> node aggregation: rel_expand [A*T, E*T] @ msg_s [E*T, Hm]
    # (rel_expand = kron(rel_recv, I_T), so rows come out in (atom, time) order)
    agg = jnp.dot(rel_ref[...], msg_ref[0], preferred_element_type=jnp.float32)

    # decoder output MLP + residual; rec stays in VMEM
    h = jnp.dot(agg.astype(jnp.bfloat16), dw1_ref[...],
                preferred_element_type=jnp.float32)
    h = jnp.maximum(h + db1_ref[...], 0.0)
    delta = jnp.dot(h.astype(jnp.bfloat16), dw2_ref[...],
                    preferred_element_type=jnp.float32) + db2_ref[...]
    rec = x_ref[0] + delta                                   # (A*T, D) f32

    # TODO(synk): `Xrec` is undefined in the PyTorch forward(); the target is
    # taken to be the input X, so MSE(rec, Xrec) reduces to mean(delta^2).
    mse_part = jnp.sum(delta * delta) * mse_scale
    mse_ref[...] = jnp.broadcast_to(mse_part, mse_ref.shape).astype(mse_ref.dtype)

    # classifier layer 1 as a per-dim VPU contraction over the (A*T, D) layout
    # (avoids flattening rec into a lane-dense row inside the kernel).
    hc = cb1_ref[...]                                        # (1, H_cls)
    for d in range(num_dims):
        hc = hc + jnp.sum(rec[:, d:d + 1] * cw1_ref[d], axis=0, keepdims=True)
    hc = jnp.maximum(hc, 0.0)
    hc8 = jnp.broadcast_to(hc, (8, hc.shape[1]))             # pad M for the MXU
    logits = (jnp.dot(hc8.astype(jnp.bfloat16), cw2_ref[...],
                      preferred_element_type=jnp.float32) + cb2_ref[...])[0:1, :]

    m = jnp.max(logits, axis=-1, keepdims=True)
    lse = m + jnp.log(jnp.sum(jnp.exp(logits - m), axis=-1, keepdims=True))
    label = y_ref[s]
    lane = jax.lax.broadcasted_iota(jnp.int32, logits.shape, 1)
    picked = jnp.sum(jnp.where(lane == label, logits, 0.0), axis=-1,
                     keepdims=True)
    ce_part = jnp.sum(lse - picked) * ce_scale
    ce_ref[...] = jnp.broadcast_to(ce_part, ce_ref.shape).astype(ce_ref.dtype)


def pallas_decode_classify(msg3, x3, rel_expand, dec_w1, dec_b1, dec_w2, dec_b2,
                           cls_w1, cls_b1, cls_w2, cls_b2, y):
    s, et, hm = msg3.shape
    _, at, d = x3.shape
    hd = dec_w1.shape[1]
    hc = cls_w1.shape[1]
    c = cls_w2.shape[1]
    # classifier weight reordered (D, A*T, H_cls) for the per-dim contraction
    cw1_3d = cls_w1.reshape(at, d, hc).transpose(1, 0, 2)
    kern = functools.partial(_dec_cls_kernel, num_dims=d,
                             mse_scale=1.0 / (s * at * d), ce_scale=1.0 / s)
    grid_spec = pltpu.PrefetchScalarGridSpec(
        num_scalar_prefetch=1, grid=(s,),
        in_specs=[
            pl.BlockSpec((1, et, hm), lambda i, y: (i, 0, 0)),
            pl.BlockSpec((1, at, d), lambda i, y: (i, 0, 0)),
            pl.BlockSpec((at, et), lambda i, y: (0, 0)),
            pl.BlockSpec((hm, hd), lambda i, y: (0, 0)),
            pl.BlockSpec((1, hd), lambda i, y: (0, 0)),
            pl.BlockSpec((hd, d), lambda i, y: (0, 0)),
            pl.BlockSpec((1, d), lambda i, y: (0, 0)),
            pl.BlockSpec((d, at, hc), lambda i, y: (0, 0, 0)),
            pl.BlockSpec((1, hc), lambda i, y: (0, 0)),
            pl.BlockSpec((hc, c), lambda i, y: (0, 0)),
            pl.BlockSpec((1, c), lambda i, y: (0, 0)),
        ],
        out_specs=(pl.BlockSpec((1, 8, 128), lambda i, y: (i, 0, 0)),
                   pl.BlockSpec((1, 8, 128), lambda i, y: (i, 0, 0))),
    )
    mse_p, ce_p = pl.pallas_call(
        kern,
        out_shape=(jax.ShapeDtypeStruct((s, 8, 128), jnp.float32),
                   jax.ShapeDtypeStruct((s, 8, 128), jnp.float32)),
        grid_spec=grid_spec,
        compiler_params=pltpu.CompilerParams(
            dimension_semantics=("parallel",), vmem_limit_bytes=_VMEM_LIMIT),
    )(y.astype(jnp.int32), msg3.astype(jnp.bfloat16), x3.astype(jnp.float32),
      rel_expand.astype(jnp.bfloat16),
      dec_w1.astype(jnp.bfloat16), dec_b1.reshape(1, hd).astype(jnp.float32),
      dec_w2.astype(jnp.bfloat16), dec_b2.reshape(1, d).astype(jnp.float32),
      cw1_3d.astype(jnp.float32), cls_b1.reshape(1, hc).astype(jnp.float32),
      cls_w2.astype(jnp.bfloat16), cls_b2.reshape(1, c).astype(jnp.float32))
    return jnp.sum(mse_p[:, 0, 0]), jnp.sum(ce_p[:, 0, 0])


# ----------------------------- model (glue) -----------------------------

def init_params(key, *, A_n, T, D, K_types, H_enc, H_msg, H_dec, H_cls, C):
    ks = jax.random.split(key, 8)

    def w(k, shape, scale=0.1):
        return (scale * jax.random.normal(k, shape)).astype(jnp.float32)

    return {
        "enc_w1": w(ks[0], (T * D, H_enc)), "enc_b1": jnp.zeros((H_enc,), jnp.float32),
        "enc_w2": w(ks[1], (2 * H_enc, H_enc)), "enc_b2": jnp.zeros((H_enc,), jnp.float32),
        "enc_w3": w(ks[2], (H_enc, K_types)), "enc_b3": jnp.zeros((K_types,), jnp.float32),
        "dec_wmsg": w(ks[3], (K_types, 2 * D, H_msg)),
        "dec_bmsg": jnp.zeros((K_types, 1, H_msg), jnp.float32),
        "dec_w1": w(ks[4], (H_msg, H_dec)), "dec_b1": jnp.zeros((H_dec,), jnp.float32),
        "dec_w2": w(ks[5], (H_dec, D)), "dec_b2": jnp.zeros((D,), jnp.float32),
        "cls_w1": w(ks[6], (A_n * T * D, H_cls)), "cls_b1": jnp.zeros((H_cls,), jnp.float32),
        "cls_w2": w(ks[7], (H_cls, C)), "cls_b2": jnp.zeros((C,), jnp.float32),
    }


def vae_forward(params, X, A, Y, *, gumbel, log_prior, send_idx, recv_idx,
                rel_expand, temp, hard):
    del A  # adjacency is pre-baked into the static send/recv index lists
    S, A_n, T, D = X.shape
    E = send_idx.shape[0]
    K = log_prior.shape[-1]

    # ---------------- encoder: X -> edges (+ fused KL) ----------------
    h_nodes = pallas_linear(X.reshape(S * A_n, T * D),
                            params["enc_w1"], params["enc_b1"], relu=True)
    h_nodes = h_nodes.reshape(S, A_n, -1)
    # TODO(synk): node->edge gather stays in plain JAX; a scalar-prefetch
    # index_map could stream the per-edge rows straight from h_nodes / X.
    edge_feat = jnp.concatenate([jnp.take(h_nodes, send_idx, axis=1),
                                 jnp.take(h_nodes, recv_idx, axis=1)], axis=-1)
    edges2d, kl = pallas_encoder_edges(
        edge_feat.reshape(S * E, -1), gumbel.reshape(S * E, K),
        params["enc_w2"], params["enc_b2"], params["enc_w3"], params["enc_b3"],
        log_prior, tau=temp, hard=hard, num_sims=S, num_atoms=A_n)

    # ---------------- decoder edge messages (gate without T-fold repeat) ----
    x_send = jnp.take(X, send_idx, axis=1)
    x_recv = jnp.take(X, recv_idx, axis=1)
    pre_msg = jnp.concatenate([x_send, x_recv], axis=-1)        # [S,E,T,2D]
    msg2d = pallas_edge_messages(pre_msg.reshape(S * E * T, 2 * D), edges2d,
                                 params["dec_wmsg"], params["dec_bmsg"], rep=T)
    Hm = msg2d.shape[-1]

    # --- fused aggregation + decoder-out + residual + classifier + losses ---
    mse, ce = pallas_decode_classify(
        msg2d.reshape(S, E * T, Hm), X.reshape(S, A_n * T, D), rel_expand,
        params["dec_w1"], params["dec_b1"], params["dec_w2"], params["dec_b2"],
        params["cls_w1"], params["cls_b1"], params["cls_w2"], params["cls_b2"],
        Y)

    return {"KL": kl, "Reconstruction": mse, "Classification": ce}


# ----------------------------- demo -----------------------------

if __name__ == "__main__":
    # small shapes consistent with the module's X: [num_sims, num_atoms, T, D]
    S, A_n, T, D = 2, 4, 8, 4
    K_types, C = 4, 3
    H_enc = H_msg = H_dec = H_cls = 32
    temp, hard = 0.5, False

    prior = [0.5, 0.25, 0.125, 0.125]
    assert sum(prior) == 1.0, "Edge prior doesn't sum to 1"
    log_prior = jnp.asarray(np.log(np.array(prior)), dtype=jnp.float32)

    key = jax.random.PRNGKey(0)
    k_x, k_y, k_g, k_p = jax.random.split(key, 4)

    X = jax.random.normal(k_x, (S, A_n, T, D), dtype=jnp.float32)
    A_np = np.ones((A_n, A_n), dtype=np.float32) - np.eye(A_n, dtype=np.float32)
    A = jnp.asarray(A_np)
    Y = jax.random.randint(k_y, (S,), 0, C)

    # static edge list from the (off-diagonal) adjacency + the expanded
    # receiver matrix kron(rel_recv, I_T) used by the fused aggregation matmul
    recv_np, send_np = np.nonzero(A_np)
    send_idx = jnp.asarray(send_np, dtype=jnp.int32)
    recv_idx = jnp.asarray(recv_np, dtype=jnp.int32)
    rel_recv_t = np.eye(A_n, dtype=np.float32)[recv_np].T            # [A, E]
    rel_expand = jnp.asarray(np.kron(rel_recv_t, np.eye(T, dtype=np.float32)))
    E = int(send_idx.shape[0])

    # deterministic gumbel noise for F.gumbel_softmax (RNG is plain-JAX glue)
    gumbel = jax.random.gumbel(k_g, (S, E, K_types), dtype=jnp.float32)

    params = init_params(k_p, A_n=A_n, T=T, D=D, K_types=K_types,
                         H_enc=H_enc, H_msg=H_msg, H_dec=H_dec, H_cls=H_cls, C=C)

    fwd = jax.jit(functools.partial(vae_forward, temp=temp, hard=hard))
    out = fwd(params, X, A, Y, gumbel=gumbel, log_prior=log_prior,
              send_idx=send_idx, recv_idx=recv_idx, rel_expand=rel_expand)
    out = jax.block_until_ready(out)
    print("KERNEL_OK")
</pallas_src>

<mosaic_0001>
module attributes {stable_mosaic.version = 11 : i64} {
  func.func @_linear_kernel(%arg0: i32, %arg1: memref<8x32xbf16, #tpu.memory_space<vmem>>, %arg2: memref<32x32xbf16, #tpu.memory_space<vmem>>, %arg3: memref<1x32xf32, #tpu.memory_space<vmem>>, %arg4: memref<8x32xbf16, #tpu.memory_space<vmem>>) attributes {dimension_semantics = [#tpu.dimension_semantics<parallel>], iteration_bounds = array<i64: 1>, scalar_prefetch = 0 : i64, scratch_operands = 0 : i64, tpu.core_type = #tpu.core_type<tc>, window_params = [{transform_indices = @transform_0, window_bounds = array<i64: 8, 32>}, {pipeline_mode = #tpu.pipeline_mode<synchronous>, transform_indices = @transform_1, window_bounds = array<i64: 32, 32>}, {pipeline_mode = #tpu.pipeline_mode<synchronous>, transform_indices = @transform_2, window_bounds = array<i64: 1, 32>}, {transform_indices = @transform_3, window_bounds = array<i64: 8, 32>}]} {
    %c0 = arith.constant 0 : index
    %c0_0 = arith.constant 0 : index
    %0 = vector.load %arg1[%c0, %c0_0] : memref<8x32xbf16, #tpu.memory_space<vmem>>, vector<8x32xbf16>
    %c0_1 = arith.constant 0 : index
    %c0_2 = arith.constant 0 : index
    %1 = vector.load %arg2[%c0_1, %c0_2] : memref<32x32xbf16, #tpu.memory_space<vmem>>, vector<32x32xbf16>
    %cst = arith.constant dense<0.000000e+00> : vector<8x32xf32>
    %2 = tpu.matmul %0, %1, %cst {dimension_numbers = #tpu.dot_dimension_numbers<[1], [0], [0], [1], [0, 0, 1, 1], [], []>} : vector<8x32xbf16>, vector<32x32xbf16>, vector<8x32xf32> -> vector<8x32xf32>
    %c0_3 = arith.constant 0 : index
    %c0_4 = arith.constant 0 : index
    %3 = vector.load %arg3[%c0_3, %c0_4] : memref<1x32xf32, #tpu.memory_space<vmem>>, vector<1x32xf32>
    %4 = vector.broadcast %3 : vector<1x32xf32> to vector<8x32xf32>
    %5 = arith.addf %2, %4 : vector<8x32xf32>
    %cst_5 = arith.constant 0.000000e+00 : f32
    %6 = vector.broadcast %cst_5 : f32 to vector<8x32xf32>
    %7 = arith.maximumf %5, %6 : vector<8x32xf32>
    %8 = arith.truncf %7 : vector<8x32xf32> to vector<8x32xbf16>
    %c0_6 = arith.constant 0 : index
    %c0_7 = arith.constant 0 : index
    %9 = vector.load %arg4[%c0_6, %c0_7] : memref<8x32xbf16, #tpu.memory_space<vmem>>, vector<8x32xbf16>
    tpu.vector_store %arg4[%c0_6, %c0_7], %8 {strides = array<i32>} : memref<8x32xbf16, #tpu.memory_space<vmem>>, vector<8x32xbf16>,
    return
  }
  func.func @transform_0(%arg0: i32) -> (i32, i32) {
    %c0_i32 = arith.constant 0 : i32
    %c0_i32_0 = arith.constant 0 : i32
    return %arg0, %c0_i32 : i32, i32
  }
  func.func @transform_1(%arg0: i32) -> (i32, i32) {
    %c0_i32 = arith.constant 0 : i32
    %c0_i32_0 = arith.constant 0 : i32
    %c0_i32_1 = arith.constant 0 : i32
    return %c0_i32, %c0_i32_0 : i32, i32
  }
  func.func @transform_2(%arg0: i32) -> (i32, i32) {
    %c0_i32 = arith.constant 0 : i32
    %c0_i32_0 = arith.constant 0 : i32
    %c0_i32_1 = arith.constant 0 : i32
    return %c0_i32, %c0_i32_0 : i32, i32
  }
  func.func @transform_3(%arg0: i32) -> (i32, i32) {
    %c0_i32 = arith.constant 0 : i32
    %c0_i32_0 = arith.constant 0 : i32
    return %arg0, %c0_i32 : i32, i32
  }
}

module attributes {stable_mosaic.version = 11 : i64} {
  func.func @_enc_edge_kernel(%arg0: i32, %arg1: memref<24x64xbf16, #tpu.memory_space<vmem>>, %arg2: memref<24x4xf32, #tpu.memory_space<vmem>>, %arg3: memref<64x32xbf16, #tpu.memory_space<vmem>>, %arg4: memref<1x32xf32, #tpu.memory_space<vmem>>, %arg5: memref<32x4xbf16, #tpu.memory_space<vmem>>, %arg6: memref<1x4xf32, #tpu.memory_space<vmem>>, %arg7: memref<1x4xf32, #tpu.memory_space<vmem>>, %arg8: memref<24x4xf32, #tpu.memory_space<vmem>>, %arg9: memref<1x8x128xf32, #tpu.memory_space<vmem>>) attributes {dimension_semantics = [#tpu.dimension_semantics<parallel>], iteration_bounds = array<i64: 1>, scalar_prefetch = 0 : i64, scratch_operands = 0 : i64, tpu.core_type = #tpu.core_type<tc>, window_params = [{transform_indices = @transform_0, window_bounds = array<i64: 24, 64>}, {transform_indices = @transform_1, window_bounds = array<i64: 24, 4>}, {pipeline_mode = #tpu.pipeline_mode<synchronous>, transform_indices = @transform_2, window_bounds = array<i64: 64, 32>}, {pipeline_mode = #tpu.pipeline_mode<synchronous>, transform_indices = @transform_3, window_bounds = array<i64: 1, 32>}, {pipeline_mode = #tpu.pipeline_mode<synchronous>, transform_indices = @transform_4, window_bounds = array<i64: 32, 4>}, {pipeline_mode = #tpu.pipeline_mode<synchronous>, transform_indices = @transform_5, window_bounds = array<i64: 1, 4>}, {pipeline_mode = #tpu.pipeline_mode<synchronous>, transform_indices = @transform_6, window_bounds = array<i64: 1, 4>}, {transform_indices = @transform_7, window_bounds = array<i64: 24, 4>}, {transform_indices = @transform_8, window_bounds = array<i64: 1, 8, 128>}]} {
    %c0 = arith.constant 0 : index
    %c0_0 = arith.constant 0 : index
    %0 = vector.load %arg1[%c0, %c0_0] : memref<24x64xbf16, #tpu.memory_space<vmem>>, vector<24x64xbf16>
    %c0_1 = arith.constant 0 : index
    %c0_2 = arith.constant 0 : index
    %1 = vector.load %arg3[%c0_1, %c0_2] : memref<64x32xbf16, #tpu.memory_space<vmem>>, vector<64x32xbf16>
    %cst = arith.constant dense<0.000000e+00> : vector<24x32xf32>
    %2 = tpu.matmul %0, %1, %cst {dimension_numbers = #tpu.dot_dimension_numbers<[1], [0], [0], [1], [0, 0, 1, 1], [], []>} : vector<24x64xbf16>, vector<64x32xbf16>, vector<24x32xf32> -> vector<24x32xf32>
    %c0_3 = arith.constant 0 : index
    %c0_4 = arith.constant 0 : index
    %3 = vector.load %arg4[%c0_3, %c0_4] : memref<1x32xf32, #tpu.memory_space<vmem>>, vector<1x32xf32>
    %4 = vector.broadcast %3 : vector<1x32xf32> to vector<24x32xf32>
    %5 = arith.addf %2, %4 : vector<24x32xf32>
    %cst_5 = arith.constant 0.000000e+00 : f32
    %6 = vector.broadcast %cst_5 : f32 to vector<24x32xf32>
    %7 = arith.maximumf %5, %6 : vector<24x32xf32>
    %8 = arith.truncf %7 : vector<24x32xf32> to vector<24x32xbf16>
    %c0_6 = arith.constant 0 : index
    %c0_7 = arith.constant 0 : index
    %9 = vector.load %arg5[%c0_6, %c0_7] : memref<32x4xbf16, #tpu.memory_space<vmem>>, vector<32x4xbf16>
    %cst_8 = arith.constant dense<0.000000e+00> : vector<24x4xf32>
    %10 = tpu.matmul %8, %9, %cst_8 {dimension_numbers = #tpu.dot_dimension_numbers<[1], [0], [0], [1], [0, 0, 1, 1], [], []>} : vector<24x32xbf16>, vector<32x4xbf16>, vector<24x4xf32> -> vector<24x4xf32>
    %c0_9 = arith.constant 0 : index
    %c0_10 = arith.constant 0 : index
    %11 = vector.load %arg6[%c0_9, %c0_10] : memref<1x4xf32, #tpu.memory_space<vmem>>, vector<1x4xf32>
    %12 = vector.broadcast %11 : vector<1x4xf32> to vector<24x4xf32>
    %13 = arith.addf %10, %12 : vector<24x4xf32>
    %c0_11 = arith.constant 0 : index
    %c0_12 = arith.constant 0 : index
    %14 = vector.load %arg2[%c0_11, %c0_12] : memref<24x4xf32, #tpu.memory_space<vmem>>, vector<24x4xf32>
    %15 = arith.addf %13, %14 : vector<24x4xf32>
    %cst_13 = arith.constant 2.000000e+00 : f32
    %16 = vector.broadcast %cst_13 : f32 to vector<24x4xf32>
    %17 = arith.mulf %15, %16 : vector<24x4xf32>
    %cst_14 = arith.constant dense<0xFF800000> : vector<24xf32>
    %18 = vector.multi_reduction <maximumf>, %17, %cst_14 [1] : vector<24x4xf32> to vector<24xf32>
    %19 = vector.shape_cast %18 : vector<24xf32> to vector<24x1xf32>
    %20 = vector.broadcast %19 : vector<24x1xf32> to vector<24x4xf32>
    %21 = arith.subf %17, %20 : vector<24x4xf32>
    %22 = math.exp %21 : vector<24x4xf32>
    %cst_15 = arith.constant dense<0.000000e+00> : vector<24xf32>
    %23 = vector.multi_reduction <add>, %22, %cst_15 [1] : vector<24x4xf32> to vector<24xf32>
    %24 = vector.shape_cast %23 : vector<24xf32> to vector<24x1xf32>
    %25 = vector.broadcast %24 : vector<24x1xf32> to vector<24x4xf32>
    %26 = arith.divf %22, %25 : vector<24x4xf32>
    %c0_16 = arith.constant 0 : index
    %c0_17 = arith.constant 0 : index
    %27 = vector.load %arg8[%c0_16, %c0_17] : memref<24x4xf32, #tpu.memory_space<vmem>>, vector<24x4xf32>
    tpu.vector_store %arg8[%c0_16, %c0_17], %26 {strides = array<i32>} : memref<24x4xf32, #tpu.memory_space<vmem>>, vector<24x4xf32>,
    %cst_18 = arith.constant dense<0xFF800000> : vector<24xf32>
    %28 = vector.multi_reduction <maximumf>, %13, %cst_18 [1] : vector<24x4xf32> to vector<24xf32>
    %29 = vector.shape_cast %28 : vector<24xf32> to vector<24x1xf32>
    %30 = vector.broadcast %29 : vector<24x1xf32> to vector<24x4xf32>
    %31 = arith.subf %13, %30 : vector<24x4xf32>
    %32 = math.exp %31 : vector<24x4xf32>
    %cst_19 = arith.constant dense<0.000000e+00> : vector<24xf32>
    %33 = vector.multi_reduction <add>, %32, %cst_19 [1] : vector<24x4xf32> to vector<24xf32>
    %34 = vector.shape_cast %33 : vector<24xf32> to vector<24x1xf32>
    %35 = vector.broadcast %34 : vector<24x1xf32> to vector<24x4xf32>
    %36 = arith.divf %32, %35 : vector<24x4xf32>
    %c24_i32 = arith.constant 24 : i32
    %37 = arith.muli %arg0, %c24_i32 : i32
    %38 = tpu.iota {dimensions = array<i32: 0>} : vector<24x1xi32>
    %39 = vector.broadcast %37 : i32 to vector<24x1xi32>
    %40 = arith.addi %39, %38 : vector<24x1xi32>
    %c24_i32_20 = arith.constant 24 : i32
    %41 = vector.broadcast %c24_i32_20 : i32 to vector<24x1xi32>
    %42 = arith.cmpi slt, %40, %41 : vector<24x1xi32>
    %43 = arith.extui %42 : vector<24x1xi1> to vector<24x1xi32>
    %44 = arith.sitofp %43 : vector<24x1xi32> to vector<24x1xf32>
    %45 = vector.broadcast %44 : vector<24x1xf32> to vector<24x4xf32>
    %46 = arith.mulf %45, %36 : vector<24x4xf32>
    %cst_21 = arith.constant 1.000000e-16 : f32
    %47 = vector.broadcast %cst_21 : f32 to vector<24x4xf32>
    %48 = arith.addf %36, %47 : vector<24x4xf32>
    %49 = math.log %48 : vector<24x4xf32>
    %c0_22 = arith.constant 0 : index
    %c0_23 = arith.constant 0 : index
    %50 = vector.load %arg7[%c0_22, %c0_23] : memref<1x4xf32, #tpu.memory_space<vmem>>, vector<1x4xf32>
    %51 = vector.broadcast %50 : vector<1x4xf32> to vector<24x4xf32>
    %52 = arith.subf %49, %51 : vector<24x4xf32>
    %53 = arith.mulf %46, %52 : vector<24x4xf32>
    %54 = vector.shape_cast %53 : vector<24x4xf32> to vector<1x24x4xf32>
    %cst_24 = arith.constant dense<0.000000e+00> : vector<1xf32>
    %55 = vector.multi_reduction <add>, %54, %cst_24 [1, 2] : vector<1x24x4xf32> to vector<1xf32>
    %56 = vector.shape_cast %55 : vector<1xf32> to vector<1x1x1xf32>
    %57 = vector.extract %56[0, 0, 0] : f32 from vector<1x1x1xf32>
    %cst_25 = arith.constant 1.250000e-01 : f32
    %58 = arith.mulf %57, %cst_25 : f32
    %59 = vector.broadcast %58 : f32 to vector<1x8x128xf32>
    %c0_26 = arith.constant 0 : index
    %c0_27 = arith.constant 0 : index
    %c0_28 = arith.constant 0 : index
    %60 = vector.load %arg9[%c0_26, %c0_27, %c0_28] : memref<1x8x128xf32, #tpu.memory_space<vmem>>, vector<1x8x128xf32>
    tpu.vector_store %arg9[%c0_26, %c0_27, %c0_28], %59 {strides = array<i32>} : memref<1x8x128xf32, #tpu.memory_space<vmem>>, vector<1x8x128xf32>,
    return
  }
  func.func @transform_0(%arg0: i32) -> (i32, i32) {
    %c0_i32 = arith.constant 0 : i32
    %c0_i32_0 = arith.constant 0 : i32
    return %arg0, %c0_i32 : i32, i32
  }
  func.func @transform_1(%arg0: i32) -> (i32, i32) {
    %c0_i32 = arith.constant 0 : i32
    %c0_i32_0 = arith.constant 0 : i32
    return %arg0, %c0_i32 : i32, i32
  }
  func.func @transform_2(%arg0: i32) -> (i32, i32) {
    %c0_i32 = arith.constant 0 : i32
    %c0_i32_0 = arith.constant 0 : i32
    %c0_i32_1 = arith.constant 0 : i32
    return %c0_i32, %c0_i32_0 : i32, i32
  }
  func.func @transform_3(%arg0: i32) -> (i32, i32) {
    %c0_i32 = arith.constant 0 : i32
    %c0_i32_0 = arith.constant 0 : i32
    %c0_i32_1 = arith.constant 0 : i32
    return %c0_i32, %c0_i32_0 : i32, i32
  }
  func.func @transform_4(%arg0: i32) -> (i32, i32) {
    %c0_i32 = arith.constant 0 : i32
    %c0_i32_0 = arith.constant 0 : i32
    %c0_i32_1 = arith.constant 0 : i32
    return %c0_i32, %c0_i32_0 : i32, i32
  }
  func.func @transform_5(%arg0: i32) -> (i32, i32) {
    %c0_i32 = arith.constant 0 : i32
    %c0_i32_0 = arith.constant 0 : i32
    %c0_i32_1 = arith.constant 0 : i32
    return %c0_i32, %c0_i32_0 : i32, i32
  }
  func.func @transform_6(%arg0: i32) -> (i32, i32) {
    %c0_i32 = arith.constant 0 : i32
    %c0_i32_0 = arith.constant 0 : i32
    %c0_i32_1 = arith.constant 0 : i32
    return %c0_i32, %c0_i32_0 : i32, i32
  }
  func.func @transform_7(%arg0: i32) -> (i32, i32) {
    %c0_i32 = arith.constant 0 : i32
    %c0_i32_0 = arith.constant 0 : i32
    return %arg0, %c0_i32 : i32, i32
  }
  func.func @transform_8(%arg0: i32) -> (i32, i32, i32) {
    %c0_i32 = arith.constant 0 : i32
    %c0_i32_0 = arith.constant 0 : i32
    %c0_i32_1 = arith.constant 0 : i32
    return %arg0, %c0_i32, %c0_i32_0 : i32, i32, i32
  }
}

module attributes {stable_mosaic.version = 11 : i64} {
  func.func @_edge_msg_kernel(%arg0: i32, %arg1: memref<192x8xbf16, #tpu.memory_space<vmem>>, %arg2: memref<24x4xf32, #tpu.memory_space<vmem>>, %arg3: memref<192x24xf32, #tpu.memory_space<vmem>>, %arg4: memref<8x128xbf16, #tpu.memory_space<vmem>>, %arg5: memref<1x128xf32, #tpu.memory_space<vmem>>, %arg6: memref<192x32xbf16, #tpu.memory_space<vmem>>) attributes {dimension_semantics = [#tpu.dimension_semantics<parallel>], iteration_bounds = array<i64: 1>, scalar_prefetch = 0 : i64, scratch_operands = 0 : i64, tpu.core_type = #tpu.core_type<tc>, window_params = [{transform_indices = @transform_0, window_bounds = array<i64: 192, 8>}, {transform_indices = @transform_1, window_bounds = array<i64: 24, 4>}, {pipeline_mode = #tpu.pipeline_mode<synchronous>, transform_indices = @transform_2, window_bounds = array<i64: 192, 24>}, {pipeline_mode = #tpu.pipeline_mode<synchronous>, transform_indices = @transform_3, window_bounds = array<i64: 8, 128>}, {pipeline_mode = #tpu.pipeline_mode<synchronous>, transform_indices = @transform_4, window_bounds = array<i64: 1, 128>}, {transform_indices = @transform_5, window_bounds = array<i64: 192, 32>}]} {
    %c0 = arith.constant 0 : index
    %c0_0 = arith.constant 0 : index
    %0 = vector.load %arg1[%c0, %c0_0] : memref<192x8xbf16, #tpu.memory_space<vmem>>, vector<192x8xbf16>
    %c0_1 = arith.constant 0 : index
    %c0_2 = arith.constant 0 : index
    %1 = vector.load %arg4[%c0_1, %c0_2] : memref<8x128xbf16, #tpu.memory_space<vmem>>, vector<8x128xbf16>
    %cst = arith.constant dense<0.000000e+00> : vector<192x128xf32>
    %2 = tpu.matmul %0, %1, %cst {dimension_numbers = #tpu.dot_dimension_numbers<[1], [0], [0], [1], [0, 0, 1, 1], [], []>} : vector<192x8xbf16>, vector<8x128xbf16>, vector<192x128xf32> -> vector<192x128xf32>
    %c0_3 = arith.constant 0 : index
    %c0_4 = arith.constant 0 : index
    %3 = vector.load %arg5[%c0_3, %c0_4] : memref<1x128xf32, #tpu.memory_space<vmem>>, vector<1x128xf32>
    %4 = vector.broadcast %3 : vector<1x128xf32> to vector<192x128xf32>
    %5 = arith.addf %2, %4 : vector<192x128xf32>
    %cst_5 = arith.constant 0.000000e+00 : f32
    %6 = vector.broadcast %cst_5 : f32 to vector<192x128xf32>
    %7 = arith.maximumf %5, %6 : vector<192x128xf32>
    %c0_6 = arith.constant 0 : index
    %c0_7 = arith.constant 0 : index
    %8 = vector.load %arg3[%c0_6, %c0_7] : memref<192x24xf32, #tpu.memory_space<vmem>>, vector<192x24xf32>
    %c0_8 = arith.constant 0 : index
    %c0_9 = arith.constant 0 : index
    %9 = vector.load %arg2[%c0_8, %c0_9] : memref<24x4xf32, #tpu.memory_space<vmem>>, vector<24x4xf32>
    %cst_10 = arith.constant dense<0.000000e+00> : vector<192x4xf32>
    %10 = tpu.matmul %8, %9, %cst_10 {dimension_numbers = #tpu.dot_dimension_numbers<[1], [0], [0], [1], [0, 0, 1, 1], [], []>} : vector<192x24xf32>, vector<24x4xf32>, vector<192x4xf32> -> vector<192x4xf32>
    %11 = vector.extract_strided_slice %10 {offsets = [0, 0], sizes = [192, 1], strides = [1, 1]} : vector<192x4xf32> to vector<192x1xf32>
    %12 = vector.extract_strided_slice %7 {offsets = [0, 0], sizes = [192, 32], strides = [1, 1]} : vector<192x128xf32> to vector<192x32xf32>
    %13 = vector.broadcast %11 : vector<192x1xf32> to vector<192x32xf32>
    %14 = arith.mulf %13, %12 : vector<192x32xf32>
    %15 = vector.extract_strided_slice %10 {offsets = [0, 1], sizes = [192, 1], strides = [1, 1]} : vector<192x4xf32> to vector<192x1xf32>
    %16 = vector.extract_strided_slice %7 {offsets = [0, 32], sizes = [192, 32], strides = [1, 1]} : vector<192x128xf32> to vector<192x32xf32>
    %17 = vector.broadcast %15 : vector<192x1xf32> to vector<192x32xf32>
    %18 = arith.mulf %17, %16 : vector<192x32xf32>
    %19 = arith.addf %14, %18 : vector<192x32xf32>
    %20 = vector.extract_strided_slice %10 {offsets = [0, 2], sizes = [192, 1], strides = [1, 1]} : vector<192x4xf32> to vector<192x1xf32>
    %21 = vector.extract_strided_slice %7 {offsets = [0, 64], sizes = [192, 32], strides = [1, 1]} : vector<192x128xf32> to vector<192x32xf32>
    %22 = vector.broadcast %20 : vector<192x1xf32> to vector<192x32xf32>
    %23 = arith.mulf %22, %21 : vector<192x32xf32>
    %24 = arith.addf %19, %23 : vector<192x32xf32>
    %25 = vector.extract_strided_slice %10 {offsets = [0, 3], sizes = [192, 1], strides = [1, 1]} : vector<192x4xf32> to vector<192x1xf32>
    %26 = vector.extract_strided_slice %7 {offsets = [0, 96], sizes = [192, 32], strides = [1, 1]} : vector<192x128xf32> to vector<192x32xf32>
    %27 = vector.broadcast %25 : vector<192x1xf32> to vector<192x32xf32>
    %28 = arith.mulf %27, %26 : vector<192x32xf32>
    %29 = arith.addf %24, %28 : vector<192x32xf32>
    %30 = arith.truncf %29 : vector<192x32xf32> to vector<192x32xbf16>
    %c0_11 = arith.constant 0 : index
    %c0_12 = arith.constant 0 : index
    %31 = vector.load %arg6[%c0_11, %c0_12] : memref<192x32xbf16, #tpu.memory_space<vmem>>, vector<192x32xbf16>
    tpu.vector_store %arg6[%c0_11, %c0_12], %30 {strides = array<i32>} : memref<192x32xbf16, #tpu.memory_space<vmem>>, vector<192x32xbf16>,
    return
  }
  func.func @transform_0(%arg0: i32) -> (i32, i32) {
    %c0_i32 = arith.constant 0 : i32
    %c0_i32_0 = arith.constant 0 : i32
    return %arg0, %c0_i32 : i32, i32
  }
  func.func @transform_1(%arg0: i32) -> (i32, i32) {
    %c0_i32 = arith.constant 0 : i32
    %c0_i32_0 = arith.constant 0 : i32
    return %arg0, %c0_i32 : i32, i32
  }
  func.func @transform_2(%arg0: i32) -> (i32, i32) {
    %c0_i32 = arith.constant 0 : i32
    %c0_i32_0 = arith.constant 0 : i32
    %c0_i32_1 = arith.constant 0 : i32
    return %c0_i32, %c0_i32_0 : i32, i32
  }
  func.func @transform_3(%arg0: i32) -> (i32, i32) {
    %c0_i32 = arith.constant 0 : i32
    %c0_i32_0 = arith.constant 0 : i32
    %c0_i32_1 = arith.constant 0 : i32
    return %c0_i32, %c0_i32_0 : i32, i32
  }
  func.func @transform_4(%arg0: i32) -> (i32, i32) {
    %c0_i32 = arith.constant 0 : i32
    %c0_i32_0 = arith.constant 0 : i32
    %c0_i32_1 = arith.constant 0 : i32
    return %c0_i32, %c0_i32_0 : i32, i32
  }
  func.func @transform_5(%arg0: i32) -> (i32, i32) {
    %c0_i32 = arith.constant 0 : i32
    %c0_i32_0 = arith.constant 0 : i32
    return %arg0, %c0_i32 : i32, i32
  }
}

module attributes {stable_mosaic.version = 11 : i64} {
  func.func @_dec_cls_kernel(%arg0: i32, %arg1: memref<2xi32, #tpu.memory_space<smem>>, %arg2: memref<1x96x32xbf16, #tpu.memory_space<vmem>>, %arg3: memref<1x32x4xf32, #tpu.memory_space<vmem>>, %arg4: memref<32x96xbf16, #tpu.memory_space<vmem>>, %arg5: memref<32x32xbf16, #tpu.memory_space<vmem>>, %arg6: memref<1x32xf32, #tpu.memory_space<vmem>>, %arg7: memref<32x4xbf16, #tpu.memory_space<vmem>>, %arg8: memref<1x4xf32, #tpu.memory_space<vmem>>, %arg9: memref<4x32x32xf32, #tpu.memory_space<vmem>>, %arg10: memref<1x32xf32, #tpu.memory_space<vmem>>, %arg11: memref<32x3xbf16, #tpu.memory_space<vmem>>, %arg12: memref<1x3xf32, #tpu.memory_space<vmem>>, %arg13: memref<1x8x128xf32, #tpu.memory_space<vmem>>, %arg14: memref<1x8x128xf32, #tpu.memory_space<vmem>>) attributes {dimension_semantics = [#tpu.dimension_semantics<parallel>], iteration_bounds = array<i64: 2>, scalar_prefetch = 1 : i64, scratch_operands = 0 : i64, tpu.core_type = #tpu.core_type<tc>, window_params = [{transform_indices = @transform_0, window_bounds = array<i64: 1, 96, 32>}, {transform_indices = @transform_1, window_bounds = array<i64: 1, 32, 4>}, {pipeline_mode = #tpu.pipeline_mode<synchronous>, transform_indices = @transform_2, window_bounds = array<i64: 32, 96>}, {pipeline_mode = #tpu.pipeline_mode<synchronous>, transform_indices = @transform_3, window_bounds = array<i64: 32, 32>}, {pipeline_mode = #tpu.pipeline_mode<synchronous>, transform_indices = @transform_4, window_bounds = array<i64: 1, 32>}, {pipeline_mode = #tpu.pipeline_mode<synchronous>, transform_indices = @transform_5, window_bounds = array<i64: 32, 4>}, {pipeline_mode = #tpu.pipeline_mode<synchronous>, transform_indices = @transform_6, window_bounds = array<i64: 1, 4>}, {pipeline_mode = #tpu.pipeline_mode<synchronous>, transform_indices = @transform_7, window_bounds = array<i64: 4, 32, 32>}, {pipeline_mode = #tpu.pipeline_mode<synchronous>, transform_indices = @transform_8, window_bounds = array<i64: 1, 32>}, {pipeline_mode = #tpu.pipeline_mode<synchronous>, transform_indices = @transform_9, window_bounds = array<i64: 32, 3>}, {pipeline_mode = #tpu.pipeline_mode<synchronous>, transform_indices = @transform_10, window_bounds = array<i64: 1, 3>}, {transform_indices = @transform_11, window_bounds = array<i64: 1, 8, 128>}, {transform_indices = @transform_12, window_bounds = array<i64: 1, 8, 128>}]} {
    %c0 = arith.constant 0 : index
    %c0_0 = arith.constant 0 : index
    %0 = vector.load %arg4[%c0, %c0_0] : memref<32x96xbf16, #tpu.memory_space<vmem>>, vector<32x96xbf16>
    %c0_1 = arith.constant 0 : index
    %c0_2 = arith.constant 0 : index
    %c0_3 = arith.constant 0 : index
    %1 = vector.load %arg2[%c0_1, %c0_2, %c0_3] : memref<1x96x32xbf16, #tpu.memory_space<vmem>>, vector<1x96x32xbf16>
    %2 = vector.shape_cast %1 : vector<1x96x32xbf16> to vector<96x32xbf16>
    %cst = arith.constant dense<0.000000e+00> : vector<32x32xf32>
    %3 = tpu.matmul %0, %2, %cst {dimension_numbers = #tpu.dot_dimension_numbers<[1], [0], [0], [1], [0, 0, 1, 1], [], []>} : vector<32x96xbf16>, vector<96x32xbf16>, vector<32x32xf32> -> vector<32x32xf32>
    %4 = arith.truncf %3 : vector<32x32xf32> to vector<32x32xbf16>
    %c0_4 = arith.constant 0 : index
    %c0_5 = arith.constant 0 : index
    %5 = vector.load %arg5[%c0_4, %c0_5] : memref<32x32xbf16, #tpu.memory_space<vmem>>, vector<32x32xbf16>
    %cst_6 = arith.constant dense<0.000000e+00> : vector<32x32xf32>
    %6 = tpu.matmul %4, %5, %cst_6 {dimension_numbers = #tpu.dot_dimension_numbers<[1], [0], [0], [1], [0, 0, 1, 1], [], []>} : vector<32x32xbf16>, vector<32x32xbf16>, vector<32x32xf32> -> vector<32x32xf32>
    %c0_7 = arith.constant 0 : index
    %c0_8 = arith.constant 0 : index
    %7 = vector.load %arg6[%c0_7, %c0_8] : memref<1x32xf32, #tpu.memory_space<vmem>>, vector<1x32xf32>
    %8 = vector.broadcast %7 : vector<1x32xf32> to vector<32x32xf32>
    %9 = arith.addf %6, %8 : vector<32x32xf32>
    %cst_9 = arith.constant 0.000000e+00 : f32
    %10 = vector.broadcast %cst_9 : f32 to vector<32x32xf32>
    %11 = arith.maximumf %9, %10 : vector<32x32xf32>
    %12 = arith.truncf %11 : vector<32x32xf32> to vector<32x32xbf16>
    %c0_10 = arith.constant 0 : index
    %c0_11 = arith.constant 0 : index
    %13 = vector.load %arg7[%c0_10, %c0_11] : memref<32x4xbf16, #tpu.memory_space<vmem>>, vector<32x4xbf16>
    %cst_12 = arith.constant dense<0.000000e+00> : vector<32x4xf32>
    %14 = tpu.matmul %12, %13, %cst_12 {dimension_numbers = #tpu.dot_dimension_numbers<[1], [0], [0], [1], [0, 0, 1, 1], [], []>} : vector<32x32xbf16>, vector<32x4xbf16>, vector<32x4xf32> -> vector<32x4xf32>
    %c0_13 = arith.constant 0 : index
    %c0_14 = arith.constant 0 : index
    %15 = vector.load %arg8[%c0_13, %c0_14] : memref<1x4xf32, #tpu.memory_space<vmem>>, vector<1x4xf32>
    %16 = vector.broadcast %15 : vector<1x4xf32> to vector<32x4xf32>
    %17 = arith.addf %14, %16 : vector<32x4xf32>
    %c0_15 = arith.constant 0 : index
    %c0_16 = arith.constant 0 : index
    %c0_17 = arith.constant 0 : index
    %18 = vector.load %arg3[%c0_15, %c0_16, %c0_17] : memref<1x32x4xf32, #tpu.memory_space<vmem>>, vector<1x32x4xf32>
    %19 = vector.shape_cast %18 : vector<1x32x4xf32> to vector<32x4xf32>
    %20 = arith.addf %19, %17 : vector<32x4xf32>
    %21 = arith.mulf %17, %17 : vector<32x4xf32>
    %22 = vector.shape_cast %21 : vector<32x4xf32> to vector<1x32x4xf32>
    %cst_18 = arith.constant dense<0.000000e+00> : vector<1xf32>
    %23 = vector.multi_reduction <add>, %22, %cst_18 [1, 2] : vector<1x32x4xf32> to vector<1xf32>
    %24 = vector.shape_cast %23 : vector<1xf32> to vector<1x1x1xf32>
    %25 = vector.extract %24[0, 0, 0] : f32 from vector<1x1x1xf32>
    %cst_19 = arith.constant 3.906250e-03 : f32
    %26 = arith.mulf %25, %cst_19 : f32
    %27 = vector.broadcast %26 : f32 to vector<1x8x128xf32>
    %c0_20 = arith.constant 0 : index
    %c0_21 = arith.constant 0 : index
    %c0_22 = arith.constant 0 : index
    %28 = vector.load %arg13[%c0_20, %c0_21, %c0_22] : memref<1x8x128xf32, #tpu.memory_space<vmem>>, vector<1x8x128xf32>
    tpu.vector_store %arg13[%c0_20, %c0_21, %c0_22], %27 {strides = array<i32>} : memref<1x8x128xf32, #tpu.memory_space<vmem>>, vector<1x8x128xf32>,
    %c0_23 = arith.constant 0 : index
    %c0_24 = arith.constant 0 : index
    %29 = vector.load %arg10[%c0_23, %c0_24] : memref<1x32xf32, #tpu.memory_space<vmem>>, vector<1x32xf32>
    %30 = vector.extract_strided_slice %20 {offsets = [0, 0], sizes = [32, 1], strides = [1, 1]} : vector<32x4xf32> to vector<32x1xf32>
    %c0_25 = arith.constant 0 : index
    %c0_26 = arith.constant 0 : index
    %c0_27 = arith.constant 0 : index
    %31 = vector.load %arg9[%c0_25, %c0_26, %c0_27] : memref<4x32x32xf32, #tpu.memory_space<vmem>>, vector<1x32x32xf32>
    %32 = vector.shape_cast %31 : vector<1x32x32xf32> to vector<32x32xf32>
    %33 = vector.broadcast %30 : vector<32x1xf32> to vector<32x32xf32>
    %34 = arith.mulf %33, %32 : vector<32x32xf32>
    %cst_28 = arith.constant dense<0.000000e+00> : vector<32xf32>
    %35 = vector.multi_reduction <add>, %34, %cst_28 [0] : vector<32x32xf32> to vector<32xf32>
    %36 = vector.shape_cast %35 : vector<32xf32> to vector<1x32xf32>
    %37 = arith.addf %29, %36 : vector<1x32xf32>
    %38 = vector.extract_strided_slice %20 {offsets = [0, 1], sizes = [32, 1], strides = [1, 1]} : vector<32x4xf32> to vector<32x1xf32>
    %c1 = arith.constant 1 : index
    %c0_29 = arith.constant 0 : index
    %c0_30 = arith.constant 0 : index
    %39 = vector.load %arg9[%c1, %c0_29, %c0_30] : memref<4x32x32xf32, #tpu.memory_space<vmem>>, vector<1x32x32xf32>
    %40 = vector.shape_cast %39 : vector<1x32x32xf32> to vector<32x32xf32>
    %41 = vector.broadcast %38 : vector<32x1xf32> to vector<32x32xf32>
    %42 = arith.mulf %41, %40 : vector<32x32xf32>
    %cst_31 = arith.constant dense<0.000000e+00> : vector<32xf32>
    %43 = vector.multi_reduction <add>, %42, %cst_31 [0] : vector<32x32xf32> to vector<32xf32>
    %44 = vector.shape_cast %43 : vector<32xf32> to vector<1x32xf32>
    %45 = arith.addf %37, %44 : vector<1x32xf32>
    %46 = vector.extract_strided_slice %20 {offsets = [0, 2], sizes = [32, 1], strides = [1, 1]} : vector<32x4xf32> to vector<32x1xf32>
    %c2 = arith.constant 2 : index
    %c0_32 = arith.constant 0 : index
    %c0_33 = arith.constant 0 : index
    %47 = vector.load %arg9[%c2, %c0_32, %c0_33] : memref<4x32x32xf32, #tpu.memory_space<vmem>>, vector<1x32x32xf32>
    %48 = vector.shape_cast %47 : vector<1x32x32xf32> to vector<32x32xf32>
    %49 = vector.broadcast %46 : vector<32x1xf32> to vector<32x32xf32>
    %50 = arith.mulf %49, %48 : vector<32x32xf32>
    %cst_34 = arith.constant dense<0.000000e+00> : vector<32xf32>
    %51 = vector.multi_reduction <add>, %50, %cst_34 [0] : vector<32x32xf32> to vector<32xf32>
    %52 = vector.shape_cast %51 : vector<32xf32> to vector<1x32xf32>
    %53 = arith.addf %45, %52 : vector<1x32xf32>
    %54 = vector.extract_strided_slice %20 {offsets = [0, 3], sizes = [32, 1], strides = [1, 1]} : vector<32x4xf32> to vector<32x1xf32>
    %c3 = arith.constant 3 : index
    %c0_35 = arith.constant 0 : index
    %c0_36 = arith.constant 0 : index
    %55 = vector.load %arg9[%c3, %c0_35, %c0_36] : memref<4x32x32xf32, #tpu.memory_space<vmem>>, vector<1x32x32xf32>
    %56 = vector.shape_cast %55 : vector<1x32x32xf32> to vector<32x32xf32>
    %57 = vector.broadcast %54 : vector<32x1xf32> to vector<32x32xf32>
    %58 = arith.mulf %57, %56 : vector<32x32xf32>
    %cst_37 = arith.constant dense<0.000000e+00> : vector<32xf32>
    %59 = vector.multi_reduction <add>, %58, %cst_37 [0] : vector<32x32xf32> to vector<32xf32>
    %60 = vector.shape_cast %59 : vector<32xf32> to vector<1x32xf32>
    %61 = arith.addf %53, %60 : vector<1x32xf32>
    %cst_38 = arith.constant 0.000000e+00 : f32
    %62 = vector.broadcast %cst_38 : f32 to vector<1x32xf32>
    %63 = arith.maximumf %61, %62 : vector<1x32xf32>
    %64 = vector.shape_cast %63 : vector<1x32xf32> to vector<1x32xf32>
    %65 = vector.broadcast %64 : vector<1x32xf32> to vector<8x32xf32>
    %66 = arith.truncf %65 : vector<8x32xf32> to vector<8x32xbf16>
    %c0_39 = arith.constant 0 : index
    %c0_40 = arith.constant 0 : index
    %67 = vector.load %arg11[%c0_39, %c0_40] : memref<32x3xbf16, #tpu.memory_space<vmem>>, vector<32x3xbf16>
    %cst_41 = arith.constant dense<0.000000e+00> : vector<8x3xf32>
    %68 = tpu.matmul %66, %67, %cst_41 {dimension_numbers = #tpu.dot_dimension_numbers<[1], [0], [0], [1], [0, 0, 1, 1], [], []>} : vector<8x32xbf16>, vector<32x3xbf16>, vector<8x3xf32> -> vector<8x3xf32>
    %c0_42 = arith.constant 0 : index
    %c0_43 = arith.constant 0 : index
    %69 = vector.load %arg12[%c0_42, %c0_43] : memref<1x3xf32, #tpu.memory_space<vmem>>, vector<1x3xf32>
    %70 = vector.broadcast %69 : vector<1x3xf32> to vector<8x3xf32>
    %71 = arith.addf %68, %70 : vector<8x3xf32>
    %72 = vector.extract_strided_slice %71 {offsets = [0, 0], sizes = [1, 3], strides = [1, 1]} : vector<8x3xf32> to vector<1x3xf32>
    %cst_44 = arith.constant dense<0xFF800000> : vector<1xf32>
    %73 = vector.multi_reduction <maximumf>, %72, %cst_44 [1] : vector<1x3xf32> to vector<1xf32>
    %74 = vector.shape_cast %73 : vector<1xf32> to vector<1x1xf32>
    %75 = vector.broadcast %74 : vector<1x1xf32> to vector<1x3xf32>
    %76 = arith.subf %72, %75 : vector<1x3xf32>
    %77 = math.exp %76 : vector<1x3xf32>
    %cst_45 = arith.constant dense<0.000000e+00> : vector<1xf32>
    %78 = vector.multi_reduction <add>, %77, %cst_45 [1] : vector<1x3xf32> to vector<1xf32>
    %79 = vector.shape_cast %78 : vector<1xf32> to vector<1x1xf32>
    %80 = math.log %79 : vector<1x1xf32>
    %81 = arith.addf %74, %80 : vector<1x1xf32>
    %82 = arith.index_cast %arg0 : i32 to index
    %83 = memref.load %arg1[%82] : memref<2xi32, #tpu.memory_space<smem>>
    %84 = tpu.iota {dimensions = array<i32: 1>} : vector<1x3xi32>
    %85 = vector.broadcast %83 : i32 to vector<1x3xi32>
    %86 = arith.cmpi eq, %84, %85 : vector<1x3xi32>
    %cst_46 = arith.constant 0.000000e+00 : f32
    %87 = vector.broadcast %cst_46 : f32 to vector<1x3xf32>
    %88 = arith.select %86, %72, %87 : vector<1x3xi1>, vector<1x3xf32>
    %cst_47 = arith.constant dense<0.000000e+00> : vector<1xf32>
    %89 = vector.multi_reduction <add>, %88, %cst_47 [1] : vector<1x3xf32> to vector<1xf32>
    %90 = vector.shape_cast %89 : vector<1xf32> to vector<1x1xf32>
    %91 = arith.subf %81, %90 : vector<1x1xf32>
    %92 = vector.shape_cast %91 : vector<1x1xf32> to vector<1x1x1xf32>
    %cst_48 = arith.constant dense<0.000000e+00> : vector<1xf32>
    %93 = vector.multi_reduction <add>, %92, %cst_48 [1, 2] : vector<1x1x1xf32> to vector<1xf32>
    %94 = vector.shape_cast %93 : vector<1xf32> to vector<1x1x1xf32>
    %95 = vector.extract %94[0, 0, 0] : f32 from vector<1x1x1xf32>
    %cst_49 = arith.constant 5.000000e-01 : f32
    %96 = arith.mulf %95, %cst_49 : f32
    %97 = vector.broadcast %96 : f32 to vector<1x8x128xf32>
    %c0_50 = arith.constant 0 : index
    %c0_51 = arith.constant 0 : index
    %c0_52 = arith.constant 0 : index
    %98 = vector.load %arg14[%c0_50, %c0_51, %c0_52] : memref<1x8x128xf32, #tpu.memory_space<vmem>>, vector<1x8x128xf32>
    tpu.vector_store %arg14[%c0_50, %c0_51, %c0_52], %97 {strides = array<i32>} : memref<1x8x128xf32, #tpu.memory_space<vmem>>, vector<1x8x128xf32>,
    return
  }
  func.func @transform_0(%arg0: i32, %arg1: memref<2xi32, #tpu.memory_space<smem>>) -> (i32, i32, i32) {
    %c0_i32 = arith.constant 0 : i32
    %c0_i32_0 = arith.constant 0 : i32
    %c0_i32_1 = arith.constant 0 : i32
    return %arg0, %c0_i32, %c0_i32_0 : i32, i32, i32
  }
  func.func @transform_1(%arg0: i32, %arg1: memref<2xi32, #tpu.memory_space<smem>>) -> (i32, i32, i32) {
    %c0_i32 = arith.constant 0 : i32
    %c0_i32_0 = arith.constant 0 : i32
    %c0_i32_1 = arith.constant 0 : i32
    return %arg0, %c0_i32, %c0_i32_0 : i32, i32, i32
  }
  func.func @transform_2(%arg0: i32, %arg1: memref<2xi32, #tpu.memory_space<smem>>) -> (i32, i32) {
    %c0_i32 = arith.constant 0 : i32
    %c0_i32_0 = arith.constant 0 : i32
    %c0_i32_1 = arith.constant 0 : i32
    return %c0_i32, %c0_i32_0 : i32, i32
  }
  func.func @transform_3(%arg0: i32, %arg1: memref<2xi32, #tpu.memory_space<smem>>) -> (i32, i32) {
    %c0_i32 = arith.constant 0 : i32
    %c0_i32_0 = arith.constant 0 : i32
    %c0_i32_1 = arith.constant 0 : i32
    return %c0_i32, %c0_i32_0 : i32, i32
  }
  func.func @transform_4(%arg0: i32, %arg1: memref<2xi32, #tpu.memory_space<smem>>) -> (i32, i32) {
    %c0_i32 = arith.constant 0 : i32
    %c0_i32_0 = arith.constant 0 : i32
    %c0_i32_1 = arith.constant 0 : i32
    return %c0_i32, %c0_i32_0 : i32, i32
  }
  func.func @transform_5(%arg0: i32, %arg1: memref<2xi32, #tpu.memory_space<smem>>) -> (i32, i32) {
    %c0_i32 = arith.constant 0 : i32
    %c0_i32_0 = arith.constant 0 : i32
    %c0_i32_1 = arith.constant 0 : i32
    return %c0_i32, %c0_i32_0 : i32, i32
  }
  func.func @transform_6(%arg0: i32, %arg1: memref<2xi32, #tpu.memory_space<smem>>) -> (i32, i32) {
    %c0_i32 = arith.constant 0 : i32
    %c0_i32_0 = arith.constant 0 : i32
    %c0_i32_1 = arith.constant 0 : i32
    return %c0_i32, %c0_i32_0 : i32, i32
  }
  func.func @transform_7(%arg0: i32, %arg1: memref<2xi32, #tpu.memory_space<smem>>) -> (i32, i32, i32) {
    %c0_i32 = arith.constant 0 : i32
    %c0_i32_0 = arith.constant 0 : i32
    %c0_i32_1 = arith.constant 0 : i32
    %c0_i32_2 = arith.constant 0 : i32
    return %c0_i32, %c0_i32_0, %c0_i32_1 : i32, i32, i32
  }
  func.func @transform_8(%arg0: i32, %arg1: memref<2xi32, #tpu.memory_space<smem>>) -> (i32, i32) {
    %c0_i32 = arith.constant 0 : i32
    %c0_i32_0 = arith.constant 0 : i32
    %c0_i32_1 = arith.constant 0 : i32
    return %c0_i32, %c0_i32_0 : i32, i32
  }
  func.func @transform_9(%arg0: i32, %arg1: memref<2xi32, #tpu.memory_space<smem>>) -> (i32, i32) {
    %c0_i32 = arith.constant 0 : i32
    %c0_i32_0 = arith.constant 0 : i32
    %c0_i32_1 = arith.constant 0 : i32
    return %c0_i32, %c0_i32_0 : i32, i32
  }
  func.func @transform_10(%arg0: i32, %arg1: memref<2xi32, #tpu.memory_space<smem>>) -> (i32, i32) {
    %c0_i32 = arith.constant 0 : i32
    %c0_i32_0 = arith.constant 0 : i32
    %c0_i32_1 = arith.constant 0 : i32
    return %c0_i32, %c0_i32_0 : i32, i32
  }
  func.func @transform_11(%arg0: i32, %arg1: memref<2xi32, #tpu.memory_space<smem>>) -> (i32, i32, i32) {
    %c0_i32 = arith.constant 0 : i32
    %c0_i32_0 = arith.constant 0 : i32
    %c0_i32_1 = arith.constant 0 : i32
    return %arg0, %c0_i32, %c0_i32_0 : i32, i32, i32
  }
  func.func @transform_12(%arg0: i32, %arg1: memref<2xi32, #tpu.memory_space<smem>>) -> (i32, i32, i32) {
    %c0_i32 = arith.constant 0 : i32
    %c0_i32_0 = arith.constant 0 : i32
    %c0_i32_1 = arith.constant 0 : i32
    return %arg0, %c0_i32, %c0_i32_0 : i32, i32, i32
  }
}

</mosaic_0001>

<bundles_post_ra>
// kernel: vae_forward.4
= control target key start
LH: loop header
LB: loop body
LE: loop exit
PB: predicated region body
PF: predicated region fallthrough
CT: control target
= control target key end

     0   :  { %vm36_vm0 = vcmask 261120   ;;  %vm55_vm1 = vcmask 257024   ;;  %s108_s1 = inlined_call_operand.vmem [shape: bf16[32,32], index: 1, kind: input, shape index: {}]   ;;  %s109_s2 = inlined_call_operand.vmem [shape: f32[1,32], index: 2, kind: input, shape index: {}]   ;;  %s110_s0 = inlined_call_operand.vmem [shape: bf16[8,32], index: 0, kind: input, shape index: {}]   ;;  %s111_s3 = inlined_call_operand.vmem [shape: bf16[8,32], index: 3, kind: output, shape index: {}]  }
   0x1   :  { %v71_v0 = vld [vmem:[%s108_s1 + $0x8] sm:$0xff]  ;;  %v70_v1 = vld [vmem:[%s108_s1] sm:$0xff] }
   0x2   :  { %46 = vmatpush.bf16.msra.mxu0 %v71_v0  ;;  %v15_v2 = vld [vmem:[%s110_s0] sm:$0xf] }
   0x3   :  { %v72_v3 = vld [vmem:[%s109_s2] ss:$0 sm:$0xff] }
   0x6   :  { %47 = vmatpush.bf16.msra.mxu0 %v70_v1 }
   0x9   :  { %69 = vmatmul.msk.bf16.vlgmr.msra.gmra.mxu0 %vm36_vm0, %v15_v2 }
  0x86   :  { %v49_v4 = vpop.f32.mrf.mxu0 }
  0x87   :  { %v50_v5 = vadd.f32 %v72_v3, %v49_v4 }
  0x89   :  { %v53_v6 = vmax.f32 %v50_v5, 0.0 }
  0x8b   :  { %v54_v7 = vpack.c.bf16 %v53_v6, %v53_v6 }
  0x8d   :  { %56 = vst.msk [vmem:[%s111_s3] sm:$0xf] %vm55_vm1, %v54_v7 }
  0x8e   :  { %v51_v8 = vpop.f32.mrf.mxu0 }

// kernel: vae_forward.5
= control target key start
LH: loop header
LB: loop body
LE: loop exit
PB: predicated region body
PF: predicated region fallthrough
CT: control target
= control target key end

     0   :  { %vm76_vm0 = vcmask 523264   ;;  %vm126_vm1 = vcmask 261120   ;;  %vm160_vm2 = vcmask 31744   ;;  %s594_s2 = inlined_call_operand.vmem [shape: bf16[64,32], index: 2, kind: input, shape index: {}]   ;;  %s595_s3 = inlined_call_operand.vmem [shape: f32[1,32], index: 3, kind: input, shape index: {}]   ;;  %s596_s0 = inlined_call_operand.vmem [shape: bf16[24,64], index: 0, kind: input, shape index: {}]   ;;  %s597_s5 = inlined_call_operand.vmem [shape: f32[1,4], index: 5, kind: input, shape index: {}]   ;;  %s598_s4 = inlined_call_operand.vmem [shape: bf16[32,4], index: 4, kind: input, shape index: {}]   ;;  %s599_s1 = inlined_call_operand.vmem [shape: f32[24,4], index: 1, kind: input, shape index: {}]   ;;  %s600_s6 = inlined_call_operand.vmem [shape: f32[1,4], index: 6, kind: input, shape index: {}]   ;;  %s601_s7 = inlined_call_operand.vmem [shape: f32[24,4], index: 7, kind: output, shape index: {0}]   ;;  %s602_s8 = inlined_call_operand.vmem [shape: f32[1,8,128], index: 8, kind: output, shape index: {1}]  }
   0x1   :  { %v409_v0 = vld [vmem:[%s594_s2 + $0x18] sm:$0xff]  ;;  %v408_v1 = vld [vmem:[%s594_s2 + $0x10] sm:$0xff]  ;;  %v407_v2 = vld [vmem:[%s594_s2 + $0x8] sm:$0xff] }
   0x2   :  { %87 = vmatpush.bf16.msra.mxu0 %v409_v0  ;;  %412 = vmatpush.bf16.msra.mxu2 %v409_v0  ;;  %v31_v3 = vld [vmem:[%s596_s0 + $0x8] sm:$0xf]  ;;  %v406_v5 = vld [vmem:[%s594_s2] sm:$0xff]  ;;  %v153_v59 = vld [vmem:[%s599_s1 + $0x10] sm:$0xff] }
   0x3   :  { %v49_v4 = vunpack.c.l.b16 %v31_v3  ;;  %v405_v6 = vld [vmem:[%s596_s0] sm:$0xff]  ;;  %v411_v8 = vld [vmem:[%s598_s4 + $0x8] sm:$0xff] }
   0x4   :  { %416 = vmatpush.bf16.msra.mxu3 %v411_v8  ;;  %139 = vmatpush.bf16.msra.mxu1 %v411_v8  ;;  %v410_v9 = vld [vmem:[%s598_s4] sm:$0xff]  ;;  %v152_v44 = vld [vmem:[%s599_s1 + $0x8] sm:$0xff] }
   0x5   :  { %v51_v7 = vpack.c.b16 %v49_v4, %v49_v4  ;;  %v420_v11 = vld [vmem:[%s595_s3] ss:$0 sm:$0xff] }
   0x6   :  { %88 = vmatpush.bf16.msra.mxu0 %v408_v1  ;;  %413 = vmatpush.bf16.msra.mxu2 %v408_v1  ;;  %v421_v23 = vld [vmem:[%s597_s5] ss:$0 sm:$0xff] }
   0x7   :  { %v151_v31 = vld [vmem:[%s599_s1] sm:$0xff] }
   0x8   :  { %417 = vmatpush.bf16.msra.mxu3 %v410_v9  ;;  %140 = vmatpush.bf16.msra.mxu1 %v410_v9 }
   0xa   :  { %89 = vmatpush.bf16.msra.mxu0 %v407_v2  ;;  %414 = vmatpush.bf16.msra.mxu2 %v407_v2 }
   0xe   :  { %90 = vmatpush.bf16.msra.mxu0 %v406_v5  ;;  %415 = vmatpush.bf16.msra.mxu2 %v406_v5 }
  0x11   :  { %393 = vmatmul.msk.bf16.vlgmr.msra.gmra.mxu0 %vm76_vm0, %v405_v6  ;;  %394 = vmatmul.msk.bf16.vlgmr.msra.gmra.mxu2 %vm76_vm0, %v51_v7 }
  0x8e   :  { %v92_v10 = vpop.f32.mrf.mxu0 }
  0x8f   :  { %v93_v13 = vadd.f32 %v420_v11, %v92_v10 }
  0x91   :  { %v101_v18 = vmax.f32 %v93_v13, 0.0 }
  0x94   :  { %v97_v12 = vpop.f32.mrf.mxu2 }
  0x95   :  { %v98_v14 = vadd.f32 %v420_v11, %v97_v12 }
  0x96   :  { %v94_v15 = vpop.f32.mrf.mxu0 }
  0x97   :  { %v103_v16 = vmax.f32 %v98_v14, 0.0  ;;  %v95_v17 = vadd.f32 %v420_v11, %v94_v15 }
  0x99   :  { %v105_v19 = vpack.c.bf16 %v103_v16, %v103_v16  ;;  %v102_v20 = vmax.f32 %v95_v17, 0.0 }
  0x9b   :  { %v104_v21 = vpack.c.bf16 %v102_v20, %v101_v18  ;;  %404 = vmatmul.msk.bf16.vlgmr.msra.gmra.mxu3 %vm126_vm1, %v105_v19 }
  0x9c   :  { %v99_v22 = vpop.f32.mrf.mxu2 }
  0x9d   :  { %403 = vmatmul.msk.bf16.vlgmr.msra.gmra.mxu1 %vm126_vm1, %v104_v21 }
 0x11a   :  { %v142_v24 = vpop.f32.mrf.mxu1 }
 0x11b   :  { %v143_v25 = vadd.f32 %v421_v23, %v142_v24 }
 0x11d   :  { %v236_v26 = vsel %vm160_vm2, %v143_v25, -inf  ;;  %v154_v34 = vadd.f32 %v151_v31, %v143_v25 }
 0x11e   :  { %v147_v27 = vpop.f32.mrf.mxu3  ;;  %237 = vmax.xlane.f32.xlu0 %v236_v26 }
 0x11f   :  { %v148_v28 = vadd.f32 %v421_v23, %v147_v27  ;;  %v157_v36 = vmul.f32 2.0, %v154_v34 }
 0x121   :  { %v242_v29 = vsel %vm160_vm2, %v148_v28, -inf  ;;  %v161_v37 = vsel %vm160_vm2, %v157_v36, -inf  ;;  %v156_v63 = vadd.f32 %v153_v59, %v148_v28 }
 0x122   :  { %243 = vmax.xlane.f32.xlu1 %v242_v29  ;;  %v144_v30 = vpop.f32.mrf.mxu1 }
 0x123   :  { %v145_v32 = vadd.f32 %v421_v23, %v144_v30  ;;  %v558_v0 = vmul.f32 2.0, %v156_v63 }
 0x125   :  { %v239_v33 = vsel %vm160_vm2, %v145_v32, -inf  ;;  %v155_v49 = vadd.f32 %v152_v44, %v145_v32  ;;  %v167_v1 = vsel %vm160_vm2, %v558_v0, -inf }
 0x126   :  { %240 = vmax.xlane.f32.xlu0 %v239_v33  ;;  %v149_v35 = vpop.f32.mrf.mxu3 }
 0x127   :  { %v158_v52 = vmul.f32 2.0, %v155_v49 }
 0x129   :  { %v164_v56 = vsel %vm160_vm2, %v158_v52, -inf }
 0x12e   :  { %162 = vmax.xlane.f32.xlu0 %v161_v37 }
 0x191   :  { %v238_v38 = vpop.xlane.xlu0 %237 }
 0x192   :  { %v245_v39 = vsub.f32 %v143_v25, %v238_v38 }
 0x194   :  { %v248_v40 = vmul.f32 1.442695, %v245_v39 }
 0x195   :  { %v244_v41 = vpop.xlane.xlu1 %243 }
 0x196   :  { %423 = vpow2.f32 %v248_v40  ;;  %v247_v46 = vsub.f32 %v148_v28, %v244_v41 }
 0x198   :  { %v252_v50 = vmul.f32 1.442695, %v247_v46 }
 0x199   :  { %v241_v42 = vpop.xlane.xlu0 %240 }
 0x19a   :  { %v246_v43 = vsub.f32 %v145_v32, %v241_v42 }
 0x19c   :  { %v538_v45 = vpop.eup %423  ;;  %v250_v47 = vmul.f32 1.442695, %v246_v43 }
 0x19d   :  { %v254_v48 = vsel %vm160_vm2, %v538_v45, 0.0 }
 0x19e   :  { %425 = vpow2.f32 %v250_v47  ;;  %255 = vadd.xlane.f32.xlu1 %v254_v48 }
 0x19f   :  { %427 = vpow2.f32 %v252_v50 }
 0x1a1   :  { %v163_v51 = vpop.xlane.xlu0 %162 }
 0x1a2   :  { %v170_v53 = vsub.f32 %v157_v36, %v163_v51 }
 0x1a4   :  { %v542_v54 = vpop.eup %425  ;;  %v173_v55 = vmul.f32 1.442695, %v170_v53 }
 0x1a5   :  { %v257_v57 = vsel %vm160_vm2, %v542_v54, 0.0  ;;  %v547_v58 = vpop.eup %427 }
 0x1a6   :  { %429 = vpow2.f32 %v173_v55  ;;  %165 = vmax.xlane.f32.xlu1 %v164_v56  ;;  %258 = vadd.xlane.f32.xlu2 %v257_v57  ;;  %v260_v61 = vsel %vm160_vm2, %v547_v58, 0.0 }
 0x1ac   :  { %v552_v60 = vpop.eup %429 }
 0x1ad   :  { %v179_v62 = vsel %vm160_vm2, %v552_v60, 0.0 }
 0x1ae   :  { %261 = vadd.xlane.f32.xlu2 %v260_v61  ;;  %180 = vadd.xlane.f32.xlu1 %v179_v62  ;;  %v422_v62 = vld [vmem:[%s600_s6] ss:$0 sm:$0xff] }
 0x1b6   :  { %168 = vmax.xlane.f32.xlu2 %v167_v1 }
 0x211   :  { %v256_v2 = vpop.xlane.xlu1 %255 }
 0x212   :  { %431 = vrcp.f32 %v256_v2  ;;  %v274_v11 = vand.u32 2147483648, %v256_v2  ;;  %vm268_vm4 = vweird.f32 %v256_v2  ;;  %v272_v13 = vand.u32 2147483647, %v256_v2 }
 0x214   :  { %v275_v19 = vor.u32 1.1754944e-38, %v274_v11  ;;  %vm273_vm6 = vcmp.eq.f32.partialorder %v272_v13, 8.507059e+37 }
 0x218   :  { %v432_v3 = vpop.eup %431 }
 0x219   :  { %v264_v4 = vmul.f32 %v432_v3, %v256_v2  ;;  %v166_v5 = vpop.xlane.xlu1 %165  ;;  %v259_v6 = vpop.xlane.xlu2 %258  ;;  %vm269_vm3 = vweird.f32 %v432_v3 }
 0x21a   :  { %v171_v7 = vsub.f32 %v158_v52, %v166_v5  ;;  %433 = vrcp.f32 %v259_v6  ;;  %vm270_vm5 = vmor %vm268_vm4, %vm269_vm3  ;;  %v287_v22 = vand.u32 2147483647, %v259_v6  ;;  %v289_v23 = vand.u32 2147483648, %v259_v6 }
 0x21b   :  { %v265_v8 = vsub.f32 1.0, %v264_v4  ;;  %vm283_vm8 = vweird.f32 %v259_v6 }
 0x21c   :  { %v175_v9 = vmul.f32 1.442695, %v171_v7  ;;  %v290_v30 = vor.u32 1.1754944e-38, %v289_v23  ;;  %vm288_vm10 = vcmp.eq.f32.partialorder %v287_v22, 8.507059e+37 }
 0x21d   :  { %v266_v10 = vmul.f32 %v432_v3, %v265_v8 }
 0x21e   :  { %435 = vpow2.f32 %v175_v9 }
 0x21f   :  { %v267_v12 = vadd.f32 %v432_v3, %v266_v10 }
 0x220   :  { %v434_v14 = vpop.eup %433 }
 0x221   :  { %v279_v15 = vmul.f32 %v434_v14, %v259_v6  ;;  %v262_v16 = vpop.xlane.xlu2 %261  ;;  %v181_v17 = vpop.xlane.xlu1 %180  ;;  %v271_v18 = vsel %vm270_vm5, %v432_v3, %v267_v12  ;;  %vm284_vm7 = vweird.f32 %v434_v14 }
 0x222   :  { %437 = vrcp.f32 %v262_v16  ;;  %v276_v24 = vsel %vm273_vm6, %v275_v19, %v271_v18  ;;  %vm285_vm9 = vmor %vm283_vm8, %vm284_vm7  ;;  %v302_v39 = vand.u32 2147483647, %v262_v16  ;;  %v304_v40 = vand.u32 2147483648, %v262_v16 }
 0x223   :  { %v280_v20 = vsub.f32 1.0, %v279_v15  ;;  %439 = vrcp.f32 %v181_v17  ;;  %v277_v27 = vmul.f32 %v538_v45, %v276_v24  ;;  %v199_v42 = vand.u32 2147483648, %v181_v17 }
 0x224   :  { %v562_v21 = vpop.eup %435  ;;  %v197_v46 = vand.u32 2147483647, %v181_v17  ;;  %vm298_vm13 = vweird.f32 %v262_v16  ;;  %v305_v48 = vor.u32 1.1754944e-38, %v304_v40  ;;  %vm193_vm15 = vweird.f32 %v181_v17 }
 0x225   :  { %v281_v25 = vmul.f32 %v434_v14, %v280_v20  ;;  %v182_v26 = vsel %vm160_vm2, %v562_v21, 0.0  ;;  %v329_v34 = vadd.f32 1e-16, %v277_v27  ;;  %vm303_vm0 = vcmp.eq.f32.partialorder %v302_v39, 8.507059e+37 }
 0x226   :  { %183 = vadd.xlane.f32.xlu2 %v182_v26  ;;  %v200_v50 = vor.u32 1.1754944e-38, %v199_v42  ;;  %vm198_vm3 = vcmp.eq.f32.partialorder %v197_v46, 8.507059e+37 }
 0x227   :  { %v282_v28 = vadd.f32 %v434_v14, %v281_v25  ;;  %441 = vlog2.f32 %v329_v34 }
 0x228   :  { %v438_v29 = vpop.eup %437 }
 0x229   :  { %v440_v31 = vpop.eup %439  ;;  %v294_v32 = vmul.f32 %v438_v29, %v262_v16  ;;  %v286_v33 = vsel %vm285_vm9, %v434_v14, %v282_v28  ;;  %vm299_vm11 = vweird.f32 %v438_v29  ;;  %v169_v3 = vpop.xlane.xlu2 %168 }
 0x22a   :  { %v189_v35 = vmul.f32 %v440_v31, %v181_v17  ;;  %v291_v36 = vsel %vm288_vm10, %v290_v30, %v286_v33  ;;  %vm194_vm12 = vweird.f32 %v440_v31  ;;  %vm300_vm14 = vmor %vm298_vm13, %vm299_vm11 }
 0x22b   :  { %v295_v37 = vsub.f32 1.0, %v294_v32  ;;  %v292_v38 = vmul.f32 %v542_v54, %v291_v36  ;;  %vm195_vm1 = vmor %vm193_vm15, %vm194_vm12 }
 0x22c   :  { %v190_v41 = vsub.f32 1.0, %v189_v35 }
 0x22d   :  { %v296_v43 = vmul.f32 %v438_v29, %v295_v37  ;;  %v330_v44 = vadd.f32 1e-16, %v292_v38  ;;  %v442_v54 = vpop.eup %441 }
 0x22e   :  { %v191_v45 = vmul.f32 %v440_v31, %v190_v41  ;;  %v333_v63 = vmul.f32 0.6931472, %v442_v54 }
 0x22f   :  { %v297_v47 = vadd.f32 %v438_v29, %v296_v43  ;;  %443 = vlog2.f32 %v330_v44 }
 0x230   :  { %v192_v49 = vadd.f32 %v440_v31, %v191_v45  ;;  %v342_v4 = vsub.f32 %v333_v63, %v422_v62 }
 0x231   :  { %v301_v51 = vsel %vm300_vm14, %v438_v29, %v297_v47 }
 0x232   :  { %v196_v52 = vsel %vm195_vm1, %v440_v31, %v192_v49  ;;  %v306_v53 = vsel %vm303_vm0, %v305_v48, %v301_v51  ;;  %v345_v7 = vmul.f32 %v342_v4, %v277_v27 }
 0x233   :  { %v201_v55 = vsel %vm198_vm3, %v200_v50, %v196_v52  ;;  %v307_v56 = vmul.f32 %v547_v58, %v306_v53 }
 0x234   :  { %v202_v57 = vmul.f32 %v552_v60, %v201_v55  ;;  %v172_v60 = vsub.f32 %v558_v0, %v169_v3  ;;  %v348_v12 = vsel %vm160_vm2, %v345_v7, 0.0 }
 0x235   :  { %v444_v59 = vpop.eup %443  ;;  %v331_v61 = vadd.f32 1e-16, %v307_v56 }
 0x236   :  { %233 = vst.msk [vmem:[%s601_s7] sm:$0xff] %vm160_vm2, %v202_v57  ;;  %v335_v1 = vmul.f32 0.6931472, %v444_v59  ;;  %v177_v10 = vmul.f32 1.442695, %v172_v60 }
 0x237   :  { %445 = vlog2.f32 %v331_v61 }
 0x238   :  { %v343_v2 = vsub.f32 %v335_v1, %v422_v62  ;;  %447 = vpow2.f32 %v177_v10 }
 0x23a   :  { %v346_v58 = vmul.f32 %v343_v2, %v292_v38 }
 0x23c   :  { %v349_v9 = vsel %vm160_vm2, %v346_v58, 0.0 }
 0x23d   :  { %v446_v5 = vpop.eup %445  ;;  %v350_v13 = vadd.f32 %v349_v9, %v348_v12 }
 0x23e   :  { %v337_v6 = vmul.f32 0.6931472, %v446_v5  ;;  %v448_v16 = vpop.eup %447 }
 0x23f   :  { %v185_v17 = vsel %vm160_vm2, %v448_v16, 0.0 }
 0x240   :  { %v344_v8 = vsub.f32 %v337_v6, %v422_v62 }
 0x242   :  { %v347_v11 = vmul.f32 %v344_v8, %v307_v56 }
 0x244   :  { %v351_v14 = vsel %vm160_vm2, %v347_v11, 0.0 }
 0x245   :  { %v352_v15 = vadd.f32 %v351_v14, %v350_v13 }
 0x247   :  { %353 = vadd.xlane.f32.xlu0 %v352_v15 }
 0x24f   :  { %186 = vadd.xlane.f32.xlu0 %v185_v17 }
 0x299   :  { %v184_v0 = vpop.xlane.xlu2 %183 }
 0x29a   :  { %449 = vrcp.f32 %v184_v0  ;;  %v214_v22 = vand.u32 2147483648, %v184_v0  ;;  %v212_v24 = vand.u32 2147483647, %v184_v0  ;;  %vm208_vm5 = vweird.f32 %v184_v0 }
 0x29c   :  { %v215_v26 = vor.u32 1.1754944e-38, %v214_v22  ;;  %vm213_vm7 = vcmp.eq.f32.partialorder %v212_v24, 8.507059e+37 }
 0x2a0   :  { %v450_v18 = vpop.eup %449 }
 0x2a1   :  { %v204_v19 = vmul.f32 %v450_v18, %v184_v0  ;;  %vm209_vm4 = vweird.f32 %v450_v18 }
 0x2a2   :  { %vm210_vm6 = vmor %vm208_vm5, %vm209_vm4 }
 0x2a3   :  { %v205_v20 = vsub.f32 1.0, %v204_v19 }
 0x2a5   :  { %v206_v23 = vmul.f32 %v450_v18, %v205_v20 }
 0x2a7   :  { %v207_v25 = vadd.f32 %v450_v18, %v206_v23 }
 0x2a9   :  { %v211_v27 = vsel %vm210_vm6, %v450_v18, %v207_v25 }
 0x2aa   :  { %v216_v28 = vsel %vm213_vm7, %v215_v26, %v211_v27 }
 0x2ab   :  { %v217_v29 = vmul.f32 %v562_v21, %v216_v28 }
 0x2ad   :  { %234 = vst.msk [vmem:[%s601_s7 + $0x8] sm:$0xff] %vm160_vm2, %v217_v29 }
 0x2ba   :  { %v354_v30 = vpop.xlane.xlu0 %353 }
 0x2bb   :  { %v355_v31 = vrot.slane %v354_v30, 4 }
 0x2bd   :  { %v356_v32 = vadd.f32 %v355_v31, %v354_v30 }
 0x2bf   :  { %v357_v33 = vrot.slane %v356_v32, 2 }
 0x2c1   :  { %v358_v34 = vadd.f32 %v357_v33, %v356_v32 }
 0x2c2   :  { %v187_v35 = vpop.xlane.xlu0 %186 }
 0x2c3   :  { %451 = vrcp.f32 %v187_v35  ;;  %v359_v36 = vrot.slane %v358_v34, 1  ;;  %v229_v41 = vand.u32 2147483648, %v187_v35  ;;  %v227_v42 = vand.u32 2147483647, %v187_v35 }
 0x2c4   :  { %vm223_vm9 = vweird.f32 %v187_v35 }
 0x2c5   :  { %v360_v37 = vadd.f32 %v359_v36, %v358_v34  ;;  %v230_v44 = vor.u32 1.1754944e-38, %v229_v41  ;;  %vm228_vm11 = vcmp.eq.f32.partialorder %v227_v42, 8.507059e+37 }
 0x2c7   :  { %418 = vpush %v360_v37 }
 0x2c9   :  { %v452_v38 = vpop.eup %451 }
 0x2ca   :  { %v219_v39 = vmul.f32 %v452_v38, %v187_v35  ;;  %vm224_vm8 = vweird.f32 %v452_v38 }
 0x2cb   :  { %vm225_vm10 = vmor %vm223_vm9, %vm224_vm8 }
 0x2cc   :  { %v220_v40 = vsub.f32 1.0, %v219_v39 }
 0x2ce   :  { %v221_v21 = vmul.f32 %v452_v38, %v220_v40 }
 0x2d0   :  { %v222_v43 = vadd.f32 %v452_v38, %v221_v21 }
 0x2d2   :  { %v226_v45 = vsel %vm225_vm10, %v452_v38, %v222_v43 }
 0x2d3   :  { %v231_v46 = vsel %vm228_vm11, %v230_v44, %v226_v45 }
 0x2d4   :  { %v232_v47 = vmul.f32 %v448_v16, %v231_v46 }
 0x2d6   :  { %235 = vst.msk [vmem:[%s601_s7 + $0x10] sm:$0xff] %vm160_vm2, %v232_v47 }
 0x2f8   :  { %s419_s10 = spop %418 }
 0x2f9   :  { %s362_s11 = smul.f32 0.125, %s419_s10 }
 0x2fb   :  { %v363_v48 = vstv %s362_s11 }
 0x2fc   :  { %364 = vst [vmem:[%s602_s8] sm:$0xff] %v363_v48 }

// kernel: vae_forward.6
= control target key start
LH: loop header
LB: loop body
LE: loop exit
PB: predicated region body
PF: predicated region fallthrough
CT: control target
= control target key end

     0   :  { %vm147_vm0 = vcmask 1043456   ;;  %vm110_vm1 = vcmask 64512   ;;  %vm271_vm2 = vcmask 195584   ;;  %v2507_v24 = vmov 3   ;;  %s1522_s17 = smov 96   ;;  %s1523_s18 = smov 32   ;;  %s2500_s1 = inlined_call_operand.vmem [shape: f32[24,4], index: 1, kind: input, shape index: {}]   ;;  %s2501_s3 = inlined_call_operand.vmem [shape: bf16[8,128], index: 3, kind: input, shape index: {}]   ;;  %s2502_s0 = inlined_call_operand.vmem [shape: bf16[192,8], index: 0, kind: input, shape index: {}]   ;;  %s2503_s2 = inlined_call_operand.vmem [shape: f32[192,24], index: 2, kind: input, shape index: {}]   ;;  %s2504_s4 = inlined_call_operand.vmem [shape: f32[1,128], index: 4, kind: input, shape index: {}]   ;;  %s2505_s5 = inlined_call_operand.vmem [shape: bf16[192,32], index: 5, kind: output, shape index: {}]  }
   0x1   :  { %v270_v0 = vld [vmem:[%s2500_s1 + $0x10] sm:$0xff]  ;;  %v45_v1 = vld [vmem:[%s2501_s3] sm:$0xf]  ;;  %v269_v2 = vld [vmem:[%s2500_s1 + $0x8] sm:$0xff]  ;;  %1460 = vset.pattern.permute.xlu2 %v2507_v24  ;;  %v2506_v25 = vmov 2   ;;  %v2509_v26 = vmov 0  }
   0x2   :  { %357 = vmatpush.msra.mxu1 %v270_v0  ;;  %v149_v3 = vsel %vm147_vm0, %v45_v1, 0  ;;  %1447 = vmatpush.msra.mxu2 %v270_v0  ;;  %v1434_v4 = vld [vmem:[%s2502_s0] sm:$0xff]  ;;  %v245_v8 = vld [vmem:[%s2503_s2 + $0x8] sm:$0xff]  ;;  %v246_v11 = vld [vmem:[%s2503_s2 + $0x10] sm:$0xff]  ;;  %v1520_v36 = vmov 1   ;;  %vm1321_vm3 = vcmask 257024  }
   0x3   :  { %158 = vmatpush.bf16.msra.mxu0 %v149_v3  ;;  %v268_v5 = vld [vmem:[%s2500_s1] sm:$0xff]  ;;  %1446 = vmatpush.bf16.msra.mxu3 %v149_v3  ;;  %v257_v9 = vld [vmem:[%s2503_s2 + $0x68] sm:$0xff]  ;;  %v258_v12 = vld [vmem:[%s2503_s2 + $0x70] sm:$0xff] }
   0x4   :  { %358 = vmatpush.msra.mxu1 %v269_v2  ;;  %1448 = vmatpush.msra.mxu2 %v269_v2  ;;  %v244_v6 = vld [vmem:[%s2503_s2] sm:$0xff]  ;;  %v1435_v10 = vld [vmem:[%s2502_s0 + $0x8] sm:$0xff]  ;;  %v247_v13 = vld [vmem:[%s2503_s2 + $0x18] sm:$0xff] }
   0x5   :  { %v256_v7 = vld [vmem:[%s2503_s2 + $0x60] sm:$0xff]  ;;  %v259_v14 = vld [vmem:[%s2503_s2 + $0x78] sm:$0xff]  ;;  %v1436_v15 = vld [vmem:[%s2502_s0 + $0x10] sm:$0xff]  ;;  %1459 = vset.pattern.permute.xlu1 %v2506_v25  ;;  %1457 = vset.pattern.permute.xlu0 %v2509_v26 }
   0x6   :  { %359 = vmatpush.msra.mxu1 %v268_v5  ;;  %1398 = vmatmul.msk.bf16.vlgmr.msra.gmra.mxu0 %vm110_vm1, %v1434_v4  ;;  %v248_v16 = vld [vmem:[%s2503_s2 + $0x20] sm:$0xff]  ;;  %v1437_v18 = vld [vmem:[%s2502_s0 + $0x18] sm:$0xff]  ;;  %v249_v19 = vld [vmem:[%s2503_s2 + $0x28] sm:$0xff] }
   0x7   :  { %1410 = vmatmul.msk.f32.vlgmr.msra.gmra.mxu1 %vm271_vm2, %v244_v6  ;;  %1449 = vmatpush.msra.mxu2 %v268_v5  ;;  %v260_v17 = vld [vmem:[%s2503_s2 + $0x80] sm:$0xff]  ;;  %v261_v20 = vld [vmem:[%s2503_s2 + $0x88] sm:$0xff]  ;;  %v250_v22 = vld [vmem:[%s2503_s2 + $0x30] sm:$0xff] }
   0x8   :  { %1422 = vmatmul.msk.f32.vlgmr.msra.gmra.mxu2 %vm271_vm2, %v256_v7  ;;  %v1438_v21 = vld [vmem:[%s2502_s0 + $0x20] sm:$0xff]  ;;  %v262_v23 = vld [vmem:[%s2503_s2 + $0x90] sm:$0xff]  ;;  %v1439_v27 = vld [vmem:[%s2502_s0 + $0x28] sm:$0xff] }
   0x9   :  { %v1440_v28 = vld [vmem:[%s2502_s0 + $0x30] sm:$0xff]  ;;  %v251_v29 = vld [vmem:[%s2503_s2 + $0x38] sm:$0xff]  ;;  %v252_v32 = vld [vmem:[%s2503_s2 + $0x40] sm:$0xff] }
   0xa   :  { %v1441_v30 = vld [vmem:[%s2502_s0 + $0x38] sm:$0xff]  ;;  %v264_v33 = vld [vmem:[%s2503_s2 + $0xa0] sm:$0xff]  ;;  %v253_v37 = vld [vmem:[%s2503_s2 + $0x48] sm:$0xff] }
   0xb   :  { %1405 = vmatmul.msk.bf16.vlgmr.msra.gmra.mxu3 %vm110_vm1, %v1441_v30  ;;  %v263_v31 = vld [vmem:[%s2503_s2 + $0x98] sm:$0xff]  ;;  %v265_v38 = vld [vmem:[%s2503_s2 + $0xa8] sm:$0xff]  ;;  %v254_v41 = vld [vmem:[%s2503_s2 + $0x50] sm:$0xff] }
   0xc   :  { %v266_v42 = vld [vmem:[%s2503_s2 + $0xb0] sm:$0xff]  ;;  %v1442_v43 = vld [vmem:[%s2502_s0 + $0x40] sm:$0xff]  ;;  %v255_v46 = vld [vmem:[%s2503_s2 + $0x58] sm:$0xff] }
   0xd   :  { %v267_v47 = vld [vmem:[%s2503_s2 + $0xb8] sm:$0xff]  ;;  %v1443_v50 = vld [vmem:[%s2502_s0 + $0x48] sm:$0xff]  ;;  %v1444_v60 = vld [vmem:[%s2502_s0 + $0x50] sm:$0xff] }
   0xf   :  { %1411 = vmatmul.msk.f32.gmra.mxu1 %vm271_vm2, %v245_v8 }
  0x10   :  { %1423 = vmatmul.msk.f32.gmra.mxu2 %vm271_vm2, %v257_v9 }
  0x16   :  { %1399 = vmatmul.msk.bf16.gmra.mxu0 %vm110_vm1, %v1435_v10 }
  0x17   :  { %1412 = vmatmul.msk.f32.gmra.mxu1 %vm271_vm2, %v246_v11 }
  0x18   :  { %1424 = vmatmul.msk.f32.gmra.mxu2 %vm271_vm2, %v258_v12 }
  0x1b   :  { %1406 = vmatmul.msk.bf16.gmra.mxu3 %vm110_vm1, %v1442_v43 }
  0x1f   :  { %1413 = vmatmul.msk.f32.gmra.mxu1 %vm271_vm2, %v247_v13 }
  0x20   :  { %1425 = vmatmul.msk.f32.gmra.mxu2 %vm271_vm2, %v259_v14 }
  0x26   :  { %1400 = vmatmul.msk.bf16.gmra.mxu0 %vm110_vm1, %v1436_v15  ;;  %v1445_v15 = vld [vmem:[%s2502_s0 + $0x58] sm:$0xff] }
  0x27   :  { %1414 = vmatmul.msk.f32.gmra.mxu1 %vm271_vm2, %v248_v16 }
  0x28   :  { %1426 = vmatmul.msk.f32.gmra.mxu2 %vm271_vm2, %v260_v17 }
  0x2b   :  { %1407 = vmatmul.msk.bf16.gmra.mxu3 %vm110_vm1, %v1443_v50 }
  0x2f   :  { %1415 = vmatmul.msk.f32.gmra.mxu1 %vm271_vm2, %v249_v19 }
  0x30   :  { %1427 = vmatmul.msk.f32.gmra.mxu2 %vm271_vm2, %v261_v20 }
  0x36   :  { %1401 = vmatmul.msk.bf16.gmra.mxu0 %vm110_vm1, %v1437_v18 }
  0x37   :  { %1416 = vmatmul.msk.f32.gmra.mxu1 %vm271_vm2, %v250_v22 }
  0x38   :  { %1428 = vmatmul.msk.f32.gmra.mxu2 %vm271_vm2, %v262_v23  ;;  %v1839_v23 = vld [vmem:[%s2504_s4] ss:$0 sm:$0xff]  ;;  %s1521_s4 = smov 64  }
  0x3b   :  { %1408 = vmatmul.msk.bf16.gmra.mxu3 %vm110_vm1, %v1444_v60 }
  0x3f   :  { %1417 = vmatmul.msk.f32.gmra.mxu1 %vm271_vm2, %v251_v29 }
  0x40   :  { %1429 = vmatmul.msk.f32.gmra.mxu2 %vm271_vm2, %v263_v31 }
  0x46   :  { %1402 = vmatmul.msk.bf16.gmra.mxu0 %vm110_vm1, %v1438_v21 }
  0x47   :  { %1418 = vmatmul.msk.f32.gmra.mxu1 %vm271_vm2, %v252_v32 }
  0x48   :  { %1430 = vmatmul.msk.f32.gmra.mxu2 %vm271_vm2, %v264_v33 }
  0x4b   :  { %1409 = vmatmul.msk.bf16.gmra.mxu3 %vm110_vm1, %v1445_v15 }
  0x4f   :  { %1419 = vmatmul.msk.f32.gmra.mxu1 %vm271_vm2, %v253_v37 }
  0x50   :  { %1431 = vmatmul.msk.f32.gmra.mxu2 %vm271_vm2, %v265_v38 }
  0x56   :  { %1403 = vmatmul.msk.bf16.gmra.mxu0 %vm110_vm1, %v1439_v27 }
  0x57   :  { %1420 = vmatmul.msk.f32.gmra.mxu1 %vm271_vm2, %v254_v41 }
  0x58   :  { %1432 = vmatmul.msk.f32.gmra.mxu2 %vm271_vm2, %v266_v42 }
  0x5f   :  { %1421 = vmatmul.msk.f32.gmra.mxu1 %vm271_vm2, %v255_v46 }
  0x60   :  { %1433 = vmatmul.msk.f32.gmra.mxu2 %vm271_vm2, %v267_v47 }
  0x66   :  { %1404 = vmatmul.msk.bf16.gmra.mxu0 %vm110_vm1, %v1440_v28 }
  0x83   :  { %v1750_v54 = vpop.f32.mrf.mxu0 }
  0x84   :  { %v361_v34 = vpop.f32.mrf.mxu1 }
  0x85   :  { %1058 = vperm.xlu2 %1460, %v361_v34   ;;  %818 = vperm.xlu1 %1459, %v361_v34  }
  0x86   :  { %435 = vperm.xlu0 %1457, %v361_v34  }
  0x8b   :  { %v1673_v35 = vpop.f32.mrf.mxu2  ;;  %v1763_v58 = vpop.f32.mrf.mxu0 }
  0x8c   :  { %v364_v39 = vpop.f32.mrf.mxu1 }
  0x8d   :  { %1463 = vset.pattern.permute.xlu2 %v2506_v25  ;;  %1462 = vset.pattern.permute.xlu1 %v1520_v36 }
  0x8e   :  { %1458 = vset.pattern.permute.xlu0 %v1520_v36  ;;  %866 = vperm.xlu2 %1463, %v1673_v35  }
  0x8f   :  { %626 = vperm.xlu1 %1462, %v1673_v35   ;;  %578 = vperm.xlu0 %1458, %v361_v34  }
  0x93   :  { %v1690_v40 = vpop.f32.mrf.mxu2  ;;  %v165_v62 = vpop.f32.mrf.mxu0 }
  0x94   :  { %2518 = vst [vmem:[#allocation2_spill] sm:$0xff] %v1690_v40  ;;  %v367_v44 = vpop.f32.mrf.mxu1  ;;  %v166_v33 = vadd.f32 %v1839_v23, %v165_v62 }
  0x96   :  { %822 = vperm.xlu2 %1463, %v364_v39   ;;  %v1863_v38 = vmax.f32 %v166_v33, 0.0 }
  0x97   :  { %1461 = vset.pattern.permute.xlu0 %v2509_v26  ;;  %582 = vperm.xlu1 %1462, %v364_v39  }
  0x98   :  { %495 = vperm.xlu0 %1461, %v1673_v35  }
  0x9b   :  { %v1709_v45 = vpop.f32.mrf.mxu2  ;;  %v1785_v2 = vpop.f32.mrf.mxu0 }
  0x9c   :  { %v370_v48 = vpop.f32.mrf.mxu1 }
  0x9e   :  { %1466 = vset.pattern.permute.xlu2 %v1520_v36 }
  0x9f   :  { %1465 = vset.pattern.permute.xlu1 %v2509_v26  ;;  %630 = vperm.xlu2 %1466, %v1690_v40  }
  0xa0   :  { %500 = vperm.xlu1 %1465, %v1690_v40   ;;  %440 = vperm.xlu0 %1461, %v364_v39  }
  0xa3   :  { %v1727_v49 = vpop.f32.mrf.mxu2  ;;  %v170_v7 = vpop.f32.mrf.mxu0 }
  0xa4   :  { %v373_v51 = vpop.f32.mrf.mxu1  ;;  %v171_v27 = vadd.f32 %v1839_v23, %v170_v7 }
  0xa6   :  { %v1848_v29 = vmax.f32 %v171_v27, 0.0 }
  0xa7   :  { %586 = vperm.xlu2 %1466, %v367_v44  }
  0xa8   :  { %1464 = vset.pattern.permute.xlu0 %v2507_v24  ;;  %445 = vperm.xlu1 %1465, %v367_v44  }
  0xa9   :  { %1062 = vperm.xlu0 %1464, %v364_v39  }
  0xab   :  { %v1742_v52 = vpop.f32.mrf.mxu2  ;;  %v1809_v12 = vpop.f32.mrf.mxu0 }
  0xac   :  { %2519 = vst [vmem:[#allocation3_spill] sm:$0xff] %v1742_v52  ;;  %v376_v53 = vpop.f32.mrf.mxu1 }
  0xaf   :  { %1469 = vset.pattern.permute.xlu2 %v2509_v26 }
  0xb0   :  { %1468 = vset.pattern.permute.xlu1 %v2507_v24  ;;  %505 = vperm.xlu2 %1469, %v1709_v45  }
  0xb1   :  { %1467 = vset.pattern.permute.xlu0 %v2506_v25  ;;  %1066 = vperm.xlu1 %1468, %v367_v44  }
  0xb2   :  { %870 = vperm.xlu0 %1467, %v1690_v40  }
  0xb3   :  { %v1756_v56 = vpop.f32.mrf.mxu2  ;;  %v1830_v20 = vpop.f32.mrf.mxu0 }
  0xb4   :  { %2521 = vst [vmem:[#allocation5_spill] sm:$0xff] %v1756_v56  ;;  %v379_v59 = vpop.f32.mrf.mxu1 }
  0xb8   :  { %1475 = vset.pattern.permute.xlu2 %v2507_v24 }
  0xb9   :  { %1471 = vset.pattern.permute.xlu1 %v2506_v25  ;;  %1070 = vperm.xlu2 %1475, %v370_v48  }
  0xba   :  { %826 = vperm.xlu0 %1467, %v367_v44   ;;  %874 = vperm.xlu1 %1471, %v1709_v45  }
  0xbb   :  { %v1791_v5 = vpop.f32.mrf.mxu2  ;;  %v1854_v32 = vpop.f32.mrf.mxu0 }
  0xbc   :  { %v382_v11 = vpop.f32.mrf.mxu1 }
  0xc1   :  { %1478 = vset.pattern.permute.xlu2 %v2506_v25 }
  0xc2   :  { %1470 = vset.pattern.permute.xlu0 %v1520_v36  ;;  %1472 = vset.pattern.permute.xlu1 %v2509_v26 }
  0xc3   :  { %634 = vperm.xlu0 %1470, %v1709_v45   ;;  %878 = vperm.xlu2 %1478, %v1727_v49   ;;  %v1818_v16 = vpop.f32.mrf.mxu2  ;;  %v1872_v44 = vpop.f32.mrf.mxu0 }
  0xc4   :  { %450 = vperm.xlu1 %1472, %v370_v48   ;;  %2522 = vst [vmem:[#allocation6_spill] sm:$0xff] %v1818_v16  ;;  %v1832_v21 = vpop.f32.mrf.mxu1 }
  0xcb   :  { %1476 = vset.pattern.permute.xlu0 %v2509_v26  ;;  %1479 = vset.pattern.permute.xlu2 %v2509_v26  ;;  %v1852_v31 = vpop.f32.mrf.mxu2 }
  0xcc   :  { %1473 = vset.pattern.permute.xlu1 %v1520_v36  ;;  %510 = vperm.xlu0 %1476, %v1727_v49   ;;  %2526 = vst [vmem:[#allocation10_spill] sm:$0xff] %v1852_v31  ;;  %v1870_v43 = vpop.f32.mrf.mxu1 }
  0xcd   :  { %590 = vperm.xlu1 %1473, %v370_v48   ;;  %455 = vperm.xlu2 %1479, %v373_v51  }
  0xd4   :  { %1485 = vset.pattern.permute.xlu0 %v2506_v25 }
  0xd5   :  { %1474 = vset.pattern.permute.xlu1 %v2506_v25  ;;  %1480 = vset.pattern.permute.xlu2 %v1520_v36 }
  0xd6   :  { %882 = vperm.xlu0 %1485, %v1742_v52   ;;  %830 = vperm.xlu1 %1474, %v370_v48   ;;  %v1883_v48 = vpop.f32.mrf.mxu2 }
  0xd7   :  { %594 = vperm.xlu2 %1480, %v373_v51  }
  0xde   :  { %1487 = vset.pattern.permute.xlu0 %v1520_v36  ;;  %1477 = vset.pattern.permute.xlu1 %v1520_v36 }
  0xdf   :  { %1481 = vset.pattern.permute.xlu2 %v2506_v25  ;;  %638 = vperm.xlu1 %1477, %v1727_v49   ;;  %v1754_v55 = vpop.permute.xlu2 %1058 }
  0xe0   :  { %2520 = vst [vmem:[#allocation4_spill] sm:$0xff] %v1754_v55  ;;  %834 = vperm.xlu2 %1481, %v373_v51   ;;  %598 = vperm.xlu0 %1487, %v376_v53  }
  0xe7   :  { %1482 = vset.pattern.permute.xlu1 %v2507_v24 }
  0xe8   :  { %1484 = vset.pattern.permute.xlu2 %v1520_v36  ;;  %646 = vperm.xlu0 %1487, %v1756_v56   ;;  %v1761_v57 = vpop.permute.xlu2 %866 }
  0xe9   :  { %1074 = vperm.xlu1 %1482, %v373_v51   ;;  %642 = vperm.xlu2 %1484, %v1742_v52  }
  0xf0   :  { %1491 = vset.pattern.permute.xlu0 %v2509_v26  ;;  %v1770_v61 = vpop.permute.xlu2 %822 }
  0xf1   :  { %1483 = vset.pattern.permute.xlu1 %v2509_v26  ;;  %1486 = vset.pattern.permute.xlu2 %v2509_v26 }
  0xf2   :  { %465 = vperm.xlu0 %1491, %v379_v59   ;;  %515 = vperm.xlu1 %1483, %v1742_v52  }
  0xf3   :  { %460 = vperm.xlu2 %1486, %v376_v53  }
  0xf7   :  { %v1776_v63 = vpop.permute.xlu1 %818 }
  0xf8   :  { %v1778_v0 = vpop.permute.xlu0 %435 }
  0xf9   :  { %v1780_v1 = vpop.permute.xlu2 %630 }
  0xfa   :  { %1494 = vset.pattern.permute.xlu0 %v2507_v24  ;;  %1488 = vset.pattern.permute.xlu1 %v2506_v25 }
  0xfb   :  { %1489 = vset.pattern.permute.xlu2 %v2507_v24  ;;  %1082 = vperm.xlu0 %1494, %v379_v59  }
  0xfc   :  { %838 = vperm.xlu1 %1488, %v376_v53   ;;  %1078 = vperm.xlu2 %1489, %v376_v53   ;;  %v168_v53 = vadd.f32 %v1839_v23, %v1785_v2 }
  0xfe   :  { %v1899_v62 = vmax.f32 %v168_v53, 0.0 }
 0x101   :  { %v1787_v3 = vpop.permute.xlu1 %626  ;;  %v1789_v4 = vpop.permute.xlu0 %578 }
 0x102   :  { %v1793_v6 = vpop.permute.xlu2 %586 }
 0x103   :  { %1495 = vset.pattern.permute.xlu0 %v2509_v26 }
 0x104   :  { %886 = vperm.xlu1 %1488, %v1756_v56   ;;  %1490 = vset.pattern.permute.xlu2 %v2509_v26 }
 0x105   :  { %525 = vperm.xlu0 %1495, %v1791_v5   ;;  %520 = vperm.xlu2 %1490, %v1756_v56  }
 0x109   :  { %v1800_v8 = vpop.permute.xlu1 %582 }
 0x10a   :  { %v1802_v9 = vpop.permute.xlu0 %495  ;;  %v1804_v10 = vpop.permute.xlu2 %505 }
 0x10c   :  { %1492 = vset.pattern.permute.xlu1 %v1520_v36 }
 0x10d   :  { %1498 = vset.pattern.permute.xlu0 %v2506_v25  ;;  %1493 = vset.pattern.permute.xlu2 %v2506_v25 }
 0x10e   :  { %602 = vperm.xlu1 %1492, %v379_v59   ;;  %846 = vperm.xlu0 %1498, %v382_v11  }
 0x10f   :  { %842 = vperm.xlu2 %1493, %v379_v59   ;;  %v1892_v59 = vpop.f32.mrf.mxu0 }
 0x112   :  { %v1811_v13 = vpop.permute.xlu1 %500  ;;  %v1813_v14 = vpop.permute.xlu0 %440 }
 0x113   :  { %v1820_v17 = vpop.permute.xlu2 %1070 }
 0x114   :  { %2523 = vst [vmem:[#allocation7_spill] sm:$0xff] %v1820_v17 }
 0x116   :  { %650 = vperm.xlu1 %1492, %v1791_v5   ;;  %894 = vperm.xlu0 %1498, %v1818_v16  }
 0x117   :  { %890 = vperm.xlu2 %1493, %v1791_v5   ;;  %v1915_v33 = vpop.f32.mrf.mxu0 }
 0x11a   :  { %v1826_v18 = vpop.permute.xlu1 %445 }
 0x11b   :  { %v1828_v19 = vpop.permute.xlu0 %1062 }
 0x11c   :  { %2524 = vst [vmem:[#allocation8_spill] sm:$0xff] %v1828_v19 }
 0x11d   :  { %v1834_v22 = vpop.permute.xlu2 %878 }
 0x11e   :  { %1496 = vset.pattern.permute.xlu1 %v2509_v26  ;;  %1502 = vset.pattern.permute.xlu0 %v1520_v36 }
 0x11f   :  { %1497 = vset.pattern.permute.xlu2 %v1520_v36  ;;  %470 = vperm.xlu1 %1496, %v382_v11  }
 0x120   :  { %610 = vperm.xlu0 %1502, %v1832_v21   ;;  %606 = vperm.xlu2 %1497, %v382_v11  }
 0x123   :  { %v1846_v28 = vpop.permute.xlu1 %1066 }
 0x124   :  { %2525 = vst [vmem:[#allocation9_spill] sm:$0xff] %v1846_v28  ;;  %v1850_v30 = vpop.permute.xlu0 %870 }
 0x127   :  { %1499 = vset.pattern.permute.xlu1 %v2507_v24  ;;  %v456_v34 = vpop.permute.xlu2 %455  ;;  %v1931_v24 = vpop.f32.mrf.mxu0 }
 0x128   :  { %658 = vperm.xlu0 %1502, %v1852_v31   ;;  %654 = vperm.xlu2 %1497, %v1818_v16   ;;  %v1861_v37 = vmul.f32 %v456_v34, %v1848_v29  ;;  %v1917_v34 = vpop.f32.mrf.mxu2 }
 0x129   :  { %1086 = vperm.xlu1 %1499, %v382_v11   ;;  %v1903_v11 = vpop.f32.mrf.mxu1  ;;  %2529 = vst [vmem:[#allocation13_spill] sm:$0xff] %v1917_v34 }
 0x12c   :  { %v827_v39 = vpop.permute.xlu0 %826  ;;  %v1865_v41 = vpop.permute.xlu1 %874 }
 0x12d   :  { %v1868_v42 = vmul.f32 %v827_v39, %v1863_v38  ;;  %v173_v39 = vadd.f32 %v1839_v23, %v1809_v12 }
 0x130   :  { %1504 = vset.pattern.permute.xlu0 %v2509_v26  ;;  %1501 = vset.pattern.permute.xlu2 %v2509_v26 }
 0x131   :  { %1500 = vset.pattern.permute.xlu1 %v2509_v26  ;;  %480 = vperm.xlu0 %1504, %v1870_v43   ;;  %v595_v46 = vpop.permute.xlu2 %594  ;;  %v1936_v12 = vpop.f32.mrf.mxu1 }
 0x132   :  { %530 = vperm.xlu1 %1500, %v1818_v16   ;;  %475 = vperm.xlu2 %1501, %v1832_v21   ;;  %v1881_v47 = vmul.f32 %v595_v46, %v1848_v29  ;;  %v1950_v16 = vpop.f32.mrf.mxu2 }
 0x133   :  { %2532 = vst [vmem:[#allocation16_spill] sm:$0xff] %v1950_v16 }
 0x135   :  { %v1885_v50 = vpop.permute.xlu0 %634 }
 0x136   :  { %v1887_v51 = vpop.permute.xlu1 %450 }
 0x137   :  { %2527 = vst [vmem:[#allocation11_spill] sm:$0xff] %v1887_v51  ;;  %v2533_v51 = vmov 0  }
 0x139   :  { %540 = vperm.xlu0 %1504, %v1883_v48  }
 0x13a   :  { %1503 = vset.pattern.permute.xlu1 %v2506_v25  ;;  %535 = vperm.xlu2 %1501, %v1852_v31   ;;  %v1897_v60 = vpop.permute.xlu2 %834 }
 0x13b   :  { %850 = vperm.xlu1 %1503, %v1832_v21  }
 0x13e   :  { %v1901_v7 = vpop.permute.xlu0 %510 }
 0x13f   :  { %2528 = vst [vmem:[#allocation12_spill] sm:$0xff] %v1901_v7  ;;  %v591_v15 = vpop.permute.xlu1 %590  ;;  %v190_v7 = vpop.f32.mrf.mxu0 }
 0x140   :  { %v1906_v27 = vmul.f32 %v591_v15, %v1899_v62  ;;  %v1928_v15 = vmax.f32 %v173_v39, 0.0 }
 0x141   :  { %1509 = vset.pattern.permute.xlu0 %v2506_v25 }
 0x142   :  { %1506 = vset.pattern.permute.xlu2 %v2506_v25  ;;  %858 = vperm.xlu0 %1509, %v1903_v11  }
 0x143   :  { %898 = vperm.xlu1 %1503, %v1852_v31   ;;  %854 = vperm.xlu2 %1506, %v1870_v43   ;;  %v1913_v2 = vpop.permute.xlu2 %642  ;;  %v163_v31 = vadd.f32 %v1839_v23, %v1763_v58 }
 0x147   :  { %v192_v56 = vpop.f32.mrf.mxu0 }
 0x148   :  { %v1921_v46 = vpop.permute.xlu1 %830  ;;  %v1923_v53 = vpop.permute.xlu0 %882 }
 0x14a   :  { %906 = vperm.xlu0 %1509, %v1917_v34  }
 0x14b   :  { %1505 = vset.pattern.permute.xlu1 %v1520_v36  ;;  %902 = vperm.xlu2 %1506, %v1883_v48  }
 0x14c   :  { %614 = vperm.xlu1 %1505, %v1870_v43  }
 0x14d   :  { %v461_v25 = vpop.permute.xlu2 %460 }
 0x14e   :  { %v1934_v26 = vmul.f32 %v461_v25, %v1928_v15 }
 0x150   :  { %2530 = vst [vmem:[#allocation14_spill] sm:$0xff] %v1934_v26  ;;  %v193_v26 = vadd.f32 %v1839_v23, %v192_v56 }
 0x151   :  { %v1938_v19 = vpop.permute.xlu1 %638 }
 0x152   :  { %1511 = vset.pattern.permute.xlu0 %v1520_v36  ;;  %v1941_v28 = vpop.permute.xlu0 %598 }
 0x153   :  { %1508 = vset.pattern.permute.xlu2 %v1520_v36  ;;  %622 = vperm.xlu0 %1511, %v1936_v12  }
 0x154   :  { %662 = vperm.xlu1 %1505, %v1883_v48   ;;  %618 = vperm.xlu2 %1508, %v1903_v11  }
 0x156   :  { %v1079_v39 = vpop.permute.xlu2 %1078 }
 0x157   :  { %v1948_v25 = vmul.f32 %v1079_v39, %v1928_v15  ;;  %v1962_v39 = vmax.f32 %v163_v31, 0.0 }
 0x159   :  { %2531 = vst [vmem:[#allocation15_spill] sm:$0xff] %v1948_v25  ;;  %v176_v25 = vadd.f32 %v1839_v23, %v1830_v20  ;;  %v914_v55 = vmul.f32 %v1770_v61, %v1962_v39  ;;  %v1984_v20 = vmax.f32 %v193_v26, 0.0 }
 0x15a   :  { %v1954_v17 = vpop.permute.xlu0 %646 }
 0x15b   :  { %670 = vperm.xlu0 %1511, %v1950_v16   ;;  %v1075_v36 = vpop.permute.xlu1 %1074  ;;  %v1971_v40 = vmax.f32 %v176_v25, 0.0  ;;  %v926_v56 = vmul.f32 %v1850_v30, %v1984_v20  ;;  %v161_v25 = vadd.f32 %v1839_v23, %v1750_v54  ;;  %v191_v54 = vadd.f32 %v1839_v23, %v190_v7 }
 0x15c   :  { %1507 = vset.pattern.permute.xlu1 %v2533_v51  ;;  %666 = vperm.xlu2 %1508, %v1917_v34   ;;  %v1960_v52 = vmul.f32 %v1075_v36, %v1848_v29 }
 0x15d   :  { %485 = vperm.xlu1 %1507, %v1903_v11   ;;  %v2020_v7 = vmax.f32 %v191_v54, 0.0 }
 0x15e   :  { %2534 = vst [vmem:[#allocation17_spill] sm:$0xff] %v1960_v52  ;;  %v2537_v52 = vmov 3  }
 0x15f   :  { %v1967_v58 = vpop.permute.xlu2 %520 }
 0x160   :  { %2535 = vst [vmem:[#allocation18_spill] sm:$0xff] %v1967_v58 }
 0x163   :  { %963 = vrot.lane.b32.xlu0 %v914_v55, %s1521_s4 }
 0x164   :  { %1510 = vset.pattern.permute.xlu2 %v2533_v51  ;;  %v466_v31 = vpop.permute.xlu0 %465  ;;  %v1976_v36 = vpop.permute.xlu1 %515  ;;  %1514 = vset.pattern.permute.xlu0 %v2537_v52 }
 0x165   :  { %2536 = vst [vmem:[#allocation19_spill] sm:$0xff] %v1976_v36  ;;  %545 = vperm.xlu1 %1507, %v1917_v34   ;;  %490 = vperm.xlu2 %1510, %v1936_v12   ;;  %v1982_v61 = vmul.f32 %v466_v31, %v1971_v40  ;;  %v2539_v34 = vmov 2  }
 0x167   :  { %2538 = vst [vmem:[#allocation20_spill] sm:$0xff] %v1982_v61  ;;  %v195_v61 = vpop.f32.mrf.mxu3 }
 0x168   :  { %v196_v36 = vadd.f32 %v1839_v23, %v195_v61 }
 0x169   :  { %v843_v55 = vpop.permute.xlu2 %842 }
 0x16a   :  { %v1989_v51 = vmul.f32 %v843_v55, %v1971_v40  ;;  %v2002_v55 = vmax.f32 %v161_v25, 0.0  ;;  %v2022_v25 = vmax.f32 %v196_v36, 0.0 }
 0x16b   :  { %987 = vrot.lane.b32.xlu0 %v926_v56, %s1521_s4  ;;  %v675_v56 = vmul.f32 %v1793_v6, %v1863_v38 }
 0x16c   :  { %v673_v54 = vmul.f32 %v1789_v4, %v2002_v55 }
 0x16d   :  { %1512 = vset.pattern.permute.xlu1 %v2539_v34  ;;  %550 = vperm.xlu2 %1510, %v1950_v16   ;;  %v1083_v31 = vpop.permute.xlu0 %1082  ;;  %v913_v34 = vmul.f32 %v1776_v63, %v2002_v55 }
 0x16e   :  { %862 = vperm.xlu1 %1512, %v1936_v12   ;;  %v1998_v26 = vmul.f32 %v1083_v31, %v1971_v40  ;;  %v2000_v30 = vpop.permute.xlu1 %838  ;;  %v178_v31 = vadd.f32 %v1839_v23, %v1854_v32 }
 0x16f   :  { %v197_v63 = vpop.f32.mrf.mxu3 }
 0x170   :  { %2540 = vst [vmem:[#allocation21_spill] sm:$0xff] %v1998_v26  ;;  %v227_v26 = vmax.f32 %v178_v31, 0.0 }
 0x171   :  { %v2006_v58 = vpop.permute.xlu2 %890 }
 0x173   :  { %725 = vrot.lane.b32.xlu0 %v675_v56, %s1522_s17  ;;  %v687_v56 = vmul.f32 %v1885_v50, %v2022_v25 }
 0x175   :  { %961 = vrot.lane.b32.xlu2 %v913_v34, %s1521_s4  ;;  %v925_v34 = vmul.f32 %v1761_v57, %v2020_v7  ;;  %v917_v57 = vmul.f32 %v1897_v60, %v1848_v29 }
 0x176   :  { %910 = vperm.xlu1 %1512, %v1950_v16   ;;  %v2017_v6 = vpop.permute.xlu1 %886  ;;  %1513 = vset.pattern.permute.xlu2 %v2537_v52 }
 0x177   :  { %v2024_v61 = vpop.permute.xlu0 %525  ;;  %v200_v36 = vpop.f32.mrf.mxu3 }
 0x178   :  { %2541 = vst [vmem:[#allocation22_spill] sm:$0xff] %v2024_v61  ;;  %v201_v4 = vadd.f32 %v1839_v23, %v200_v36 }
 0x17a   :  { %v607_v32 = vpop.permute.xlu2 %606 }
 0x17b   :  { %v2030_v16 = vmul.f32 %v607_v32, %v227_v26  ;;  %749 = vrot.lane.b32.xlu0 %v687_v56, %s1522_s17  ;;  %v674_v56 = vmul.f32 %v1800_v8, %v1962_v39  ;;  %v686_v8 = vmul.f32 %v1780_v1, %v1984_v20  ;;  %v916_v1 = vmul.f32 %v1921_v46, %v1899_v62 }
 0x17d   :  { %985 = vrot.lane.b32.xlu2 %v925_v34, %s1521_s4  ;;  %v685_v34 = vmul.f32 %v1787_v3, %v2020_v7 }
 0x17e   :  { %721 = vrot.lane.b32.xlu1 %v673_v54, %s1522_s17 }
 0x17f   :  { %1515 = vset.pattern.permute.xlu1 %v2537_v52  ;;  %v2052_v52 = vmax.f32 %v201_v4, 0.0  ;;  %v202_v3 = vpop.f32.mrf.mxu3 }
 0x180   :  { %v2038_v31 = vpop.permute.xlu1 %602  ;;  %v847_v50 = vpop.permute.xlu0 %846 }
 0x181   :  { %v929_v60 = vmul.f32 %v1923_v53, %v2052_v52 }
 0x182   :  { %v2042_v32 = vpop.permute.xlu2 %654 }
 0x183   :  { %969 = vrot.lane.b32.xlu0 %v917_v57, %s1521_s4  ;;  %v678_v57 = vmul.f32 %v1941_v28, %v1928_v15 }
 0x185   :  { %723 = vrot.lane.b32.xlu2 %v674_v56, %s1522_s17 }
 0x186   :  { %745 = vrot.lane.b32.xlu1 %v685_v34, %s1522_s17  ;;  %v198_v34 = vadd.f32 %v1839_v23, %v197_v63 }
 0x187   :  { %v205_v63 = vpop.f32.mrf.mxu3 }
 0x188   :  { %v2054_v54 = vpop.permute.xlu1 %650  ;;  %v895_v29 = vpop.permute.xlu0 %894  ;;  %v2081_v28 = vmax.f32 %v198_v34, 0.0 }
 0x18b   :  { %993 = vrot.lane.b32.xlu0 %v929_v60, %s1521_s4  ;;  %v203_v60 = vadd.f32 %v1839_v23, %v202_v3 }
 0x18c   :  { %v2061_v36 = vpop.permute.xlu2 %475 }
 0x18d   :  { %747 = vrot.lane.b32.xlu2 %v686_v8, %s1522_s17 }
 0x18e   :  { %965 = vrot.lane.b32.xlu1 %v1868_v42, %s1521_s4  ;;  %v927_v42 = vmul.f32 %v1865_v41, %v2022_v25  ;;  %v928_v41 = vmul.f32 %v1834_v22, %v2081_v28  ;;  %v688_v22 = vmul.f32 %v1938_v19, %v2081_v28  ;;  %v689_v19 = vmul.f32 %v1913_v2, %v2052_v52 }
 0x18f   :  { %v207_v34 = vpop.f32.mrf.mxu3 }
 0x191   :  { %v471_v56 = vpop.permute.xlu1 %470 }
 0x192   :  { %v2068_v4 = vmul.f32 %v471_v56, %v227_v26  ;;  %v611_v53 = vpop.permute.xlu0 %610  ;;  %v2083_v56 = vmax.f32 %v203_v60, 0.0  ;;  %v920_v60 = vmul.f32 %v847_v50, %v227_v26  ;;  %v181_v50 = vadd.f32 %v1839_v23, %v1872_v44 }
 0x193   :  { %731 = vrot.lane.b32.xlu0 %v678_v57, %s1522_s17 }
 0x194   :  { %v2077_v8 = vpop.permute.xlu2 %535  ;;  %v690_v46 = vmul.f32 %v1954_v17, %v2083_v56  ;;  %v208_v17 = vadd.f32 %v1839_v23, %v207_v34  ;;  %v930_v2 = vmul.f32 %v2017_v6, %v2083_v56 }
 0x195   :  { %967 = vrot.lane.b32.xlu2 %v916_v1, %s1521_s4 }
 0x196   :  { %989 = vrot.lane.b32.xlu1 %v927_v42, %s1521_s4 }
 0x19a   :  { %v659_v3 = vpop.permute.xlu0 %658 }
 0x19b   :  { %v1087_v61 = vpop.permute.xlu1 %1086  ;;  %755 = vrot.lane.b32.xlu0 %v690_v46, %s1522_s17 }
 0x19c   :  { %v2090_v57 = vmul.f32 %v1087_v61, %v227_v26 }
 0x19d   :  { %v2092_v1 = vpop.permute.xlu2 %854  ;;  %991 = vrot.lane.b32.xlu2 %v928_v41, %s1521_s4 }
 0x19e   :  { %727 = vrot.lane.b32.xlu1 %v1906_v27, %s1522_s17  ;;  %v2110_v27 = vmax.f32 %v208_v17, 0.0 }
 0x1a0   :  { %v932_v26 = vmul.f32 %v895_v29, %v2110_v27  ;;  %v2126_v29 = vmax.f32 %v181_v50, 0.0 }
 0x1a2   :  { %v681_v44 = vmul.f32 %v611_v53, %v2126_v29 }
 0x1a3   :  { %v2098_v42 = vpop.permute.xlu0 %480  ;;  %975 = vrot.lane.b32.xlu0 %v920_v60, %s1521_s4  ;;  %v210_v60 = vpop.f32.mrf.mxu3 }
 0x1a4   :  { %v2103_v61 = vpop.permute.xlu1 %530 }
 0x1a5   :  { %729 = vrot.lane.b32.xlu2 %v1881_v47, %s1522_s17  ;;  %v2107_v46 = vpop.permute.xlu2 %902  ;;  %v918_v47 = vmul.f32 %v2000_v30, %v1928_v15 }
 0x1a6   :  { %751 = vrot.lane.b32.xlu1 %v688_v22, %s1522_s17  ;;  %v206_v22 = vadd.f32 %v1839_v23, %v205_v63 }
 0x1a8   :  { %v2139_v53 = vmax.f32 %v206_v22, 0.0 }
 0x1aa   :  { %v931_v6 = vmul.f32 %v2006_v58, %v2139_v53 }
 0x1ab   :  { %999 = vrot.lane.b32.xlu0 %v932_v26, %s1521_s4  ;;  %v2116_v41 = vpop.permute.xlu0 %540  ;;  %v211_v26 = vadd.f32 %v1839_v23, %v210_v60  ;;  %v186_v60 = vadd.f32 %v1839_v23, %v1915_v33 }
 0x1ac   :  { %2542 = vst [vmem:[#allocation23_spill] sm:$0xff] %v2116_v41 }
 0x1ad   :  { %v851_v34 = vpop.permute.xlu1 %850  ;;  %753 = vrot.lane.b32.xlu2 %v689_v19, %s1522_s17  ;;  %v212_v19 = vpop.f32.mrf.mxu3  ;;  %v2141_v63 = vmax.f32 %v211_v26, 0.0  ;;  %v2153_v26 = vmax.f32 %v186_v60, 0.0 }
 0x1ae   :  { %v2123_v17 = vpop.permute.xlu2 %618  ;;  %971 = vrot.lane.b32.xlu1 %v918_v47, %s1521_s4  ;;  %v213_v41 = vadd.f32 %v1839_v23, %v212_v19 }
 0x1af   :  { %v693_v47 = vmul.f32 %v659_v3, %v2141_v63 }
 0x1b3   :  { %737 = vrot.lane.b32.xlu0 %v681_v44, %s1522_s17 }
 0x1b4   :  { %v859_v15 = vpop.permute.xlu0 %858 }
 0x1b5   :  { %v899_v30 = vpop.permute.xlu1 %898  ;;  %973 = vrot.lane.b32.xlu2 %v1989_v51, %s1521_s4  ;;  %v679_v51 = vmul.f32 %v2038_v31, %v1971_v40  ;;  %v215_v22 = vpop.f32.mrf.mxu3  ;;  %v923_v33 = vmul.f32 %v859_v15, %v2153_v26  ;;  %v691_v40 = vmul.f32 %v2054_v54, %v2139_v53  ;;  %v188_v15 = vadd.f32 %v1839_v23, %v1931_v24 }
 0x1b6   :  { %995 = vrot.lane.b32.xlu1 %v930_v2, %s1521_s4  ;;  %v2137_v50 = vpop.permute.xlu2 %666  ;;  %v216_v58 = vadd.f32 %v1839_v23, %v215_v22  ;;  %v692_v54 = vmul.f32 %v2042_v32, %v2110_v27  ;;  %v921_v22 = vmul.f32 %v851_v34, %v2126_v29 }
 0x1b8   :  { %v2162_v31 = vmax.f32 %v216_v58, 0.0 }
 0x1bb   :  { %761 = vrot.lane.b32.xlu0 %v693_v47, %s1522_s17 }
 0x1bc   :  { %v907_v44 = vpop.permute.xlu0 %906 }
 0x1bd   :  { %997 = vrot.lane.b32.xlu2 %v931_v6, %s1521_s4  ;;  %v935_v60 = vmul.f32 %v907_v44, %v2162_v31  ;;  %v217_v58 = vpop.f32.mrf.mxu3  ;;  %v2180_v44 = vmax.f32 %v188_v15, 0.0 }
 0x1be   :  { %v615_v2 = vpop.permute.xlu1 %614  ;;  %733 = vrot.lane.b32.xlu1 %v679_v51, %s1522_s17  ;;  %v218_v34 = vadd.f32 %v1839_v23, %v217_v58 }
 0x1bf   :  { %v2155_v3 = vpop.permute.xlu2 %490 }
 0x1c0   :  { %v2193_v15 = vmax.f32 %v218_v34, 0.0 }
 0x1c3   :  { %981 = vrot.lane.b32.xlu0 %v923_v33, %s1521_s4 }
 0x1c5   :  { %v623_v47 = vpop.permute.xlu0 %622  ;;  %735 = vrot.lane.b32.xlu2 %v2030_v16, %s1522_s17  ;;  %v183_v16 = vadd.f32 %v1839_v23, %v1892_v59 }
 0x1c6   :  { %v663_v6 = vpop.permute.xlu1 %662  ;;  %757 = vrot.lane.b32.xlu1 %v691_v40, %s1522_s17  ;;  %v684_v32 = vmul.f32 %v623_v47, %v2180_v44 }
 0x1c7   :  { %v2168_v51 = vpop.permute.xlu2 %550 }
 0x1cb   :  { %1005 = vrot.lane.b32.xlu0 %v935_v60, %s1521_s4  ;;  %v2184_v60 = vmax.f32 %v183_v16, 0.0  ;;  %v2197_v16 = vmax.f32 %v213_v41, 0.0 }
 0x1cd   :  { %v671_v33 = vpop.permute.xlu0 %670  ;;  %759 = vrot.lane.b32.xlu2 %v692_v54, %s1522_s17  ;;  %v922_v59 = vmul.f32 %v2092_v1, %v2184_v60  ;;  %v933_v54 = vmul.f32 %v899_v30, %v2141_v63  ;;  %v934_v23 = vmul.f32 %v2107_v46, %v2197_v16  ;;  %v682_v30 = vmul.f32 %v615_v2, %v2184_v60 }
 0x1ce   :  { %977 = vrot.lane.b32.xlu1 %v921_v22, %s1521_s4  ;;  %v696_v47 = vmul.f32 %v671_v33, %v2193_v15  ;;  %v555_v46 = vmul.f32 %v1826_v18, %v1863_v38  ;;  %v694_v2 = vmul.f32 %v663_v6, %v2197_v16  ;;  %v695_v18 = vmul.f32 %v2137_v50, %v2162_v31 }
 0x1cf   :  { %v2182_v40 = vpop.permute.xlu1 %485  ;;  %v962_v24 = vpop.permute.xlu2 %961 }
 0x1d3   :  { %743 = vrot.lane.b32.xlu0 %v684_v32, %s1522_s17  ;;  %v554_v32 = vmul.f32 %v1813_v14, %v1962_v39  ;;  %v566_v14 = vmul.f32 %v1811_v13, %v1984_v20  ;;  %v553_v13 = vmul.f32 %v1778_v0, %v2002_v55 }
 0x1d5   :  { %v964_v22 = vpop.permute.xlu0 %963  ;;  %979 = vrot.lane.b32.xlu2 %v922_v59, %s1521_s4 }
 0x1d6   :  { %1001 = vrot.lane.b32.xlu1 %v933_v54, %s1521_s4  ;;  %v683_v54 = vmul.f32 %v2123_v17, %v2153_v26 }
 0x1d7   :  { %v2200_v58 = vpop.permute.xlu1 %545  ;;  %v986_v1 = vpop.permute.xlu2 %985 }
 0x1db   :  { %767 = vrot.lane.b32.xlu0 %v696_v47, %s1522_s17 }
 0x1dd   :  { %v988_v19 = vpop.permute.xlu0 %987  ;;  %1003 = vrot.lane.b32.xlu2 %v934_v23, %s1521_s4 }
 0x1de   :  { %739 = vrot.lane.b32.xlu1 %v682_v30, %s1522_s17 }
 0x1df   :  { %v724_v41 = vpop.permute.xlu2 %723 }
 0x1e0   :  { %v794_v33 = vadd.f32 %v724_v41, %v554_v32  ;;  %v863_v34 = vpop.permute.xlu1 %862 }
 0x1e2   :  { %v2210_v59 = vadd.f32 %v964_v22, %v794_v33 }
 0x1e3   :  { %1094 = vperm.xlu0 %1514, %v1870_v43   ;;  %v924_v43 = vmul.f32 %v863_v34, %v2180_v44  ;;  %v565_v34 = vmul.f32 %v1802_v9, %v2020_v7 }
 0x1e5   :  { %v726_v47 = vpop.permute.xlu0 %725  ;;  %741 = vrot.lane.b32.xlu2 %v683_v54, %s1522_s17 }
 0x1e6   :  { %v795_v23 = vadd.f32 %v726_v47, %v555_v46  ;;  %763 = vrot.lane.b32.xlu1 %v694_v2, %s1522_s17 }
 0x1e7   :  { %v748_v22 = vpop.permute.xlu2 %747 }
 0x1e8   :  { %v806_v30 = vadd.f32 %v748_v22, %v566_v14  ;;  %v911_v32 = vpop.permute.xlu1 %910 }
 0x1ea   :  { %v2222_v17 = vadd.f32 %v988_v19, %v806_v30 }
 0x1eb   :  { %1106 = vperm.xlu0 %1514, %v1673_v35   ;;  %v936_v35 = vmul.f32 %v911_v32, %v2193_v15 }
 0x1ed   :  { %v750_v6 = vpop.permute.xlu0 %749  ;;  %765 = vrot.lane.b32.xlu2 %v695_v18, %s1522_s17  ;;  %v2545_v18 = vld [vmem:[#allocation2_spill] sm:$0xff] }
 0x1ee   :  { %983 = vrot.lane.b32.xlu1 %v924_v43, %s1521_s4 }
 0x1ef   :  { %v968_v41 = vpop.permute.xlu2 %967 }
 0x1f0   :  { %v722_v33 = vpop.permute.xlu1 %721 }
 0x1f1   :  { %v793_v54 = vadd.f32 %v722_v33, %v553_v13  ;;  %v2546_v33 = vld [vmem:[#allocation4_spill] sm:$0xff] }
 0x1f3   :  { %1118 = vperm.xlu0 %1514, %v1727_v49   ;;  %v2233_v19 = vadd.f32 %v962_v24, %v793_v54 }
 0x1f5   :  { %v970_v50 = vpop.permute.xlu0 %969  ;;  %1090 = vperm.xlu2 %1513, %v1832_v21  }
 0x1f6   :  { %1007 = vrot.lane.b32.xlu1 %v936_v35, %s1521_s4 }
 0x1f7   :  { %v992_v46 = vpop.permute.xlu2 %991 }
 0x1f8   :  { %v746_v2 = vpop.permute.xlu1 %745 }
 0x1f9   :  { %v805_v0 = vadd.f32 %v746_v2, %v565_v34  ;;  %v2548_v34 = vld [vmem:[#allocation5_spill] sm:$0xff]  ;;  %v2549_v2 = vld [vmem:[#allocation3_spill] sm:$0xff] }
 0x1fb   :  { %1130 = vperm.xlu0 %1514, %v1791_v5   ;;  %v2241_v47 = vadd.f32 %v986_v1, %v805_v0  ;;  %v567_v5 = vmul.f32 %v1804_v10, %v2022_v25  ;;  %v2550_v0 = vld [vmem:[#allocation11_spill] sm:$0xff] }
 0x1fd   :  { %v994_v49 = vpop.permute.xlu0 %993  ;;  %1102 = vperm.xlu2 %1513, %v1936_v12   ;;  %v2543_v12 = vld [vmem:[#allocation19_spill] sm:$0xff] }
 0x1fe   :  { %1098 = vperm.xlu1 %1515, %v1903_v11   ;;  %v569_v1 = vmul.f32 %v2543_v12, %v2052_v52  ;;  %v2544_v11 = vld [vmem:[#allocation14_spill] sm:$0xff] }
 0x1ff   :  { %v730_v24 = vpop.permute.xlu2 %729 }
 0x200   :  { %v797_v21 = vadd.f32 %v730_v24, %v1861_v37  ;;  %v966_v14 = vpop.permute.xlu1 %965  ;;  %v807_v37 = vadd.f32 %v750_v6, %v567_v5  ;;  %v556_v24 = vmul.f32 %v2550_v0, %v1899_v62 }
 0x201   :  { %v2246_v22 = vadd.f32 %v966_v14, %v795_v23 }
 0x202   :  { %v2248_v30 = vadd.f32 %v970_v50, %v797_v21 }
 0x203   :  { %1142 = vperm.xlu0 %1514, %v1883_v48   ;;  %v1153_v48 = vmul.f32 %v2546_v33, %v2002_v55  ;;  %v2555_v33 = vld [vmem:[#allocation21_spill] sm:$0xff] }
 0x205   :  { %v732_v9 = vpop.permute.xlu0 %731  ;;  %1114 = vperm.xlu2 %1513, %v1709_v45   ;;  %v2547_v45 = vld [vmem:[#allocation18_spill] sm:$0xff] }
 0x206   :  { %v798_v32 = vadd.f32 %v732_v9, %v2544_v11  ;;  %1110 = vperm.xlu1 %1515, %v2545_v18   ;;  %v570_v35 = vmul.f32 %v2547_v45, %v2083_v56  ;;  %v2553_v11 = vld [vmem:[#allocation6_spill] sm:$0xff]  ;;  %v2554_v18 = vld [vmem:[#allocation12_spill] sm:$0xff] }
 0x207   :  { %v754_v23 = vpop.permute.xlu2 %753  ;;  %v2556_v45 = vld [vmem:[#allocation16_spill] sm:$0xff] }
 0x208   :  { %v809_v43 = vadd.f32 %v754_v23, %v569_v1  ;;  %v990_v13 = vpop.permute.xlu1 %989  ;;  %v2552_v1 = vld [vmem:[#allocation10_spill] sm:$0xff] }
 0x209   :  { %v2260_v54 = vadd.f32 %v990_v13, %v807_v37  ;;  %v568_v37 = vmul.f32 %v2554_v18, %v2081_v28 }
 0x20a   :  { %v2262_v10 = vadd.f32 %v994_v49, %v809_v43  ;;  %v2551_v49 = vld [vmem:[#allocation7_spill] sm:$0xff] }
 0x20b   :  { %1201 = vrot.lane.b32.xlu0 %v1153_v48, %s1523_s18  ;;  %v1156_v14 = vmul.f32 %v2551_v49, %v1899_v62  ;;  %v2559_v49 = vld [vmem:[#allocation8_spill] sm:$0xff] }
 0x20d   :  { %v756_v50 = vpop.permute.xlu0 %755  ;;  %1126 = vperm.xlu2 %1513, %v2548_v34  }
 0x20e   :  { %v810_v6 = vadd.f32 %v756_v50, %v570_v35  ;;  %1122 = vperm.xlu1 %1515, %v2549_v2  }
 0x20f   :  { %v974_v55 = vpop.permute.xlu2 %973 }
 0x210   :  { %v728_v21 = vpop.permute.xlu1 %727 }
 0x211   :  { %v796_v5 = vadd.f32 %v728_v21, %v556_v24  ;;  %v2558_v24 = vld [vmem:[#allocation9_spill] sm:$0xff] }
 0x212   :  { %v1155_v21 = vmul.f32 %v2558_v24, %v1863_v38 }
 0x213   :  { %1207 = vrot.lane.b32.xlu0 %v1156_v14, %s1523_s18  ;;  %v2274_v9 = vadd.f32 %v968_v41, %v796_v5  ;;  %v2557_v41 = vld [vmem:[#allocation13_spill] sm:$0xff]  ;;  %v561_v14 = vmul.f32 %v2061_v36, %v2126_v29 }
 0x215   :  { %v976_v12 = vpop.permute.xlu0 %975  ;;  %1138 = vperm.xlu2 %1513, %v2552_v1  }
 0x216   :  { %1134 = vperm.xlu1 %1515, %v2553_v11  }
 0x217   :  { %v998_v23 = vpop.permute.xlu2 %997 }
 0x218   :  { %v752_v43 = vpop.permute.xlu1 %751 }
 0x219   :  { %v808_v13 = vadd.f32 %v752_v43, %v568_v37  ;;  %v2560_v37 = vld [vmem:[#allocation15_spill] sm:$0xff] }
 0x21b   :  { %1213 = vrot.lane.b32.xlu0 %v2555_v33, %s1523_s18  ;;  %v2282_v62 = vadd.f32 %v992_v46, %v808_v13  ;;  %v1154_v46 = vmul.f32 %v2559_v49, %v1962_v39  ;;  %v573_v39 = vmul.f32 %v2077_v8, %v2141_v63  ;;  %v2563_v8 = vld [vmem:[#allocation22_spill] sm:$0xff] }
 0x21d   :  { %v1000_v48 = vpop.permute.xlu0 %999  ;;  %1150 = vperm.xlu2 %1513, %v2556_v45   ;;  %v2562_v45 = vld [vmem:[#allocation20_spill] sm:$0xff] }
 0x21e   :  { %1146 = vperm.xlu1 %1515, %v2557_v41  }
 0x21f   :  { %v736_v35 = vpop.permute.xlu2 %735 }
 0x220   :  { %v800_v50 = vadd.f32 %v736_v35, %v2068_v4  ;;  %v972_v34 = vpop.permute.xlu1 %971  ;;  %v572_v4 = vmul.f32 %v2103_v61, %v2110_v27  ;;  %v2561_v61 = vld [vmem:[#allocation17_spill] sm:$0xff] }
 0x221   :  { %v2287_v2 = vadd.f32 %v972_v34, %v798_v32 }
 0x222   :  { %v2289_v0 = vadd.f32 %v976_v12, %v800_v50 }
 0x225   :  { %v738_v5 = vpop.permute.xlu0 %737  ;;  %1205 = vrot.lane.b32.xlu2 %v1155_v21, %s1523_s18 }
 0x226   :  { %v801_v1 = vadd.f32 %v738_v5, %v561_v14  ;;  %1203 = vrot.lane.b32.xlu1 %v1154_v46, %s1523_s18  ;;  %v563_v46 = vmul.f32 %v2182_v40, %v2153_v26 }
 0x227   :  { %v760_v32 = vpop.permute.xlu2 %759 }
 0x228   :  { %v812_v12 = vadd.f32 %v760_v32, %v572_v4  ;;  %v996_v11 = vpop.permute.xlu1 %995 }
 0x229   :  { %v2301_v18 = vadd.f32 %v996_v11, %v810_v6  ;;  %v575_v11 = vmul.f32 %v2200_v58, %v2162_v31 }
 0x22a   :  { %v2303_v38 = vadd.f32 %v1000_v48, %v812_v12  ;;  %v571_v48 = vmul.f32 %v2563_v8, %v2139_v53 }
 0x22d   :  { %v762_v36 = vpop.permute.xlu0 %761  ;;  %1211 = vrot.lane.b32.xlu2 %v2560_v37, %s1523_s18 }
 0x22e   :  { %v813_v43 = vadd.f32 %v762_v36, %v573_v39  ;;  %1209 = vrot.lane.b32.xlu1 %v2561_v61, %s1523_s18 }
 0x22f   :  { %v980_v13 = vpop.permute.xlu2 %979 }
 0x230   :  { %v734_v33 = vpop.permute.xlu1 %733 }
 0x231   :  { %v799_v41 = vadd.f32 %v734_v33, %v2562_v45 }
 0x233   :  { %v2312_v35 = vadd.f32 %v974_v55, %v799_v41 }
 0x235   :  { %v982_v6 = vpop.permute.xlu0 %981 }
 0x236   :  { %1215 = vrot.lane.b32.xlu1 %v2090_v57, %s1523_s18  ;;  %v564_v57 = vmul.f32 %v2155_v3, %v2180_v44  ;;  %v562_v3 = vmul.f32 %v2098_v42, %v2184_v60 }
 0x237   :  { %v1004_v50 = vpop.permute.xlu2 %1003 }
 0x238   :  { %v758_v34 = vpop.permute.xlu1 %757 }
 0x239   :  { %v811_v24 = vadd.f32 %v758_v34, %v571_v48 }
 0x23b   :  { %v2318_v21 = vadd.f32 %v998_v23, %v811_v24  ;;  %v2564_v24 = vld [vmem:[#allocation23_spill] sm:$0xff] }
 0x23d   :  { %v1006_v49 = vpop.permute.xlu0 %1005 }
 0x23f   :  { %v742_v14 = vpop.permute.xlu2 %741 }
 0x240   :  { %v803_v5 = vadd.f32 %v742_v14, %v563_v46  ;;  %v978_v55 = vpop.permute.xlu1 %977 }
 0x241   :  { %v2322_v4 = vadd.f32 %v978_v55, %v801_v1  ;;  %v576_v1 = vmul.f32 %v2168_v51, %v2193_v15  ;;  %v574_v51 = vmul.f32 %v2564_v24, %v2197_v16 }
 0x242   :  { %v2324_v32 = vadd.f32 %v982_v6, %v803_v5 }
 0x245   :  { %v744_v12 = vpop.permute.xlu0 %743 }
 0x246   :  { %v804_v23 = vadd.f32 %v744_v12, %v564_v57 }
 0x247   :  { %v766_v39 = vpop.permute.xlu2 %765 }
 0x248   :  { %v815_v36 = vadd.f32 %v766_v39, %v575_v11  ;;  %v1002_v37 = vpop.permute.xlu1 %1001 }
 0x249   :  { %v2330_v61 = vadd.f32 %v1002_v37, %v813_v43 }
 0x24a   :  { %v2332_v40 = vadd.f32 %v1006_v49, %v815_v36 }
 0x24d   :  { %v768_v33 = vpop.permute.xlu0 %767 }
 0x24e   :  { %v816_v45 = vadd.f32 %v768_v33, %v576_v1 }
 0x24f   :  { %v1091_v41 = vpop.permute.xlu2 %1090 }
 0x250   :  { %v1161_v6 = vmul.f32 %v1091_v41, %v2126_v29  ;;  %v740_v58 = vpop.permute.xlu1 %739 }
 0x251   :  { %v802_v8 = vadd.f32 %v740_v58, %v562_v3 }
 0x252   :  { %1217 = vrot.lane.b32.xlu2 %v1161_v6, %s1523_s18 }
 0x253   :  { %v2340_v48 = vadd.f32 %v980_v13, %v802_v8 }
 0x255   :  { %v1095_v43 = vpop.permute.xlu0 %1094 }
 0x256   :  { %v1162_v34 = vmul.f32 %v1095_v43, %v2184_v60 }
 0x257   :  { %v1103_v49 = vpop.permute.xlu2 %1102 }
 0x258   :  { %v1164_v46 = vmul.f32 %v1103_v49, %v2180_v44  ;;  %1219 = vrot.lane.b32.xlu0 %v1162_v34, %s1523_s18  ;;  %v764_v42 = vpop.permute.xlu1 %763 }
 0x259   :  { %v814_v14 = vadd.f32 %v764_v42, %v574_v51 }
 0x25a   :  { %1223 = vrot.lane.b32.xlu2 %v1164_v46, %s1523_s18 }
 0x25b   :  { %v2348_v29 = vadd.f32 %v1004_v50, %v814_v14 }
 0x25d   :  { %v1107_v5 = vpop.permute.xlu0 %1106 }
 0x25e   :  { %v1165_v13 = vmul.f32 %v1107_v5, %v2020_v7 }
 0x25f   :  { %v1115_v55 = vpop.permute.xlu2 %1114 }
 0x260   :  { %v1167_v60 = vmul.f32 %v1115_v55, %v2022_v25  ;;  %1225 = vrot.lane.b32.xlu0 %v1165_v13, %s1523_s18  ;;  %v984_v57 = vpop.permute.xlu1 %983 }
 0x261   :  { %v2353_v12 = vadd.f32 %v984_v57, %v804_v23 }
 0x262   :  { %1229 = vrot.lane.b32.xlu2 %v1167_v60, %s1523_s18 }
 0x265   :  { %v1119_v44 = vpop.permute.xlu0 %1118 }
 0x266   :  { %v1168_v11 = vmul.f32 %v1119_v44, %v2081_v28 }
 0x267   :  { %v1127_v39 = vpop.permute.xlu2 %1126 }
 0x268   :  { %v1170_v50 = vmul.f32 %v1127_v39, %v2083_v56  ;;  %1231 = vrot.lane.b32.xlu0 %v1168_v11, %s1523_s18  ;;  %v1008_v36 = vpop.permute.xlu1 %1007 }
 0x269   :  { %v2359_v7 = vadd.f32 %v1008_v36, %v816_v45 }
 0x26a   :  { %1235 = vrot.lane.b32.xlu2 %v1170_v50, %s1523_s18 }
 0x26d   :  { %v1131_v25 = vpop.permute.xlu0 %1130 }
 0x26e   :  { %v1171_v37 = vmul.f32 %v1131_v25, %v2139_v53 }
 0x26f   :  { %v1139_v23 = vpop.permute.xlu2 %1138 }
 0x270   :  { %v1173_v1 = vmul.f32 %v1139_v23, %v2141_v63  ;;  %1237 = vrot.lane.b32.xlu0 %v1171_v37, %s1523_s18  ;;  %v1099_v33 = vpop.permute.xlu1 %1098 }
 0x271   :  { %v1163_v28 = vmul.f32 %v1099_v33, %v2153_v26 }
 0x272   :  { %1241 = vrot.lane.b32.xlu2 %v1173_v1, %s1523_s18 }
 0x273   :  { %1221 = vrot.lane.b32.xlu1 %v1163_v28, %s1523_s18 }
 0x275   :  { %v1143_v56 = vpop.permute.xlu0 %1142 }
 0x276   :  { %v1174_v45 = vmul.f32 %v1143_v56, %v2197_v16 }
 0x277   :  { %v1151_v3 = vpop.permute.xlu2 %1150 }
 0x278   :  { %v1176_v41 = vmul.f32 %v1151_v3, %v2193_v15  ;;  %1243 = vrot.lane.b32.xlu0 %v1174_v45, %s1523_s18  ;;  %v1111_v53 = vpop.permute.xlu1 %1110 }
 0x279   :  { %v1166_v63 = vmul.f32 %v1111_v53, %v1984_v20 }
 0x27a   :  { %1247 = vrot.lane.b32.xlu2 %v1176_v41, %s1523_s18 }
 0x27b   :  { %1227 = vrot.lane.b32.xlu1 %v1166_v63, %s1523_s18 }
 0x27d   :  { %v1202_v26 = vpop.permute.xlu0 %1201 }
 0x27e   :  { %v1273_v6 = vadd.f32 %v1202_v26, %v2233_v19 }
 0x27f   :  { %v1206_v58 = vpop.permute.xlu2 %1205 }
 0x280   :  { %v1297_v8 = vpack.c.bf16 %v1273_v6, %v1273_v6  ;;  %v1275_v16 = vadd.f32 %v1206_v58, %v2246_v22  ;;  %v1123_v43 = vpop.permute.xlu1 %1122 }
 0x281   :  { %v1169_v15 = vmul.f32 %v1123_v43, %v2052_v52 }
 0x282   :  { %1322 = vst.msk [vmem:[%s2505_s5] sm:$0xf] %vm1321_vm3, %v1297_v8  ;;  %v1299_v20 = vpack.c.bf16 %v1275_v16, %v1275_v16 }
 0x283   :  { %1233 = vrot.lane.b32.xlu1 %v1169_v15, %s1523_s18 }
 0x284   :  { %1324 = vst.msk [vmem:[%s2505_s5 + $0x8] sm:$0xf] %vm1321_vm3, %v1299_v20 }
 0x285   :  { %v1208_v19 = vpop.permute.xlu0 %1207 }
 0x286   :  { %v1276_v34 = vadd.f32 %v1208_v19, %v2274_v9 }
 0x287   :  { %v1212_v22 = vpop.permute.xlu2 %1211 }
 0x288   :  { %v1300_v24 = vpack.c.bf16 %v1276_v34, %v1276_v34  ;;  %v1278_v52 = vadd.f32 %v1212_v22, %v2287_v2  ;;  %v1135_v51 = vpop.permute.xlu1 %1134 }
 0x289   :  { %v1172_v49 = vmul.f32 %v1135_v51, %v2110_v27 }
 0x28a   :  { %1325 = vst.msk [vmem:[%s2505_s5 + $0xc] sm:$0xf] %vm1321_vm3, %v1300_v24  ;;  %v1302_v46 = vpack.c.bf16 %v1278_v52, %v1278_v52 }
 0x28b   :  { %1239 = vrot.lane.b32.xlu1 %v1172_v49, %s1523_s18 }
 0x28c   :  { %1327 = vst.msk [vmem:[%s2505_s5 + $0x14] sm:$0xf] %vm1321_vm3, %v1302_v46 }
 0x28d   :  { %v1214_v9 = vpop.permute.xlu0 %1213 }
 0x28e   :  { %v1279_v42 = vadd.f32 %v1214_v9, %v2312_v35 }
 0x290   :  { %v1303_v2 = vpack.c.bf16 %v1279_v42, %v1279_v42  ;;  %v1147_v14 = vpop.permute.xlu1 %1146 }
 0x291   :  { %v1175_v27 = vmul.f32 %v1147_v14, %v2162_v31 }
 0x292   :  { %1328 = vst.msk [vmem:[%s2505_s5 + $0x18] sm:$0xf] %vm1321_vm3, %v1303_v2 }
 0x293   :  { %1245 = vrot.lane.b32.xlu1 %v1175_v27, %s1523_s18 }
 0x298   :  { %v1204_v5 = vpop.permute.xlu1 %1203 }
 0x299   :  { %v1274_v13 = vadd.f32 %v1204_v5, %v2210_v59 }
 0x29b   :  { %v1298_v55 = vpack.c.bf16 %v1274_v13, %v1274_v13 }
 0x29d   :  { %1323 = vst.msk [vmem:[%s2505_s5 + $0x4] sm:$0xf] %vm1321_vm3, %v1298_v55 }
 0x2a0   :  { %v1210_v35 = vpop.permute.xlu1 %1209 }
 0x2a1   :  { %v1277_v60 = vadd.f32 %v1210_v35, %v2248_v30 }
 0x2a3   :  { %v1301_v31 = vpack.c.bf16 %v1277_v60, %v1277_v60 }
 0x2a5   :  { %1326 = vst.msk [vmem:[%s2505_s5 + $0x10] sm:$0xf] %vm1321_vm3, %v1301_v31 }
 0x2a8   :  { %v1216_v57 = vpop.permute.xlu1 %1215 }
 0x2a9   :  { %v1280_v44 = vadd.f32 %v1216_v57, %v2289_v0 }
 0x2ab   :  { %v1304_v11 = vpack.c.bf16 %v1280_v44, %v1280_v44 }
 0x2ac   :  { %v1218_v59 = vpop.permute.xlu2 %1217 }
 0x2ad   :  { %1329 = vst.msk [vmem:[%s2505_s5 + $0x1c] sm:$0xf] %vm1321_vm3, %v1304_v11  ;;  %v1281_v39 = vadd.f32 %v1218_v59, %v2322_v4 }
 0x2af   :  { %v1305_v50 = vpack.c.bf16 %v1281_v39, %v1281_v39 }
 0x2b1   :  { %1330 = vst.msk [vmem:[%s2505_s5 + $0x20] sm:$0xf] %vm1321_vm3, %v1305_v50 }
 0x2b4   :  { %v1224_v30 = vpop.permute.xlu2 %1223 }
 0x2b5   :  { %v1284_v36 = vadd.f32 %v1224_v30, %v2353_v12 }
 0x2b7   :  { %v1308_v25 = vpack.c.bf16 %v1284_v36, %v1284_v36 }
 0x2b9   :  { %1333 = vst.msk [vmem:[%s2505_s5 + $0x2c] sm:$0xf] %vm1321_vm3, %v1308_v25 }
 0x2bc   :  { %v1230_v0 = vpop.permute.xlu2 %1229 }
 0x2bd   :  { %v1287_v37 = vadd.f32 %v1230_v0, %v2260_v54 }
 0x2bf   :  { %v1311_v23 = vpack.c.bf16 %v1287_v37, %v1287_v37 }
 0x2c1   :  { %1336 = vst.msk [vmem:[%s2505_s5 + $0x38] sm:$0xf] %vm1321_vm3, %v1311_v23 }
 0x2c4   :  { %v1236_v4 = vpop.permute.xlu2 %1235 }
 0x2c5   :  { %v1290_v1 = vadd.f32 %v1236_v4, %v2301_v18 }
 0x2c7   :  { %v1314_v33 = vpack.c.bf16 %v1290_v1, %v1290_v1 }
 0x2c9   :  { %1339 = vst.msk [vmem:[%s2505_s5 + $0x44] sm:$0xf] %vm1321_vm3, %v1314_v33 }
 0x2ca   :  { %v1220_v12 = vpop.permute.xlu0 %1219 }
 0x2cb   :  { %v1282_v28 = vadd.f32 %v1220_v12, %v2340_v48 }
 0x2cc   :  { %v1242_v56 = vpop.permute.xlu2 %1241 }
 0x2cd   :  { %v1306_v54 = vpack.c.bf16 %v1282_v28, %v1282_v28  ;;  %v1293_v45 = vadd.f32 %v1242_v56, %v2330_v61 }
 0x2cf   :  { %1331 = vst.msk [vmem:[%s2505_s5 + $0x24] sm:$0xf] %vm1321_vm3, %v1306_v54  ;;  %v1317_v3 = vpack.c.bf16 %v1293_v45, %v1293_v45 }
 0x2d1   :  { %1342 = vst.msk [vmem:[%s2505_s5 + $0x50] sm:$0xf] %vm1321_vm3, %v1317_v3 }
 0x2d2   :  { %v1226_v18 = vpop.permute.xlu0 %1225 }
 0x2d3   :  { %v1285_v41 = vadd.f32 %v1226_v18, %v2241_v47 }
 0x2d4   :  { %v1248_v53 = vpop.permute.xlu2 %1247 }
 0x2d5   :  { %v1309_v48 = vpack.c.bf16 %v1285_v41, %v1285_v41  ;;  %v1296_v63 = vadd.f32 %v1248_v53, %v2359_v7 }
 0x2d7   :  { %1334 = vst.msk [vmem:[%s2505_s5 + $0x30] sm:$0xf] %vm1321_vm3, %v1309_v48  ;;  %v1320_v61 = vpack.c.bf16 %v1296_v63, %v1296_v63 }
 0x2d9   :  { %1345 = vst.msk [vmem:[%s2505_s5 + $0x5c] sm:$0xf] %vm1321_vm3, %v1320_v61 }
 0x2da   :  { %v1232_v26 = vpop.permute.xlu0 %1231 }
 0x2db   :  { %v1288_v6 = vadd.f32 %v1232_v26, %v2282_v62 }
 0x2dd   :  { %v1312_v58 = vpack.c.bf16 %v1288_v6, %v1288_v6 }
 0x2df   :  { %1337 = vst.msk [vmem:[%s2505_s5 + $0x3c] sm:$0xf] %vm1321_vm3, %v1312_v58 }
 0x2e2   :  { %v1238_v47 = vpop.permute.xlu0 %1237 }
 0x2e3   :  { %v1291_v7 = vadd.f32 %v1238_v47, %v2318_v21 }
 0x2e5   :  { %v1315_v8 = vpack.c.bf16 %v1291_v7, %v1291_v7  ;;  %v1222_v16 = vpop.permute.xlu1 %1221 }
 0x2e6   :  { %v1283_v43 = vadd.f32 %v1222_v16, %v2324_v32 }
 0x2e7   :  { %1340 = vst.msk [vmem:[%s2505_s5 + $0x48] sm:$0xf] %vm1321_vm3, %v1315_v8 }
 0x2e8   :  { %v1307_v15 = vpack.c.bf16 %v1283_v43, %v1283_v43 }
 0x2ea   :  { %1332 = vst.msk [vmem:[%s2505_s5 + $0x28] sm:$0xf] %vm1321_vm3, %v1307_v15  ;;  %v1244_v62 = vpop.permute.xlu0 %1243 }
 0x2eb   :  { %v1294_v20 = vadd.f32 %v1244_v62, %v2348_v29 }
 0x2ed   :  { %v1318_v19 = vpack.c.bf16 %v1294_v20, %v1294_v20  ;;  %v1228_v21 = vpop.permute.xlu1 %1227 }
 0x2ee   :  { %v1286_v34 = vadd.f32 %v1228_v21, %v2222_v17 }
 0x2ef   :  { %1343 = vst.msk [vmem:[%s2505_s5 + $0x54] sm:$0xf] %vm1321_vm3, %v1318_v19 }
 0x2f0   :  { %v1310_v32 = vpack.c.bf16 %v1286_v34, %v1286_v34 }
 0x2f2   :  { %1335 = vst.msk [vmem:[%s2505_s5 + $0x34] sm:$0xf] %vm1321_vm3, %v1310_v32 }
 0x2f5   :  { %v1234_v22 = vpop.permute.xlu1 %1233 }
 0x2f6   :  { %v1289_v24 = vadd.f32 %v1234_v22, %v2262_v10 }
 0x2f8   :  { %v1313_v52 = vpack.c.bf16 %v1289_v24, %v1289_v24 }
 0x2fa   :  { %1338 = vst.msk [vmem:[%s2505_s5 + $0x40] sm:$0xf] %vm1321_vm3, %v1313_v52 }
 0x2fd   :  { %v1240_v17 = vpop.permute.xlu1 %1239 }
 0x2fe   :  { %v1292_v29 = vadd.f32 %v1240_v17, %v2303_v38 }
 0x300   :  { %v1316_v51 = vpack.c.bf16 %v1292_v29, %v1292_v29 }
 0x302   :  { %1341 = vst.msk [vmem:[%s2505_s5 + $0x4c] sm:$0xf] %vm1321_vm3, %v1316_v51 }
 0x305   :  { %v1246_v49 = vpop.permute.xlu1 %1245 }
 0x306   :  { %v1295_v46 = vadd.f32 %v1246_v49, %v2332_v40 }
 0x308   :  { %v1319_v9 = vpack.c.bf16 %v1295_v46, %v1295_v46 }
 0x30a   :  { %1344 = vst.msk [vmem:[%s2505_s5 + $0x58] sm:$0xf] %vm1321_vm3, %v1319_v9 }

// kernel: vae_forward.7
= control target key start
LH: loop header
LB: loop body
LE: loop exit
PB: predicated region body
PF: predicated region fallthrough
CT: control target
= control target key end

     0   :  { %s1160_s28 = smov [#allocation3]   ;;  %s1390_s0 = inlined_call_operand.vmem [shape: s32[2], index: 0, kind: input, shape index: {}]   ;;  %s1391_s1 = inlined_call_operand.vmem [shape: bf16[2,96,32], index: 1, kind: input, shape index: {}]   ;;  %s1392_s2 = inlined_call_operand.vmem [shape: f32[2,32,4], index: 2, kind: input, shape index: {}]   ;;  %s1393_s3 = inlined_call_operand.vmem [shape: bf16[32,96], index: 3, kind: input, shape index: {}]   ;;  %s1394_s4 = inlined_call_operand.vmem [shape: bf16[32,32], index: 4, kind: input, shape index: {}]   ;;  %s1395_s5 = inlined_call_operand.vmem [shape: f32[1,32], index: 5, kind: input, shape index: {}]   ;;  %s1396_s6 = inlined_call_operand.vmem [shape: bf16[32,4], index: 6, kind: input, shape index: {}]   ;;  %s1397_s7 = inlined_call_operand.vmem [shape: f32[1,4], index: 7, kind: input, shape index: {}]   ;;  %s1398_s8 = inlined_call_operand.vmem [shape: f32[4,32,32], index: 8, kind: input, shape index: {}]   ;;  %s1399_s9 = inlined_call_operand.vmem [shape: f32[1,32], index: 9, kind: input, shape index: {}]   ;;  %s1400_s10 = inlined_call_operand.vmem [shape: bf16[32,3], index: 10, kind: input, shape index: {}]   ;;  %s1401_s11 = inlined_call_operand.vmem [shape: f32[1,3], index: 11, kind: input, shape index: {}]   ;;  %s1402_s12 = inlined_call_operand.vmem [shape: f32[2,8,128], index: 12, kind: output, shape index: {0}]   ;;  %s1403_s13 = inlined_call_operand.vmem [shape: f32[2,8,128], index: 13, kind: output, shape index: {1}]  }
   0x1   :  { %s20_s27 = sshll.u32 %s1390_s0, 4  ;;  %s21_s27 = int_to_ptr.vmem [resolvable:$true] %s20_s27 }
   0x2   :  { %23 = dma.vmem_to_smem %s21_s27, 16, %s1160_s28, [#allocation2] }
   0x3   :  { %1154 = dma.done.wait [#allocation2], 16 }
   0x4   :  { %1155 = vsyncadd [#allocation2], 4294967280 }
   0x5   :  { %26 = sfence }
   0x6   :  { %s1238_s29 = smov 0  }
   0x7 LB: > { %s1244_s30 = sadd.s32 4294967295, %s1158_s29   ;;  %p1001_p0 = scmp.ge.s32.totalorder %s1158_s29, 1  ;;  %s1158_s29 = sphi %s1238_s29, %s32_s29  }
   0x8   : > { %p384_p1 = scmp.lt.s32.totalorder %s1158_s29, 3 }
   0xa   : > { %p385_p2 = pnand %p1001_p0, %p384_p1 }
   0xb   : > { %p434_p3 = scmp.lt.s32.totalorder (!%p385_p2), %s1244_s30, 1  ;;  %s886_s22 = sld [smem:[#allocation3 + %s1244_s30]] (!%p385_p2) }
   0xc   : > { %388 = sbr.rel (%p385_p2) target bundleno = 1092 (0x444), region = 64 }
  0x11   : > { %s1250_s0 = scalar_select %p434_p3, %s1244_s30, 1  ;;  %v1085_v6 = vld [vmem:[%s1393_s3] sm:$0xff]  ;;  %vm515_vm0 = vcmask 785408   ;;  %v1086_v7 = vld [vmem:[%s1393_s3 + $0x8] sm:$0xff]  ;;  %vm563_vm1 = vcmask 261120   ;;  %v1161_v33 = vmov 1  }
  0x12   : > { %v1094_v8 = vld [vmem:[%s1394_s4 + $0x8] sm:$0xff]  ;;  %v1093_v9 = vld [vmem:[%s1394_s4] sm:$0xff]  ;;  %1118 = vset.pattern.permute.xlu1 %v1161_v33  ;;  %v1162_v34 = vmov 0   ;;  %1120 = vset.pattern.permute.xlu2 %v1161_v33  ;;  %vm652_vm2 = vcmask 31744   ;;  %v1163_v48 = vmov 2   ;;  %v1164_v58 = vmov 3  }
  0x13   : > { %s1099_s14 = smul.u32 48, %s1250_s0  ;;  %576 = vmatpush.bf16.msra.mxu1 %v1094_v8  ;;  %v1096_v16 = vld [vmem:[%s1396_s6 + $0x8] sm:$0xff]  ;;  %v1095_v17 = vld [vmem:[%s1396_s6] sm:$0xff]  ;;  %1117 = vset.pattern.permute.xlu0 %v1162_v34  ;;  %s1005_s16 = sshll.u32 %s1250_s0, 3  ;;  %vm873_vm3 = vcmask 16384  }
  0x14   : > { %627 = vmatpush.bf16.msra.mxu2 %v1096_v16  ;;  %v1131_v19 = vld [vmem:[%s1395_s5] ss:$0 sm:$0xff]  ;;  %s451_s27 = scalar_lea.vmem %s1403_s13, %s1005_s16 }
  0x15   : > { %s438_s17 = scalar_lea.vmem %s1391_s1, %s1099_s14  ;;  %v1132_v35 = vld [vmem:[%s1397_s7] ss:$0 sm:$0xff] }
  0x16   : > { %v1092_v0 = vld [vmem:[%s438_s17 + $0x28] sm:$0xff]  ;;  %v1091_v1 = vld [vmem:[%s438_s17 + $0x20] sm:$0xff]  ;;  %v1090_v2 = vld [vmem:[%s438_s17 + $0x18] sm:$0xff] }
  0x17   : > { %524 = vmatpush.bf16.msra.mxu0 %v1092_v0  ;;  %v1089_v3 = vld [vmem:[%s438_s17 + $0x10] sm:$0xff]  ;;  %v1088_v4 = vld [vmem:[%s438_s17 + $0x8] sm:$0xff]  ;;  %v1087_v5 = vld [vmem:[%s438_s17] sm:$0xff]  ;;  %577 = vmatpush.bf16.msra.mxu1 %v1093_v9  ;;  %s1084_s17 = sshll.u32 %s1250_s0, 5 }
  0x18   : > { %628 = vmatpush.bf16.msra.mxu2 %v1095_v17  ;;  %s1285_s20 = scalar_lea.vmem %s1392_s2, %s1084_s17  ;;  %v673_v9 = vld [vmem:[%s1398_s8] sm:$0xff] }
  0x19   : > { %v640_v37 = vld [vmem:[%s1285_s20] sm:$0xff]  ;;  %v641_v41 = vld [vmem:[%s1285_s20 + $0x8] sm:$0xff]  ;;  %v642_v51 = vld [vmem:[%s1285_s20 + $0x10] sm:$0xff] }
  0x1a   : > { %v643_v60 = vld [vmem:[%s1285_s20 + $0x18] sm:$0xff]  ;;  %v1065_v17 = vld [vmem:[%s1398_s8 + $0x40] sm:$0xff]  ;;  %s447_s20 = scalar_lea.vmem %s1402_s12, %s1005_s16 }
  0x1b   : > { %525 = vmatpush.bf16.msra.mxu0 %v1091_v1 }
  0x1f   : > { %526 = vmatpush.bf16.msra.mxu0 %v1090_v2 }
  0x23   : > { %527 = vmatpush.bf16.msra.mxu0 %v1089_v3 }
  0x27   : > { %528 = vmatpush.bf16.msra.mxu0 %v1088_v4 }
  0x2b   : > { %529 = vmatpush.bf16.msra.mxu0 %v1087_v5 }
  0x2e   : > { %1039 = vmatmul.msk.bf16.vlgmr.msra.gmra.mxu0 %vm515_vm0, %v1085_v6 }
  0x3e   : > { %1040 = vmatmul.msk.bf16.gmra.mxu0 %vm515_vm0, %v1086_v7  ;;  %v674_v7 = vld [vmem:[%s1398_s8 + $0x8] sm:$0xff] }
  0xab   : > { %v531_v10 = vpop.f32.mrf.mxu0 }
  0xb3   : > { %v533_v11 = vpop.f32.mrf.mxu0 }
  0xb4   : > { %v541_v12 = vpack.c.bf16 %v533_v11, %v531_v10  ;;  %v675_v11 = vld [vmem:[%s1398_s8 + $0x10] sm:$0xff] }
  0xb6   : > { %1049 = vmatmul.msk.bf16.vlgmr.msra.gmra.mxu1 %vm563_vm1, %v541_v12 }
  0xbb   : > { %v536_v13 = vpop.f32.mrf.mxu0 }
  0xc3   : > { %v538_v14 = vpop.f32.mrf.mxu0 }
  0xc4   : > { %v542_v15 = vpack.c.bf16 %v538_v14, %v536_v13 }
  0xc6   : > { %1050 = vmatmul.msk.bf16.gmra.mxu1 %vm563_vm1, %v542_v15 }
 0x133   : > { %v579_v18 = vpop.f32.mrf.mxu1 }
 0x134   : > { %v580_v20 = vadd.f32 %v1131_v19, %v579_v18  ;;  %v676_v18 = vld [vmem:[%s1398_s8 + $0x18] sm:$0xff] }
 0x136   : > { %v589_v23 = vmax.f32 %v580_v20, 0.0 }
 0x13b   : > { %v581_v21 = vpop.f32.mrf.mxu1 }
 0x13c   : > { %v582_v22 = vadd.f32 %v1131_v19, %v581_v21  ;;  %v1066_v21 = vld [vmem:[%s1398_s8 + $0x48] sm:$0xff] }
 0x13e   : > { %v590_v24 = vmax.f32 %v582_v22, 0.0 }
 0x140   : > { %v593_v25 = vpack.c.bf16 %v590_v24, %v589_v23 }
 0x142   : > { %1059 = vmatmul.msk.bf16.vlgmr.msra.gmra.mxu2 %vm563_vm1, %v593_v25 }
 0x143   : > { %v584_v26 = vpop.f32.mrf.mxu1 }
 0x144   : > { %v585_v27 = vadd.f32 %v1131_v19, %v584_v26  ;;  %v1098_v26 = vld [vmem:[%s1400_s10 + $0x8] sm:$0xff] }
 0x145   : > { %866 = vmatpush.bf16.msra.mxu3 %v1098_v26 }
 0x146   : > { %v591_v30 = vmax.f32 %v585_v27, 0.0 }
 0x14b   : > { %v586_v28 = vpop.f32.mrf.mxu1 }
 0x14c   : > { %v587_v29 = vadd.f32 %v1131_v19, %v586_v28  ;;  %v1061_v28 = vld [vmem:[%s1398_s8 + $0x20] sm:$0xff] }
 0x14e   : > { %v592_v31 = vmax.f32 %v587_v29, 0.0 }
 0x150   : > { %v594_v32 = vpack.c.bf16 %v592_v31, %v591_v30  ;;  %v1067_v30 = vld [vmem:[%s1398_s8 + $0x50] sm:$0xff]  ;;  %v1068_v31 = vld [vmem:[%s1398_s8 + $0x58] sm:$0xff] }
 0x152   : > { %1060 = vmatmul.msk.bf16.gmra.mxu2 %vm563_vm1, %v594_v32 }
 0x1c5   : > { %v630_v36 = vpop.f32.mrf.mxu2 }
 0x1c6   : > { %v631_v38 = vadd.f32 %v1132_v35, %v630_v36 }
 0x1c8   : > { %v644_v39 = vadd.f32 %v640_v37, %v631_v38  ;;  %v648_v42 = vmul.f32 %v631_v38, %v631_v38  ;;  %v1063_v38 = vld [vmem:[%s1398_s8 + $0x30] sm:$0xff] }
 0x1ca   : > { %721 = vperm.xlu1 %1118, %v644_v39   ;;  %679 = vperm.xlu0 %1117, %v644_v39   ;;  %v653_v46 = vsel %vm652_vm2, %v648_v42, 0.0 }
 0x1cd   : > { %v632_v40 = vpop.f32.mrf.mxu2 }
 0x1ce   : > { %v633_v43 = vadd.f32 %v1132_v35, %v632_v40 }
 0x1d0   : > { %v645_v44 = vadd.f32 %v641_v41, %v633_v43  ;;  %v649_v45 = vmul.f32 %v633_v43, %v633_v43 }
 0x1d2   : > { %v654_v47 = vsel %vm652_vm2, %v649_v45, 0.0  ;;  %725 = vperm.xlu2 %1120, %v645_v44   ;;  %1119 = vset.pattern.permute.xlu1 %v1163_v48 }
 0x1d3   : > { %684 = vperm.xlu0 %1117, %v645_v44   ;;  %760 = vperm.xlu1 %1119, %v644_v39   ;;  %v655_v49 = vadd.f32 %v654_v47, %v653_v46 }
 0x1d5   : > { %v635_v50 = vpop.f32.mrf.mxu2 }
 0x1d6   : > { %v636_v52 = vadd.f32 %v1132_v35, %v635_v50 }
 0x1d8   : > { %v646_v53 = vadd.f32 %v642_v51, %v636_v52  ;;  %v650_v54 = vmul.f32 %v636_v52, %v636_v52  ;;  %v1064_v51 = vld [vmem:[%s1398_s8 + $0x38] sm:$0xff] }
 0x1da   : > { %1121 = vset.pattern.permute.xlu2 %v1163_v48  ;;  %v656_v55 = vsel %vm652_vm2, %v650_v54, 0.0 }
 0x1db   : > { %1123 = vset.pattern.permute.xlu0 %v1161_v33  ;;  %764 = vperm.xlu2 %1121, %v645_v44   ;;  %v657_v56 = vadd.f32 %v656_v55, %v655_v49 }
 0x1dc   : > { %1122 = vset.pattern.permute.xlu1 %v1162_v34  ;;  %729 = vperm.xlu0 %1123, %v646_v53  }
 0x1dd   : > { %689 = vperm.xlu1 %1122, %v646_v53   ;;  %v637_v57 = vpop.f32.mrf.mxu2 }
 0x1de   : > { %v638_v59 = vadd.f32 %v1132_v35, %v637_v57  ;;  %v1062_v35 = vld [vmem:[%s1398_s8 + $0x28] sm:$0xff] }
 0x1e0   : > { %v647_v61 = vadd.f32 %v643_v60, %v638_v59  ;;  %v651_v62 = vmul.f32 %v638_v59, %v638_v59  ;;  %v1069_v59 = vld [vmem:[%s1398_s8 + $0x60] sm:$0xff] }
 0x1e2   : > { %v658_v63 = vsel %vm652_vm2, %v651_v62, 0.0 }
 0x1e3   : > { %768 = vperm.xlu2 %1121, %v646_v53   ;;  %v659_v0 = vadd.f32 %v658_v63, %v657_v56 }
 0x1e4   : > { %1124 = vset.pattern.permute.xlu0 %v1164_v58 }
 0x1e5   : > { %799 = vperm.xlu0 %1124, %v644_v39   ;;  %1125 = vset.pattern.permute.xlu1 %v1164_v58 }
 0x1e6   : > { %803 = vperm.xlu1 %1125, %v645_v44  }
 0x1eb   : > { %1126 = vset.pattern.permute.xlu2 %v1162_v34  ;;  %v1097_v34 = vld [vmem:[%s1400_s10] sm:$0xff] }
 0x1ec   : > { %694 = vperm.xlu2 %1126, %v647_v61   ;;  %867 = vmatpush.bf16.msra.mxu3 %v1097_v34 }
 0x1ee   : > { %1127 = vset.pattern.permute.xlu1 %v1161_v33 }
 0x1ef   : > { %733 = vperm.xlu1 %1127, %v647_v61  }
 0x1f4   : > { %1129 = vset.pattern.permute.xlu2 %v1163_v48 }
 0x1f5   : > { %772 = vperm.xlu2 %1129, %v647_v61  }
 0x1f7   : > { %1128 = vset.pattern.permute.xlu1 %v1164_v58 }
 0x1f8   : > { %807 = vperm.xlu1 %1128, %v646_v53  }
 0x1fd   : > { %1130 = vset.pattern.permute.xlu2 %v1164_v58 }
 0x1fe   : > { %811 = vperm.xlu2 %1130, %v647_v61   ;;  %v1070_v61 = vld [vmem:[%s1398_s8 + $0x68] sm:$0xff] }
 0x227   : > { %660 = vadd.xlane.f32.xlu2 %v659_v0 }
 0x22c   : > { %v726_v1 = vpop.permute.xlu2 %725 }
 0x22d   : > { %v737_v44 = vmul.f32 %v1062_v35, %v726_v1 }
 0x22f   : > { %v741_v52 = vsel %vm563_vm1, %v737_v44, 0.0 }
 0x235   : > { %v765_v2 = vpop.permute.xlu2 %764 }
 0x236   : > { %v776_v27 = vmul.f32 %v1066_v21, %v765_v2 }
 0x238   : > { %v780_v41 = vsel %vm563_vm1, %v776_v27, 0.0 }
 0x23c   : > { %v722_v3 = vpop.permute.xlu1 %721  ;;  %v680_v4 = vpop.permute.xlu0 %679 }
 0x23d   : > { %v769_v5 = vpop.permute.xlu2 %768  ;;  %v697_v13 = vmul.f32 %v680_v4, %v673_v9  ;;  %v736_v39 = vmul.f32 %v1061_v28, %v722_v3  ;;  %v1071_v9 = vld [vmem:[%s1398_s8 + $0x70] sm:$0xff] }
 0x23e   : > { %v777_v42 = vmul.f32 %v1067_v30, %v769_v5 }
 0x23f   : > { %v701_v19 = vsel %vm563_vm1, %v697_v13, 0.0  ;;  %v740_v47 = vsel %vm563_vm1, %v736_v39, 0.0 }
 0x240   : > { %v782_v49 = vsel %vm563_vm1, %v777_v42, 0.0  ;;  %v742_v55 = vadd.f32 %v741_v52, %v740_v47 }
 0x245   : > { %v761_v6 = vpop.permute.xlu1 %760  ;;  %v685_v8 = vpop.permute.xlu0 %684 }
 0x246   : > { %v698_v10 = vmul.f32 %v685_v8, %v674_v7  ;;  %v695_v12 = vpop.permute.xlu2 %694  ;;  %v775_v23 = vmul.f32 %v1065_v17, %v761_v6  ;;  %v1072_v7 = vld [vmem:[%s1398_s8 + $0x78] sm:$0xff] }
 0x247   : > { %v700_v24 = vmul.f32 %v695_v12, %v676_v18 }
 0x248   : > { %v702_v16 = vsel %vm563_vm1, %v698_v10, 0.0  ;;  %v779_v36 = vsel %vm563_vm1, %v775_v23, 0.0 }
 0x249   : > { %v703_v22 = vadd.f32 %v702_v16, %v701_v19  ;;  %v706_v37 = vsel %vm563_vm1, %v700_v24, 0.0  ;;  %v781_v45 = vadd.f32 %v780_v41, %v779_v36 }
 0x24b   : > { %v783_v54 = vadd.f32 %v782_v49, %v781_v45 }
 0x24e   : > { %v730_v29 = vpop.permute.xlu0 %729 }
 0x24f   : > { %v690_v14 = vpop.permute.xlu1 %689  ;;  %v773_v32 = vpop.permute.xlu2 %772  ;;  %v738_v46 = vmul.f32 %v1063_v38, %v730_v29 }
 0x250   : > { %v699_v15 = vmul.f32 %v690_v14, %v675_v11  ;;  %v778_v43 = vmul.f32 %v1068_v31, %v773_v32  ;;  %v672_v31 = vld [vmem:[%s1399_s9] sm:$0x1] }
 0x251   : > { %v743_v53 = vsel %vm563_vm1, %v738_v46, 0.0 }
 0x252   : > { %v704_v20 = vsel %vm563_vm1, %v699_v15, 0.0  ;;  %v784_v50 = vsel %vm563_vm1, %v778_v43, 0.0  ;;  %v744_v63 = vadd.f32 %v743_v53, %v742_v55  ;;  %v887_v55 = vlaneseq }
 0x253   : > { %v705_v25 = vadd.f32 %v704_v20, %v703_v22  ;;  %v785_v58 = vadd.f32 %v784_v50, %v783_v54 }
 0x255   : > { %v707_v40 = vadd.f32 %v706_v37, %v705_v25  ;;  %v786_v5 = vrot.slane %v785_v58, 4 }
 0x257   : > { %v708_v48 = vrot.slane %v707_v40, 4  ;;  %v800_v60 = vpop.permute.xlu0 %799  ;;  %v787_v14 = vadd.f32 %v786_v5, %v785_v58  ;;  %v889_v58 = vstv %s886_s22 }
 0x258   : > { %v804_v33 = vpop.permute.xlu1 %803  ;;  %v814_v1 = vmul.f32 %v1069_v59, %v800_v60  ;;  %v812_v8 = vpop.permute.xlu2 %811 }
 0x259   : > { %v709_v57 = vadd.f32 %v708_v48, %v707_v40  ;;  %v815_v2 = vmul.f32 %v1070_v61, %v804_v33  ;;  %v817_v16 = vmul.f32 %v1072_v7, %v812_v8  ;;  %v788_v23 = vrot.slane %v787_v14, 2 }
 0x25a   : > { %v818_v10 = vsel %vm563_vm1, %v814_v1, 0.0 }
 0x25b   : > { %v710_v4 = vrot.slane %v709_v57, 2  ;;  %v819_v11 = vsel %vm563_vm1, %v815_v2, 0.0  ;;  %v823_v25 = vsel %vm563_vm1, %v817_v16, 0.0  ;;  %v789_v29 = vadd.f32 %v788_v23, %v787_v14 }
 0x25c   : > { %v820_v19 = vadd.f32 %v819_v11, %v818_v10 }
 0x25d   : > { %v711_v13 = vadd.f32 %v710_v4, %v709_v57  ;;  %v790_v34 = vrot.slane %v789_v29, 1  ;;  %v1133_v57 = vld [vmem:[%s1401_s11] ss:$0 sm:$0xff] }
 0x25f   : > { %v712_v22 = vrot.slane %v711_v13, 1  ;;  %v791_v39 = vadd.f32 %v790_v34, %v789_v29 }
 0x261   : > { %v734_v56 = vpop.permute.xlu1 %733  ;;  %v713_v28 = vadd.f32 %v712_v22, %v711_v13 }
 0x262   : > { %v739_v62 = vmul.f32 %v1064_v51, %v734_v56  ;;  %v888_v56 = vand.u32 127, %v887_v55 }
 0x263   : > { %v714_v36 = vadd.f32 %v713_v28, %v672_v31 }
 0x264   : > { %v745_v0 = vsel %vm563_vm1, %v739_v62, 0.0  ;;  %vm890_vm4 = vcmp.eq.s32.totalorder %v888_v56, %v889_v58 }
 0x265   : > { %v746_v3 = vadd.f32 %v745_v0, %v744_v63 }
 0x267   : > { %v747_v6 = vrot.slane %v746_v3, 4 }
 0x269   : > { %v748_v12 = vadd.f32 %v747_v6, %v746_v3 }
 0x26a   : > { %v808_v15 = vpop.permute.xlu1 %807 }
 0x26b   : > { %v749_v17 = vrot.slane %v748_v12, 2  ;;  %v816_v18 = vmul.f32 %v1071_v9, %v808_v15 }
 0x26d   : > { %v750_v20 = vadd.f32 %v749_v17, %v748_v12  ;;  %v821_v21 = vsel %vm563_vm1, %v816_v18, 0.0 }
 0x26e   : > { %v822_v24 = vadd.f32 %v821_v21, %v820_v19 }
 0x26f   : > { %v751_v26 = vrot.slane %v750_v20, 1 }
 0x270   : > { %v824_v27 = vadd.f32 %v823_v25, %v822_v24 }
 0x271   : > { %v752_v32 = vadd.f32 %v751_v26, %v750_v20 }
 0x272   : > { %v825_v30 = vrot.slane %v824_v27, 4 }
 0x273   : > { %v753_v37 = vadd.f32 %v752_v32, %v714_v36 }
 0x274   : > { %v826_v33 = vadd.f32 %v825_v30, %v824_v27 }
 0x275   : > { %v792_v41 = vadd.f32 %v791_v39, %v753_v37 }
 0x276   : > { %v827_v35 = vrot.slane %v826_v33, 2 }
 0x278   : > { %v828_v38 = vadd.f32 %v827_v35, %v826_v33 }
 0x27a   : > { %v829_v40 = vrot.slane %v828_v38, 1 }
 0x27c   : > { %v830_v42 = vadd.f32 %v829_v40, %v828_v38 }
 0x27e   : > { %v831_v43 = vadd.f32 %v830_v42, %v792_v41 }
 0x280   : > { %v832_v44 = vmax.f32 %v831_v43, 0.0 }
 0x282   : > { %v834_v45 = vperm.slane %v832_v44, 0 }
 0x284   : > { %v836_v46 = vpack.c.bf16 %v834_v45, %v834_v45 }
 0x286   : > { %1081 = vmatmul.msk.bf16.vlgmr.msra.gmra.mxu3 %vm563_vm1, %v836_v46 }
 0x29a   : > { %v661_v47 = vpop.xlane.xlu2 %660 }
 0x29b   : > { %v662_v48 = vrot.slane %v661_v47, 4 }
 0x29d   : > { %v663_v49 = vadd.f32 %v662_v48, %v661_v47 }
 0x29f   : > { %v664_v50 = vrot.slane %v663_v49, 2 }
 0x2a1   : > { %v665_v51 = vadd.f32 %v664_v50, %v663_v49 }
 0x2a3   : > { %v666_v52 = vrot.slane %v665_v51, 1 }
 0x2a5   : > { %v667_v53 = vadd.f32 %v666_v52, %v665_v51 }
 0x2a7   : > { %1100 = vpush %v667_v53 }
 0x2d8   : > { %s1101_s17 = spop %1100 }
 0x2d9   : > { %s669_s21 = smul.f32 0.00390625, %s1101_s17 }
 0x2db   : > { %v670_v54 = vstv %s669_s21 }
 0x2dc   : > { %671 = vst [vmem:[%s447_s20] sm:$0xff] %v670_v54 }
 0x309   : > { %v869_v59 = vpop.f32.mrf.mxu3 }
 0x30a   : > { %v870_v60 = vadd.f32 %v1133_v57, %v869_v59 }
 0x30c   : > { %v874_v61 = vsel %vm873_vm3, %v870_v60, -inf  ;;  %v891_v62 = vsel %vm890_vm4, %v870_v60, 0.0 }
 0x30d   : > { %875 = vmax.xlane.f32.xlu0 %v874_v61  ;;  %v892_v63 = vsel %vm873_vm3, %v891_v62, 0.0 }
 0x30e   : > { %893 = vadd.xlane.f32.xlu2 %v892_v63 }
 0x311   : > { %v871_v0 = vpop.f32.mrf.mxu3 }
 0x380   : > { %v876_v1 = vpop.xlane.xlu0 %875 }
 0x381   : > { %v877_v2 = vsub.f32 %v870_v60, %v876_v1  ;;  %v894_v10 = vpop.xlane.xlu2 %893 }
 0x383   : > { %v878_v3 = vmul.f32 1.442695, %v877_v2 }
 0x385   : > { %1134 = vpow2.f32 %v878_v3 }
 0x38b   : > { %v1135_v4 = vpop.eup %1134 }
 0x38c   : > { %v880_v5 = vsel %vm873_vm3, %v1135_v4, 0.0 }
 0x38d   : > { %881 = vadd.xlane.f32.xlu1 %v880_v5 }
 0x400   : > { %v882_v6 = vpop.xlane.xlu1 %881 }
 0x401   : > { %1136 = vlog2.f32 %v882_v6 }
 0x407   : > { %v1137_v7 = vpop.eup %1136 }
 0x408   : > { %v884_v8 = vmul.f32 0.6931472, %v1137_v7 }
 0x40a   : > { %v885_v9 = vadd.f32 %v884_v8, %v876_v1 }
 0x40c   : > { %v895_v11 = vsub.f32 %v885_v9, %v894_v10 }
 0x40e   : > { %1102 = vpush %v895_v11 }
 0x43f   : > { %s1103_s30 = spop %1102 }
 0x440   : > { %s898_s28 = smul.f32 0.5, %s1103_s30 }
 0x442   : > { %v899_v12 = vstv %s898_s28 }
 0x443   : > { %900 = vst [vmem:[%s451_s27] sm:$0xff] %v899_v12 }
 0x444 PF: > { %s32_s29 = sadd.s32 1, %s1158_s29  }
 0x445   : > { %p29_p4 = scmp.ge.s32.totalorder %s32_s29, 4  }
 0x447   :  { %31 = sbr.rel (!%p29_p4) target bundleno = 7 (0x7), region = 112 }

</bundles_post_ra>
